<compile_context>
chip_gen: v7x
topology: tpu7x:2x2x1
jax: 0.10.0
libtpu: 0.0.40
codegen_flags: <defaults>
</compile_context>

<pallas_src>
import functools

import jax
import jax.numpy as jnp
from jax.experimental import pallas as pl
from jax.experimental.pallas import tpu as pltpu


def _round_up(v, m):
    return (v + m - 1) // m * m


# ----------------------------------------------------------------------------
# Fused IRBlock kernel (one batch element per grid step).
# ----------------------------------------------------------------------------
def _ir_block_kernel(x_ref, mask_ref, w1_ref, w2_ref, bn_ref,
                     fc1w_ref, fc1b_ref, fc2w_ref, fc2b_ref,
                     alpha_ref, se_alpha_ref,
                     o_ref,
                     buf_a, buf_b,
                     *, H, W, Wp):
    # x_ref:    (1, SP, C)  zero-padded input canvas, flattened (row = a*Wp + b)
    # mask_ref: (SP, 1)     1.0 at interior canvas positions, 0.0 at pad border/tail
    # w1_ref/w2_ref: (9, C, C) bf16 conv weights, tap k = kh*3 + kw
    # bn_ref:   (6, C)      rows: s0, b0, s1, b1, s2, b2  (folded BatchNorm)
    # fc1w_ref: (Cr, C)     SE fc1 weight, transposed;  fc1b_ref: (Cr, 1)
    # fc2w_ref: (Cr, C);    fc2b_ref: (1, C)
    # alpha_ref / se_alpha_ref: (1,) f32 scalars in SMEM (PReLU slopes)
    # o_ref:    (1, S, C)   output slab, S = H*Wp (2 garbage columns/row, dropped later)
    # buf_a/buf_b: (SP, C)  f32 VMEM canvases for conv1 / conv2 inputs
    S = H * Wp
    off0 = Wp + 1                                   # canvas offset of image (0, 0)
    f32 = jnp.float32

    alpha = alpha_ref[0]
    se_alpha = se_alpha_ref[0]
    s0 = bn_ref[0:1, :]; b0 = bn_ref[1:2, :]
    s1 = bn_ref[2:3, :]; b1 = bn_ref[3:4, :]
    s2 = bn_ref[4:5, :]; b2 = bn_ref[5:6, :]

    mask = mask_ref[...]                            # (SP, 1)
    mask_s = mask_ref[off0:off0 + S, :]             # (S, 1) valid-column mask in slab form

    # ---- bn0 + zero padding: one full-slab store (border/tail masked to 0) ----
    x = x_ref[0]                                    # (SP, C) f32
    buf_a[...] = (x * s0 + b0) * mask

    def conv3x3(buf, w_ref):
        # out[j] = sum_k buf[j + kh*Wp + kw] @ W[k]  with j = h*Wp + w.
        # 9 shifted-slab matmuls of (S, C) x (C, C): bf16 operands, f32 accumulation.
        acc = None
        for k in range(9):
            off = (k // 3) * Wp + (k % 3)
            lhs = buf[off:off + S, :].astype(jnp.bfloat16)
            d = jnp.dot(lhs, w_ref[k], preferred_element_type=f32)
            acc = d if acc is None else acc + d
        return acc                                  # (S, C) f32

    # ---- conv1 -> bn1 -> PReLU, re-padded into buf_b (canvas layout) for conv2 ----
    a1 = conv3x3(buf_a, w1_ref)
    a1 = a1 * s1 + b1
    a1 = jnp.where(a1 >= 0, a1, a1 * alpha)
    buf_b[...] = jnp.zeros_like(buf_b)
    buf_b[off0:off0 + S, :] = a1 * mask_s           # garbage cols -> 0 (conv2 zero pad)

    # ---- conv2 -> bn2 (garbage columns zeroed so SE pooling is exact) ----
    a2 = conv3x3(buf_b, w2_ref)
    a2 = (a2 * s2 + b2) * mask_s

    # ---- SE: global avg-pool -> fc1 -> PReLU -> fc2 -> sigmoid (VPU only) ----
    y = jnp.sum(a2, axis=0, keepdims=True) * (1.0 / (H * W))            # (1, C)
    y1 = jnp.sum(fc1w_ref[...] * y, axis=1, keepdims=True) + fc1b_ref[...]   # (Cr, 1)
    y1 = jnp.where(y1 >= 0, y1, y1 * se_alpha)
    z = jnp.sum(y1 * fc2w_ref[...], axis=0, keepdims=True) + fc2b_ref[...]   # (1, C)
    gate = 1.0 / (1.0 + jnp.exp(-z))                # exact sigmoid (keeps 1e-3 tolerance)

    # ---- scale + residual (raw x) + final PReLU; single slab store ----
    res = x_ref[0, off0:off0 + S, :]                # original input at image positions
    out = a2 * gate + res
    out = jnp.where(out >= 0, out, out * alpha)
    o_ref[0] = out.astype(o_ref.dtype)


def ir_block_pallas(x_nchw, p):
    x = jnp.transpose(x_nchw, (0, 2, 3, 1)).astype(jnp.float32)          # NHWC
    N, H, W, C = x.shape
    Hp, Wp = H + 2, W + 2
    S = H * Wp                                      # slab rows per image
    SP = _round_up(2 * Wp + 2 + S, 8)               # canvas rows + tap over-read slack

    # Zero-padded canvas, flattened to (N, SP, C).  (Layout-only XLA preprocessing.)
    xp = jnp.pad(x, ((0, 0), (1, 1), (1, 1), (0, 0))).reshape(N, Hp * Wp, C)
    xp = jnp.pad(xp, ((0, 0), (0, SP - Hp * Wp), (0, 0)))

    # Interior mask in canvas coordinates (1 where the real image lives).
    cidx = jnp.arange(SP)
    a, b = cidx // Wp, cidx % Wp
    mask = (((a >= 1) & (a <= H) & (b >= 1) & (b <= W))
            .astype(jnp.float32).reshape(SP, 1))

    # Parameter preprocessing (weight folding / layout only).
    w1 = p['conv1_w'].reshape(9, C, C).astype(jnp.bfloat16)              # HWIO -> (9,Ci,Co)
    w2 = p['conv2_w'].reshape(9, C, C).astype(jnp.bfloat16)
    bn = jnp.stack([p['s0'], p['b0'], p['s1'], p['b1'], p['s2'], p['b2']])   # (6, C)
    Cr = p['fc1_w'].shape[1]
    fc1w_t = p['fc1_w'].T                           # (Cr, C)
    fc1b = p['fc1_b'].reshape(Cr, 1)
    fc2w = p['fc2_w']                               # (Cr, C)
    fc2b = p['fc2_b'].reshape(1, C)
    alpha = p['alpha'].reshape(1)
    se_alpha = p['se_alpha'].reshape(1)

    kernel = functools.partial(_ir_block_kernel, H=H, W=W, Wp=Wp)
    out_slab = pl.pallas_call(
        kernel,
        out_shape=jax.ShapeDtypeStruct((N, S, C), jnp.float32),
        grid_spec=pltpu.PrefetchScalarGridSpec(
            num_scalar_prefetch=0,
            grid=(N,),
            in_specs=[
                pl.BlockSpec((1, SP, C), lambda n: (n, 0, 0)),      # padded input canvas
                pl.BlockSpec((SP, 1), lambda n: (0, 0)),            # interior mask
                pl.BlockSpec((9, C, C), lambda n: (0, 0, 0)),       # conv1 w (bf16)
                pl.BlockSpec((9, C, C), lambda n: (0, 0, 0)),       # conv2 w (bf16)
                pl.BlockSpec((6, C), lambda n: (0, 0)),             # folded BN params
                pl.BlockSpec((Cr, C), lambda n: (0, 0)),            # SE fc1 w^T
                pl.BlockSpec((Cr, 1), lambda n: (0, 0)),            # SE fc1 b
                pl.BlockSpec((Cr, C), lambda n: (0, 0)),            # SE fc2 w
                pl.BlockSpec((1, C), lambda n: (0, 0)),             # SE fc2 b
                pl.BlockSpec(memory_space=pltpu.MemorySpace.SMEM),  # PReLU alpha
                pl.BlockSpec(memory_space=pltpu.MemorySpace.SMEM),  # SE PReLU alpha
            ],
            out_specs=pl.BlockSpec((1, S, C), lambda n: (n, 0, 0)),
            scratch_shapes=[pltpu.VMEM((SP, C), jnp.float32),       # conv1 input canvas
                            pltpu.VMEM((SP, C), jnp.float32)],      # conv2 input canvas
        ),
        compiler_params=pltpu.CompilerParams(
            dimension_semantics=("parallel",)),
    )(xp, mask, w1, w2, bn, fc1w_t, fc1b, fc2w, fc2b, alpha, se_alpha)

    # Drop the 2 pad columns per row and return to NCHW (cheap layout-only XLA ops).
    out = out_slab.reshape(N, H, Wp, C)[:, :, :W, :]
    return jnp.transpose(out, (0, 3, 1, 2))


ir_block_forward = jax.jit(ir_block_pallas)


# ----------------------------------------------------------------------------
# Parameter setup (deterministic, synthetic) and pure-JAX reference.
# ----------------------------------------------------------------------------
def init_params(key, C, reduction=16):
    ks = jax.random.split(key, 12)
    eps = 1e-5

    def bn_fold(k):
        k1, k2, k3, k4 = jax.random.split(k, 4)
        gamma = jax.random.uniform(k1, (C,), jnp.float32, 0.5, 1.5)
        beta = 0.1 * jax.random.normal(k2, (C,), jnp.float32)
        mean = 0.1 * jax.random.normal(k3, (C,), jnp.float32)
        var = jax.random.uniform(k4, (C,), jnp.float32, 0.5, 1.5)
        s = gamma / jnp.sqrt(var + eps)
        b = beta - mean * s
        return s, b

    s0, b0 = bn_fold(ks[0])
    s1, b1 = bn_fold(ks[1])
    s2, b2 = bn_fold(ks[2])
    Cr = C // reduction
    return dict(
        s0=s0, b0=b0, s1=s1, b1=b1, s2=s2, b2=b2,
        conv1_w=0.1 * jax.random.normal(ks[3], (3, 3, C, C), jnp.float32),
        conv2_w=0.1 * jax.random.normal(ks[4], (3, 3, C, C), jnp.float32),
        fc1_w=0.1 * jax.random.normal(ks[5], (C, Cr), jnp.float32),
        fc1_b=0.1 * jax.random.normal(ks[6], (Cr,), jnp.float32),
        fc2_w=0.1 * jax.random.normal(ks[7], (Cr, C), jnp.float32),
        fc2_b=0.1 * jax.random.normal(ks[8], (C,), jnp.float32),
        alpha=jnp.full((1, 1), 0.25, jnp.float32),       # nn.PReLU() default init
        se_alpha=jnp.full((1, 1), 0.25, jnp.float32),    # SE-internal PReLU
    )


def ir_block_reference(x_nchw, p):
    """Pure-JAX reference.  Conv operands are cast to bf16 (f32 accumulation) to mirror
    the kernel's MXU precision; everything else is f32."""
    x = jnp.transpose(x_nchw, (0, 2, 3, 1)).astype(jnp.float32)
    prelu = lambda v, a: jnp.where(v >= 0, v, a * v)

    def conv(v, w):
        return jax.lax.conv_general_dilated(
            v.astype(jnp.bfloat16), w.astype(jnp.bfloat16), (1, 1), 'SAME',
            dimension_numbers=('NHWC', 'HWIO', 'NHWC'),
            preferred_element_type=jnp.float32)

    out = x * p['s0'] + p['b0']
    out = conv(out, p['conv1_w'])
    out = out * p['s1'] + p['b1']
    out = prelu(out, p['alpha'])
    out = conv(out, p['conv2_w'])
    out = out * p['s2'] + p['b2']
    y = out.mean(axis=(1, 2))
    y = prelu(y @ p['fc1_w'] + p['fc1_b'], p['se_alpha'])
    y = 1.0 / (1.0 + jnp.exp(-(y @ p['fc2_w'] + p['fc2_b'])))
    out = out * y[:, None, None, :]
    out = out + x
    out = prelu(out, p['alpha'])
    return jnp.transpose(out, (0, 3, 1, 2))


if __name__ == "__main__":
    key = jax.random.PRNGKey(0)
    kx, kp = jax.random.split(key)
    # IRBlock(inplanes=32, planes=32, stride=1, downsample=None, use_se=True)
    N, C, H, W = 2, 32, 16, 16
    x = jax.random.normal(kx, (N, C, H, W), jnp.float32)
    params = init_params(kp, C)

    out = ir_block_forward(x, params)
    out = jax.block_until_ready(out)

    ref = ir_block_reference(x, params)
    assert out.shape == (N, C, H, W)
    max_err = float(jnp.max(jnp.abs(out - ref)))
    assert jnp.allclose(out, ref, atol=1e-3, rtol=1e-3), max_err
    print("KERNEL_OK")
</pallas_src>

<mosaic_0001>
module attributes {stable_mosaic.version = 11 : i64} {
  func.func @_ir_block_kernel(%arg0: i32, %arg1: memref<1x328x32xf32, #tpu.memory_space<vmem>>, %arg2: memref<328x1xf32, #tpu.memory_space<vmem>>, %arg3: memref<9x32x32xbf16, #tpu.memory_space<vmem>>, %arg4: memref<9x32x32xbf16, #tpu.memory_space<vmem>>, %arg5: memref<6x32xf32, #tpu.memory_space<vmem>>, %arg6: memref<2x32xf32, #tpu.memory_space<vmem>>, %arg7: memref<2x1xf32, #tpu.memory_space<vmem>>, %arg8: memref<2x32xf32, #tpu.memory_space<vmem>>, %arg9: memref<1x32xf32, #tpu.memory_space<vmem>>, %arg10: memref<1xf32, #tpu.memory_space<smem>>, %arg11: memref<1xf32, #tpu.memory_space<smem>>, %arg12: memref<1x288x32xf32, #tpu.memory_space<vmem>>, %arg13: memref<328x32xf32, #tpu.memory_space<vmem>>, %arg14: memref<328x32xf32, #tpu.memory_space<vmem>>) attributes {dimension_semantics = [#tpu.dimension_semantics<parallel>], iteration_bounds = array<i64: 2>, scalar_prefetch = 0 : i64, scratch_operands = 2 : i64, tpu.core_type = #tpu.core_type<tc>, window_params = [{transform_indices = @transform_0, window_bounds = array<i64: 1, 328, 32>}, {pipeline_mode = #tpu.pipeline_mode<synchronous>, transform_indices = @transform_1, window_bounds = array<i64: 328, 1>}, {pipeline_mode = #tpu.pipeline_mode<synchronous>, transform_indices = @transform_2, window_bounds = array<i64: 9, 32, 32>}, {pipeline_mode = #tpu.pipeline_mode<synchronous>, transform_indices = @transform_3, window_bounds = array<i64: 9, 32, 32>}, {pipeline_mode = #tpu.pipeline_mode<synchronous>, transform_indices = @transform_4, window_bounds = array<i64: 6, 32>}, {pipeline_mode = #tpu.pipeline_mode<synchronous>, transform_indices = @transform_5, window_bounds = array<i64: 2, 32>}, {pipeline_mode = #tpu.pipeline_mode<synchronous>, transform_indices = @transform_6, window_bounds = array<i64: 2, 1>}, {pipeline_mode = #tpu.pipeline_mode<synchronous>, transform_indices = @transform_7, window_bounds = array<i64: 2, 32>}, {pipeline_mode = #tpu.pipeline_mode<synchronous>, transform_indices = @transform_8, window_bounds = array<i64: 1, 32>}, {transform_indices = @transform_9, window_bounds = array<i64: 1>}, {transform_indices = @transform_10, window_bounds = array<i64: 1>}, {transform_indices = @transform_11, window_bounds = array<i64: 1, 288, 32>}]} {
    %c0 = arith.constant 0 : index
    %0 = memref.load %arg10[%c0] : memref<1xf32, #tpu.memory_space<smem>>
    %c0_0 = arith.constant 0 : index
    %1 = memref.load %arg11[%c0_0] : memref<1xf32, #tpu.memory_space<smem>>
    %c0_1 = arith.constant 0 : index
    %c0_2 = arith.constant 0 : index
    %2 = vector.load %arg5[%c0_1, %c0_2] : memref<6x32xf32, #tpu.memory_space<vmem>>, vector<1x32xf32>
    %c1 = arith.constant 1 : index
    %c0_3 = arith.constant 0 : index
    %3 = vector.load %arg5[%c1, %c0_3] : memref<6x32xf32, #tpu.memory_space<vmem>>, vector<1x32xf32>
    %c2 = arith.constant 2 : index
    %c0_4 = arith.constant 0 : index
    %4 = vector.load %arg5[%c2, %c0_4] : memref<6x32xf32, #tpu.memory_space<vmem>>, vector<1x32xf32>
    %c3 = arith.constant 3 : index
    %c0_5 = arith.constant 0 : index
    %5 = vector.load %arg5[%c3, %c0_5] : memref<6x32xf32, #tpu.memory_space<vmem>>, vector<1x32xf32>
    %c4 = arith.constant 4 : index
    %c0_6 = arith.constant 0 : index
    %6 = vector.load %arg5[%c4, %c0_6] : memref<6x32xf32, #tpu.memory_space<vmem>>, vector<1x32xf32>
    %c5 = arith.constant 5 : index
    %c0_7 = arith.constant 0 : index
    %7 = vector.load %arg5[%c5, %c0_7] : memref<6x32xf32, #tpu.memory_space<vmem>>, vector<1x32xf32>
    %c0_8 = arith.constant 0 : index
    %c0_9 = arith.constant 0 : index
    %8 = vector.load %arg2[%c0_8, %c0_9] : memref<328x1xf32, #tpu.memory_space<vmem>>, vector<328x1xf32>
    %c19 = arith.constant 19 : index
    %c0_10 = arith.constant 0 : index
    %9 = vector.load %arg2[%c19, %c0_10] : memref<328x1xf32, #tpu.memory_space<vmem>>, vector<288x1xf32>
    %c0_11 = arith.constant 0 : index
    %c0_12 = arith.constant 0 : index
    %c0_13 = arith.constant 0 : index
    %10 = vector.load %arg1[%c0_11, %c0_12, %c0_13] : memref<1x328x32xf32, #tpu.memory_space<vmem>>, vector<1x328x32xf32>
    %11 = vector.shape_cast %10 : vector<1x328x32xf32> to vector<328x32xf32>
    %12 = vector.broadcast %2 : vector<1x32xf32> to vector<328x32xf32>
    %13 = arith.mulf %11, %12 : vector<328x32xf32>
    %14 = vector.broadcast %3 : vector<1x32xf32> to vector<328x32xf32>
    %15 = arith.addf %13, %14 : vector<328x32xf32>
    %16 = vector.broadcast %8 : vector<328x1xf32> to vector<328x32xf32>
    %17 = arith.mulf %15, %16 : vector<328x32xf32>
    %c0_14 = arith.constant 0 : index
    %c0_15 = arith.constant 0 : index
    %18 = vector.load %arg13[%c0_14, %c0_15] : memref<328x32xf32, #tpu.memory_space<vmem>>, vector<328x32xf32>
    tpu.vector_store %arg13[%c0_14, %c0_15], %17 {strides = array<i32>} : memref<328x32xf32, #tpu.memory_space<vmem>>, vector<328x32xf32>,
    %c0_16 = arith.constant 0 : index
    %c0_17 = arith.constant 0 : index
    %19 = vector.load %arg13[%c0_16, %c0_17] : memref<328x32xf32, #tpu.memory_space<vmem>>, vector<288x32xf32>
    %20 = arith.truncf %19 : vector<288x32xf32> to vector<288x32xbf16>
    %c0_18 = arith.constant 0 : index
    %c0_19 = arith.constant 0 : index
    %c0_20 = arith.constant 0 : index
    %21 = vector.load %arg3[%c0_18, %c0_19, %c0_20] : memref<9x32x32xbf16, #tpu.memory_space<vmem>>, vector<1x32x32xbf16>
    %22 = vector.shape_cast %21 : vector<1x32x32xbf16> to vector<32x32xbf16>
    %cst = arith.constant dense<0.000000e+00> : vector<288x32xf32>
    %23 = tpu.matmul %20, %22, %cst {dimension_numbers = #tpu.dot_dimension_numbers<[1], [0], [0], [1], [0, 0, 1, 1], [], []>} : vector<288x32xbf16>, vector<32x32xbf16>, vector<288x32xf32> -> vector<288x32xf32>
    %c1_21 = arith.constant 1 : index
    %c0_22 = arith.constant 0 : index
    %24 = vector.load %arg13[%c1_21, %c0_22] : memref<328x32xf32, #tpu.memory_space<vmem>>, vector<288x32xf32>
    %25 = arith.truncf %24 : vector<288x32xf32> to vector<288x32xbf16>
    %c1_23 = arith.constant 1 : index
    %c0_24 = arith.constant 0 : index
    %c0_25 = arith.constant 0 : index
    %26 = vector.load %arg3[%c1_23, %c0_24, %c0_25] : memref<9x32x32xbf16, #tpu.memory_space<vmem>>, vector<1x32x32xbf16>
    %27 = vector.shape_cast %26 : vector<1x32x32xbf16> to vector<32x32xbf16>
    %cst_26 = arith.constant dense<0.000000e+00> : vector<288x32xf32>
    %28 = tpu.matmul %25, %27, %cst_26 {dimension_numbers = #tpu.dot_dimension_numbers<[1], [0], [0], [1], [0, 0, 1, 1], [], []>} : vector<288x32xbf16>, vector<32x32xbf16>, vector<288x32xf32> -> vector<288x32xf32>
    %29 = arith.addf %23, %28 : vector<288x32xf32>
    %c2_27 = arith.constant 2 : index
    %c0_28 = arith.constant 0 : index
    %30 = vector.load %arg13[%c2_27, %c0_28] : memref<328x32xf32, #tpu.memory_space<vmem>>, vector<288x32xf32>
    %31 = arith.truncf %30 : vector<288x32xf32> to vector<288x32xbf16>
    %c2_29 = arith.constant 2 : index
    %c0_30 = arith.constant 0 : index
    %c0_31 = arith.constant 0 : index
    %32 = vector.load %arg3[%c2_29, %c0_30, %c0_31] : memref<9x32x32xbf16, #tpu.memory_space<vmem>>, vector<1x32x32xbf16>
    %33 = vector.shape_cast %32 : vector<1x32x32xbf16> to vector<32x32xbf16>
    %cst_32 = arith.constant dense<0.000000e+00> : vector<288x32xf32>
    %34 = tpu.matmul %31, %33, %cst_32 {dimension_numbers = #tpu.dot_dimension_numbers<[1], [0], [0], [1], [0, 0, 1, 1], [], []>} : vector<288x32xbf16>, vector<32x32xbf16>, vector<288x32xf32> -> vector<288x32xf32>
    %35 = arith.addf %29, %34 : vector<288x32xf32>
    %c18 = arith.constant 18 : index
    %c0_33 = arith.constant 0 : index
    %36 = vector.load %arg13[%c18, %c0_33] : memref<328x32xf32, #tpu.memory_space<vmem>>, vector<288x32xf32>
    %37 = arith.truncf %36 : vector<288x32xf32> to vector<288x32xbf16>
    %c3_34 = arith.constant 3 : index
    %c0_35 = arith.constant 0 : index
    %c0_36 = arith.constant 0 : index
    %38 = vector.load %arg3[%c3_34, %c0_35, %c0_36] : memref<9x32x32xbf16, #tpu.memory_space<vmem>>, vector<1x32x32xbf16>
    %39 = vector.shape_cast %38 : vector<1x32x32xbf16> to vector<32x32xbf16>
    %cst_37 = arith.constant dense<0.000000e+00> : vector<288x32xf32>
    %40 = tpu.matmul %37, %39, %cst_37 {dimension_numbers = #tpu.dot_dimension_numbers<[1], [0], [0], [1], [0, 0, 1, 1], [], []>} : vector<288x32xbf16>, vector<32x32xbf16>, vector<288x32xf32> -> vector<288x32xf32>
    %41 = arith.addf %35, %40 : vector<288x32xf32>
    %c19_38 = arith.constant 19 : index
    %c0_39 = arith.constant 0 : index
    %42 = vector.load %arg13[%c19_38, %c0_39] : memref<328x32xf32, #tpu.memory_space<vmem>>, vector<288x32xf32>
    %43 = arith.truncf %42 : vector<288x32xf32> to vector<288x32xbf16>
    %c4_40 = arith.constant 4 : index
    %c0_41 = arith.constant 0 : index
    %c0_42 = arith.constant 0 : index
    %44 = vector.load %arg3[%c4_40, %c0_41, %c0_42] : memref<9x32x32xbf16, #tpu.memory_space<vmem>>, vector<1x32x32xbf16>
    %45 = vector.shape_cast %44 : vector<1x32x32xbf16> to vector<32x32xbf16>
    %cst_43 = arith.constant dense<0.000000e+00> : vector<288x32xf32>
    %46 = tpu.matmul %43, %45, %cst_43 {dimension_numbers = #tpu.dot_dimension_numbers<[1], [0], [0], [1], [0, 0, 1, 1], [], []>} : vector<288x32xbf16>, vector<32x32xbf16>, vector<288x32xf32> -> vector<288x32xf32>
    %47 = arith.addf %41, %46 : vector<288x32xf32>
    %c20 = arith.constant 20 : index
    %c0_44 = arith.constant 0 : index
    %48 = vector.load %arg13[%c20, %c0_44] : memref<328x32xf32, #tpu.memory_space<vmem>>, vector<288x32xf32>
    %49 = arith.truncf %48 : vector<288x32xf32> to vector<288x32xbf16>
    %c5_45 = arith.constant 5 : index
    %c0_46 = arith.constant 0 : index
    %c0_47 = arith.constant 0 : index
    %50 = vector.load %arg3[%c5_45, %c0_46, %c0_47] : memref<9x32x32xbf16, #tpu.memory_space<vmem>>, vector<1x32x32xbf16>
    %51 = vector.shape_cast %50 : vector<1x32x32xbf16> to vector<32x32xbf16>
    %cst_48 = arith.constant dense<0.000000e+00> : vector<288x32xf32>
    %52 = tpu.matmul %49, %51, %cst_48 {dimension_numbers = #tpu.dot_dimension_numbers<[1], [0], [0], [1], [0, 0, 1, 1], [], []>} : vector<288x32xbf16>, vector<32x32xbf16>, vector<288x32xf32> -> vector<288x32xf32>
    %53 = arith.addf %47, %52 : vector<288x32xf32>
    %c36 = arith.constant 36 : index
    %c0_49 = arith.constant 0 : index
    %54 = vector.load %arg13[%c36, %c0_49] : memref<328x32xf32, #tpu.memory_space<vmem>>, vector<288x32xf32>
    %55 = arith.truncf %54 : vector<288x32xf32> to vector<288x32xbf16>
    %c6 = arith.constant 6 : index
    %c0_50 = arith.constant 0 : index
    %c0_51 = arith.constant 0 : index
    %56 = vector.load %arg3[%c6, %c0_50, %c0_51] : memref<9x32x32xbf16, #tpu.memory_space<vmem>>, vector<1x32x32xbf16>
    %57 = vector.shape_cast %56 : vector<1x32x32xbf16> to vector<32x32xbf16>
    %cst_52 = arith.constant dense<0.000000e+00> : vector<288x32xf32>
    %58 = tpu.matmul %55, %57, %cst_52 {dimension_numbers = #tpu.dot_dimension_numbers<[1], [0], [0], [1], [0, 0, 1, 1], [], []>} : vector<288x32xbf16>, vector<32x32xbf16>, vector<288x32xf32> -> vector<288x32xf32>
    %59 = arith.addf %53, %58 : vector<288x32xf32>
    %c37 = arith.constant 37 : index
    %c0_53 = arith.constant 0 : index
    %60 = vector.load %arg13[%c37, %c0_53] : memref<328x32xf32, #tpu.memory_space<vmem>>, vector<288x32xf32>
    %61 = arith.truncf %60 : vector<288x32xf32> to vector<288x32xbf16>
    %c7 = arith.constant 7 : index
    %c0_54 = arith.constant 0 : index
    %c0_55 = arith.constant 0 : index
    %62 = vector.load %arg3[%c7, %c0_54, %c0_55] : memref<9x32x32xbf16, #tpu.memory_space<vmem>>, vector<1x32x32xbf16>
    %63 = vector.shape_cast %62 : vector<1x32x32xbf16> to vector<32x32xbf16>
    %cst_56 = arith.constant dense<0.000000e+00> : vector<288x32xf32>
    %64 = tpu.matmul %61, %63, %cst_56 {dimension_numbers = #tpu.dot_dimension_numbers<[1], [0], [0], [1], [0, 0, 1, 1], [], []>} : vector<288x32xbf16>, vector<32x32xbf16>, vector<288x32xf32> -> vector<288x32xf32>
    %65 = arith.addf %59, %64 : vector<288x32xf32>
    %c38 = arith.constant 38 : index
    %c0_57 = arith.constant 0 : index
    %66 = vector.load %arg13[%c38, %c0_57] : memref<328x32xf32, #tpu.memory_space<vmem>>, vector<288x32xf32>
    %67 = arith.truncf %66 : vector<288x32xf32> to vector<288x32xbf16>
    %c8 = arith.constant 8 : index
    %c0_58 = arith.constant 0 : index
    %c0_59 = arith.constant 0 : index
    %68 = vector.load %arg3[%c8, %c0_58, %c0_59] : memref<9x32x32xbf16, #tpu.memory_space<vmem>>, vector<1x32x32xbf16>
    %69 = vector.shape_cast %68 : vector<1x32x32xbf16> to vector<32x32xbf16>
    %cst_60 = arith.constant dense<0.000000e+00> : vector<288x32xf32>
    %70 = tpu.matmul %67, %69, %cst_60 {dimension_numbers = #tpu.dot_dimension_numbers<[1], [0], [0], [1], [0, 0, 1, 1], [], []>} : vector<288x32xbf16>, vector<32x32xbf16>, vector<288x32xf32> -> vector<288x32xf32>
    %71 = arith.addf %65, %70 : vector<288x32xf32>
    %72 = vector.broadcast %4 : vector<1x32xf32> to vector<288x32xf32>
    %73 = arith.mulf %71, %72 : vector<288x32xf32>
    %74 = vector.broadcast %5 : vector<1x32xf32> to vector<288x32xf32>
    %75 = arith.addf %73, %74 : vector<288x32xf32>
    %cst_61 = arith.constant 0.000000e+00 : f32
    %76 = vector.broadcast %cst_61 : f32 to vector<288x32xf32>
    %77 = arith.cmpf oge, %75, %76 : vector<288x32xf32>
    %78 = vector.broadcast %0 : f32 to vector<288x32xf32>
    %79 = arith.mulf %75, %78 : vector<288x32xf32>
    %80 = arith.select %77, %75, %79 : vector<288x32xi1>, vector<288x32xf32>
    %cst_62 = arith.constant 0.000000e+00 : f32
    %81 = vector.broadcast %cst_62 : f32 to vector<328x32xf32>
    %c0_63 = arith.constant 0 : index
    %c0_64 = arith.constant 0 : index
    %82 = vector.load %arg14[%c0_63, %c0_64] : memref<328x32xf32, #tpu.memory_space<vmem>>, vector<328x32xf32>
    tpu.vector_store %arg14[%c0_63, %c0_64], %81 {strides = array<i32>} : memref<328x32xf32, #tpu.memory_space<vmem>>, vector<328x32xf32>,
    %83 = vector.broadcast %9 : vector<288x1xf32> to vector<288x32xf32>
    %84 = arith.mulf %80, %83 : vector<288x32xf32>
    %c19_65 = arith.constant 19 : index
    %c0_66 = arith.constant 0 : index
    %85 = vector.load %arg14[%c19_65, %c0_66] : memref<328x32xf32, #tpu.memory_space<vmem>>, vector<288x32xf32>
    tpu.vector_store %arg14[%c19_65, %c0_66], %84 {strides = array<i32>} : memref<328x32xf32, #tpu.memory_space<vmem>>, vector<288x32xf32>,
    %c0_67 = arith.constant 0 : index
    %c0_68 = arith.constant 0 : index
    %86 = vector.load %arg14[%c0_67, %c0_68] : memref<328x32xf32, #tpu.memory_space<vmem>>, vector<288x32xf32>
    %87 = arith.truncf %86 : vector<288x32xf32> to vector<288x32xbf16>
    %c0_69 = arith.constant 0 : index
    %c0_70 = arith.constant 0 : index
    %c0_71 = arith.constant 0 : index
    %88 = vector.load %arg4[%c0_69, %c0_70, %c0_71] : memref<9x32x32xbf16, #tpu.memory_space<vmem>>, vector<1x32x32xbf16>
    %89 = vector.shape_cast %88 : vector<1x32x32xbf16> to vector<32x32xbf16>
    %cst_72 = arith.constant dense<0.000000e+00> : vector<288x32xf32>
    %90 = tpu.matmul %87, %89, %cst_72 {dimension_numbers = #tpu.dot_dimension_numbers<[1], [0], [0], [1], [0, 0, 1, 1], [], []>} : vector<288x32xbf16>, vector<32x32xbf16>, vector<288x32xf32> -> vector<288x32xf32>
    %c1_73 = arith.constant 1 : index
    %c0_74 = arith.constant 0 : index
    %91 = vector.load %arg14[%c1_73, %c0_74] : memref<328x32xf32, #tpu.memory_space<vmem>>, vector<288x32xf32>
    %92 = arith.truncf %91 : vector<288x32xf32> to vector<288x32xbf16>
    %c1_75 = arith.constant 1 : index
    %c0_76 = arith.constant 0 : index
    %c0_77 = arith.constant 0 : index
    %93 = vector.load %arg4[%c1_75, %c0_76, %c0_77] : memref<9x32x32xbf16, #tpu.memory_space<vmem>>, vector<1x32x32xbf16>
    %94 = vector.shape_cast %93 : vector<1x32x32xbf16> to vector<32x32xbf16>
    %cst_78 = arith.constant dense<0.000000e+00> : vector<288x32xf32>
    %95 = tpu.matmul %92, %94, %cst_78 {dimension_numbers = #tpu.dot_dimension_numbers<[1], [0], [0], [1], [0, 0, 1, 1], [], []>} : vector<288x32xbf16>, vector<32x32xbf16>, vector<288x32xf32> -> vector<288x32xf32>
    %96 = arith.addf %90, %95 : vector<288x32xf32>
    %c2_79 = arith.constant 2 : index
    %c0_80 = arith.constant 0 : index
    %97 = vector.load %arg14[%c2_79, %c0_80] : memref<328x32xf32, #tpu.memory_space<vmem>>, vector<288x32xf32>
    %98 = arith.truncf %97 : vector<288x32xf32> to vector<288x32xbf16>
    %c2_81 = arith.constant 2 : index
    %c0_82 = arith.constant 0 : index
    %c0_83 = arith.constant 0 : index
    %99 = vector.load %arg4[%c2_81, %c0_82, %c0_83] : memref<9x32x32xbf16, #tpu.memory_space<vmem>>, vector<1x32x32xbf16>
    %100 = vector.shape_cast %99 : vector<1x32x32xbf16> to vector<32x32xbf16>
    %cst_84 = arith.constant dense<0.000000e+00> : vector<288x32xf32>
    %101 = tpu.matmul %98, %100, %cst_84 {dimension_numbers = #tpu.dot_dimension_numbers<[1], [0], [0], [1], [0, 0, 1, 1], [], []>} : vector<288x32xbf16>, vector<32x32xbf16>, vector<288x32xf32> -> vector<288x32xf32>
    %102 = arith.addf %96, %101 : vector<288x32xf32>
    %c18_85 = arith.constant 18 : index
    %c0_86 = arith.constant 0 : index
    %103 = vector.load %arg14[%c18_85, %c0_86] : memref<328x32xf32, #tpu.memory_space<vmem>>, vector<288x32xf32>
    %104 = arith.truncf %103 : vector<288x32xf32> to vector<288x32xbf16>
    %c3_87 = arith.constant 3 : index
    %c0_88 = arith.constant 0 : index
    %c0_89 = arith.constant 0 : index
    %105 = vector.load %arg4[%c3_87, %c0_88, %c0_89] : memref<9x32x32xbf16, #tpu.memory_space<vmem>>, vector<1x32x32xbf16>
    %106 = vector.shape_cast %105 : vector<1x32x32xbf16> to vector<32x32xbf16>
    %cst_90 = arith.constant dense<0.000000e+00> : vector<288x32xf32>
    %107 = tpu.matmul %104, %106, %cst_90 {dimension_numbers = #tpu.dot_dimension_numbers<[1], [0], [0], [1], [0, 0, 1, 1], [], []>} : vector<288x32xbf16>, vector<32x32xbf16>, vector<288x32xf32> -> vector<288x32xf32>
    %108 = arith.addf %102, %107 : vector<288x32xf32>
    %c19_91 = arith.constant 19 : index
    %c0_92 = arith.constant 0 : index
    %109 = vector.load %arg14[%c19_91, %c0_92] : memref<328x32xf32, #tpu.memory_space<vmem>>, vector<288x32xf32>
    %110 = arith.truncf %109 : vector<288x32xf32> to vector<288x32xbf16>
    %c4_93 = arith.constant 4 : index
    %c0_94 = arith.constant 0 : index
    %c0_95 = arith.constant 0 : index
    %111 = vector.load %arg4[%c4_93, %c0_94, %c0_95] : memref<9x32x32xbf16, #tpu.memory_space<vmem>>, vector<1x32x32xbf16>
    %112 = vector.shape_cast %111 : vector<1x32x32xbf16> to vector<32x32xbf16>
    %cst_96 = arith.constant dense<0.000000e+00> : vector<288x32xf32>
    %113 = tpu.matmul %110, %112, %cst_96 {dimension_numbers = #tpu.dot_dimension_numbers<[1], [0], [0], [1], [0, 0, 1, 1], [], []>} : vector<288x32xbf16>, vector<32x32xbf16>, vector<288x32xf32> -> vector<288x32xf32>
    %114 = arith.addf %108, %113 : vector<288x32xf32>
    %c20_97 = arith.constant 20 : index
    %c0_98 = arith.constant 0 : index
    %115 = vector.load %arg14[%c20_97, %c0_98] : memref<328x32xf32, #tpu.memory_space<vmem>>, vector<288x32xf32>
    %116 = arith.truncf %115 : vector<288x32xf32> to vector<288x32xbf16>
    %c5_99 = arith.constant 5 : index
    %c0_100 = arith.constant 0 : index
    %c0_101 = arith.constant 0 : index
    %117 = vector.load %arg4[%c5_99, %c0_100, %c0_101] : memref<9x32x32xbf16, #tpu.memory_space<vmem>>, vector<1x32x32xbf16>
    %118 = vector.shape_cast %117 : vector<1x32x32xbf16> to vector<32x32xbf16>
    %cst_102 = arith.constant dense<0.000000e+00> : vector<288x32xf32>
    %119 = tpu.matmul %116, %118, %cst_102 {dimension_numbers = #tpu.dot_dimension_numbers<[1], [0], [0], [1], [0, 0, 1, 1], [], []>} : vector<288x32xbf16>, vector<32x32xbf16>, vector<288x32xf32> -> vector<288x32xf32>
    %120 = arith.addf %114, %119 : vector<288x32xf32>
    %c36_103 = arith.constant 36 : index
    %c0_104 = arith.constant 0 : index
    %121 = vector.load %arg14[%c36_103, %c0_104] : memref<328x32xf32, #tpu.memory_space<vmem>>, vector<288x32xf32>
    %122 = arith.truncf %121 : vector<288x32xf32> to vector<288x32xbf16>
    %c6_105 = arith.constant 6 : index
    %c0_106 = arith.constant 0 : index
    %c0_107 = arith.constant 0 : index
    %123 = vector.load %arg4[%c6_105, %c0_106, %c0_107] : memref<9x32x32xbf16, #tpu.memory_space<vmem>>, vector<1x32x32xbf16>
    %124 = vector.shape_cast %123 : vector<1x32x32xbf16> to vector<32x32xbf16>
    %cst_108 = arith.constant dense<0.000000e+00> : vector<288x32xf32>
    %125 = tpu.matmul %122, %124, %cst_108 {dimension_numbers = #tpu.dot_dimension_numbers<[1], [0], [0], [1], [0, 0, 1, 1], [], []>} : vector<288x32xbf16>, vector<32x32xbf16>, vector<288x32xf32> -> vector<288x32xf32>
    %126 = arith.addf %120, %125 : vector<288x32xf32>
    %c37_109 = arith.constant 37 : index
    %c0_110 = arith.constant 0 : index
    %127 = vector.load %arg14[%c37_109, %c0_110] : memref<328x32xf32, #tpu.memory_space<vmem>>, vector<288x32xf32>
    %128 = arith.truncf %127 : vector<288x32xf32> to vector<288x32xbf16>
    %c7_111 = arith.constant 7 : index
    %c0_112 = arith.constant 0 : index
    %c0_113 = arith.constant 0 : index
    %129 = vector.load %arg4[%c7_111, %c0_112, %c0_113] : memref<9x32x32xbf16, #tpu.memory_space<vmem>>, vector<1x32x32xbf16>
    %130 = vector.shape_cast %129 : vector<1x32x32xbf16> to vector<32x32xbf16>
    %cst_114 = arith.constant dense<0.000000e+00> : vector<288x32xf32>
    %131 = tpu.matmul %128, %130, %cst_114 {dimension_numbers = #tpu.dot_dimension_numbers<[1], [0], [0], [1], [0, 0, 1, 1], [], []>} : vector<288x32xbf16>, vector<32x32xbf16>, vector<288x32xf32> -> vector<288x32xf32>
    %132 = arith.addf %126, %131 : vector<288x32xf32>
    %c38_115 = arith.constant 38 : index
    %c0_116 = arith.constant 0 : index
    %133 = vector.load %arg14[%c38_115, %c0_116] : memref<328x32xf32, #tpu.memory_space<vmem>>, vector<288x32xf32>
    %134 = arith.truncf %133 : vector<288x32xf32> to vector<288x32xbf16>
    %c8_117 = arith.constant 8 : index
    %c0_118 = arith.constant 0 : index
    %c0_119 = arith.constant 0 : index
    %135 = vector.load %arg4[%c8_117, %c0_118, %c0_119] : memref<9x32x32xbf16, #tpu.memory_space<vmem>>, vector<1x32x32xbf16>
    %136 = vector.shape_cast %135 : vector<1x32x32xbf16> to vector<32x32xbf16>
    %cst_120 = arith.constant dense<0.000000e+00> : vector<288x32xf32>
    %137 = tpu.matmul %134, %136, %cst_120 {dimension_numbers = #tpu.dot_dimension_numbers<[1], [0], [0], [1], [0, 0, 1, 1], [], []>} : vector<288x32xbf16>, vector<32x32xbf16>, vector<288x32xf32> -> vector<288x32xf32>
    %138 = arith.addf %132, %137 : vector<288x32xf32>
    %139 = vector.broadcast %6 : vector<1x32xf32> to vector<288x32xf32>
    %140 = arith.mulf %138, %139 : vector<288x32xf32>
    %141 = vector.broadcast %7 : vector<1x32xf32> to vector<288x32xf32>
    %142 = arith.addf %140, %141 : vector<288x32xf32>
    %143 = vector.broadcast %9 : vector<288x1xf32> to vector<288x32xf32>
    %144 = arith.mulf %142, %143 : vector<288x32xf32>
    %cst_121 = arith.constant dense<0.000000e+00> : vector<32xf32>
    %145 = vector.multi_reduction <add>, %144, %cst_121 [0] : vector<288x32xf32> to vector<32xf32>
    %146 = vector.shape_cast %145 : vector<32xf32> to vector<1x32xf32>
    %cst_122 = arith.constant 3.906250e-03 : f32
    %147 = vector.broadcast %cst_122 : f32 to vector<1x32xf32>
    %148 = arith.mulf %146, %147 : vector<1x32xf32>
    %c0_123 = arith.constant 0 : index
    %c0_124 = arith.constant 0 : index
    %149 = vector.load %arg6[%c0_123, %c0_124] : memref<2x32xf32, #tpu.memory_space<vmem>>, vector<2x32xf32>
    %150 = vector.broadcast %148 : vector<1x32xf32> to vector<2x32xf32>
    %151 = arith.mulf %149, %150 : vector<2x32xf32>
    %cst_125 = arith.constant dense<0.000000e+00> : vector<2xf32>
    %152 = vector.multi_reduction <add>, %151, %cst_125 [1] : vector<2x32xf32> to vector<2xf32>
    %153 = vector.shape_cast %152 : vector<2xf32> to vector<2x1xf32>
    %c0_126 = arith.constant 0 : index
    %c0_127 = arith.constant 0 : index
    %154 = vector.load %arg7[%c0_126, %c0_127] : memref<2x1xf32, #tpu.memory_space<vmem>>, vector<2x1xf32>
    %155 = arith.addf %153, %154 : vector<2x1xf32>
    %cst_128 = arith.constant 0.000000e+00 : f32
    %156 = vector.broadcast %cst_128 : f32 to vector<2x1xf32>
    %157 = arith.cmpf oge, %155, %156 : vector<2x1xf32>
    %158 = vector.broadcast %1 : f32 to vector<2x1xf32>
    %159 = arith.mulf %155, %158 : vector<2x1xf32>
    %160 = arith.select %157, %155, %159 : vector<2x1xi1>, vector<2x1xf32>
    %c0_129 = arith.constant 0 : index
    %c0_130 = arith.constant 0 : index
    %161 = vector.load %arg8[%c0_129, %c0_130] : memref<2x32xf32, #tpu.memory_space<vmem>>, vector<2x32xf32>
    %162 = vector.broadcast %160 : vector<2x1xf32> to vector<2x32xf32>
    %163 = arith.mulf %162, %161 : vector<2x32xf32>
    %cst_131 = arith.constant dense<0.000000e+00> : vector<32xf32>
    %164 = vector.multi_reduction <add>, %163, %cst_131 [0] : vector<2x32xf32> to vector<32xf32>
    %165 = vector.shape_cast %164 : vector<32xf32> to vector<1x32xf32>
    %c0_132 = arith.constant 0 : index
    %c0_133 = arith.constant 0 : index
    %166 = vector.load %arg9[%c0_132, %c0_133] : memref<1x32xf32, #tpu.memory_space<vmem>>, vector<1x32xf32>
    %167 = arith.addf %165, %166 : vector<1x32xf32>
    %cst_134 = arith.constant 0.000000e+00 : f32
    %168 = vector.broadcast %cst_134 : f32 to vector<1x32xf32>
    %169 = arith.subf %168, %167 : vector<1x32xf32>
    %170 = math.exp %169 : vector<1x32xf32>
    %cst_135 = arith.constant 1.000000e+00 : f32
    %171 = vector.broadcast %cst_135 : f32 to vector<1x32xf32>
    %172 = arith.addf %171, %170 : vector<1x32xf32>
    %cst_136 = arith.constant 1.000000e+00 : f32
    %173 = vector.broadcast %cst_136 : f32 to vector<1x32xf32>
    %174 = arith.divf %173, %172 : vector<1x32xf32>
    %c0_137 = arith.constant 0 : index
    %c19_138 = arith.constant 19 : index
    %c0_139 = arith.constant 0 : index
    %175 = vector.load %arg1[%c0_137, %c19_138, %c0_139] : memref<1x328x32xf32, #tpu.memory_space<vmem>>, vector<1x288x32xf32>
    %176 = vector.shape_cast %175 : vector<1x288x32xf32> to vector<288x32xf32>
    %177 = vector.broadcast %174 : vector<1x32xf32> to vector<288x32xf32>
    %178 = arith.mulf %144, %177 : vector<288x32xf32>
    %179 = arith.addf %178, %176 : vector<288x32xf32>
    %cst_140 = arith.constant 0.000000e+00 : f32
    %180 = vector.broadcast %cst_140 : f32 to vector<288x32xf32>
    %181 = arith.cmpf oge, %179, %180 : vector<288x32xf32>
    %182 = vector.broadcast %0 : f32 to vector<288x32xf32>
    %183 = arith.mulf %179, %182 : vector<288x32xf32>
    %184 = arith.select %181, %179, %183 : vector<288x32xi1>, vector<288x32xf32>
    %c0_141 = arith.constant 0 : index
    %c0_142 = arith.constant 0 : index
    %c0_143 = arith.constant 0 : index
    %185 = vector.load %arg12[%c0_141, %c0_142, %c0_143] : memref<1x288x32xf32, #tpu.memory_space<vmem>>, vector<1x288x32xf32>
    %186 = vector.shape_cast %185 : vector<1x288x32xf32> to vector<288x32xf32>
    %187 = vector.shape_cast %184 : vector<288x32xf32> to vector<1x288x32xf32>
    tpu.vector_store %arg12[%c0_141, %c0_142, %c0_143], %187 {strides = array<i32>} : memref<1x288x32xf32, #tpu.memory_space<vmem>>, vector<1x288x32xf32>,
    return
  }
  func.func @transform_0(%arg0: i32) -> (i32, i32, i32) {
    %c0_i32 = arith.constant 0 : i32
    %c0_i32_0 = arith.constant 0 : i32
    %c0_i32_1 = arith.constant 0 : i32
    return %arg0, %c0_i32, %c0_i32_0 : i32, i32, i32
  }
  func.func @transform_1(%arg0: i32) -> (i32, i32) {
    %c0_i32 = arith.constant 0 : i32
    %c0_i32_0 = arith.constant 0 : i32
    %c0_i32_1 = arith.constant 0 : i32
    return %c0_i32, %c0_i32_0 : i32, i32
  }
  func.func @transform_2(%arg0: i32) -> (i32, i32, i32) {
    %c0_i32 = arith.constant 0 : i32
    %c0_i32_0 = arith.constant 0 : i32
    %c0_i32_1 = arith.constant 0 : i32
    %c0_i32_2 = arith.constant 0 : i32
    return %c0_i32, %c0_i32_0, %c0_i32_1 : i32, i32, i32
  }
  func.func @transform_3(%arg0: i32) -> (i32, i32, i32) {
    %c0_i32 = arith.constant 0 : i32
    %c0_i32_0 = arith.constant 0 : i32
    %c0_i32_1 = arith.constant 0 : i32
    %c0_i32_2 = arith.constant 0 : i32
    return %c0_i32, %c0_i32_0, %c0_i32_1 : i32, i32, i32
  }
  func.func @transform_4(%arg0: i32) -> (i32, i32) {
    %c0_i32 = arith.constant 0 : i32
    %c0_i32_0 = arith.constant 0 : i32
    %c0_i32_1 = arith.constant 0 : i32
    return %c0_i32, %c0_i32_0 : i32, i32
  }
  func.func @transform_5(%arg0: i32) -> (i32, i32) {
    %c0_i32 = arith.constant 0 : i32
    %c0_i32_0 = arith.constant 0 : i32
    %c0_i32_1 = arith.constant 0 : i32
    return %c0_i32, %c0_i32_0 : i32, i32
  }
  func.func @transform_6(%arg0: i32) -> (i32, i32) {
    %c0_i32 = arith.constant 0 : i32
    %c0_i32_0 = arith.constant 0 : i32
    %c0_i32_1 = arith.constant 0 : i32
    return %c0_i32, %c0_i32_0 : i32, i32
  }
  func.func @transform_7(%arg0: i32) -> (i32, i32) {
    %c0_i32 = arith.constant 0 : i32
    %c0_i32_0 = arith.constant 0 : i32
    %c0_i32_1 = arith.constant 0 : i32
    return %c0_i32, %c0_i32_0 : i32, i32
  }
  func.func @transform_8(%arg0: i32) -> (i32, i32) {
    %c0_i32 = arith.constant 0 : i32
    %c0_i32_0 = arith.constant 0 : i32
    %c0_i32_1 = arith.constant 0 : i32
    return %c0_i32, %c0_i32_0 : i32, i32
  }
  func.func @transform_9(%arg0: i32) -> i32 {
    %c0_i32 = arith.constant 0 : i32
    %c0_i32_0 = arith.constant 0 : i32
    return %c0_i32 : i32
  }
  func.func @transform_10(%arg0: i32) -> i32 {
    %c0_i32 = arith.constant 0 : i32
    %c0_i32_0 = arith.constant 0 : i32
    return %c0_i32 : i32
  }
  func.func @transform_11(%arg0: i32) -> (i32, i32, i32) {
    %c0_i32 = arith.constant 0 : i32
    %c0_i32_0 = arith.constant 0 : i32
    %c0_i32_1 = arith.constant 0 : i32
    return %arg0, %c0_i32, %c0_i32_0 : i32, i32, i32
  }
}

</mosaic_0001>

<bundles_post_ra>
// kernel: ir_block_pallas.1
= control target key start
LH: loop header
LB: loop body
LE: loop exit
PB: predicated region body
PF: predicated region fallthrough
CT: control target
= control target key end

     0   :  { %s10078_s21 = smov 0   ;;  %s12154_s0 = inlined_call_operand.vmem [shape: f32[2,328,32], index: 0, kind: input, shape index: {}]   ;;  %s12155_s1 = inlined_call_operand.vmem [shape: f32[328,1], index: 1, kind: input, shape index: {}]   ;;  %s12156_s2 = inlined_call_operand.vmem [shape: bf16[9,32,32], index: 2, kind: input, shape index: {}]   ;;  %s12157_s3 = inlined_call_operand.vmem [shape: bf16[9,32,32], index: 3, kind: input, shape index: {}]   ;;  %s12158_s4 = inlined_call_operand.vmem [shape: f32[6,32], index: 4, kind: input, shape index: {}]   ;;  %s12159_s5 = inlined_call_operand.vmem [shape: f32[2,32], index: 5, kind: input, shape index: {}]   ;;  %s12160_s6 = inlined_call_operand.vmem [shape: f32[2,1], index: 6, kind: input, shape index: {}]   ;;  %s12161_s7 = inlined_call_operand.vmem [shape: f32[2,32], index: 7, kind: input, shape index: {}]   ;;  %s12162_s8 = inlined_call_operand.vmem [shape: f32[1,32], index: 8, kind: input, shape index: {}]   ;;  %s12163_s9 = inlined_call_operand.<no memory space> [shape: f32[1], index: 9, kind: input, shape index: {}]   ;;  %s12164_s10 = inlined_call_operand.<no memory space> [shape: f32[1], index: 10, kind: input, shape index: {}]   ;;  %s12165_s11 = inlined_call_operand.vmem [shape: f32[2,288,32], index: 11, kind: output, shape index: {}]  }
   0x1   :  { %16 = sst [smem:[#allocation4]] %s12163_s9 }
   0x2   :  { %17 = sst [smem:[#allocation5]] %s12164_s10 }
   0x3 LB: > { %s7853_s22 = sadd.s32 4294967295, %s10008_s21   ;;  %p7857_p0 = scmp.ge.s32.totalorder %s10008_s21, 1  ;;  %s10008_s21 = sphi %s10078_s21, %s23_s21  }
   0x4   : > { %p339_p1 = scmp.lt.s32.totalorder %s10008_s21, 3 }
   0x6   : > { %p340_p2 = pnand %p7857_p0, %p339_p1 }
   0x8   : > { %343 = sbr.rel (%p340_p2) target bundleno = 2234 (0x8ba), region = 64 }
   0xf   : > { %v400_v0 = vld [vmem:[%s12155_s1 + $0x10] sm:$0xff]  ;;  %v398_v1 = vld [vmem:[%s12155_s1] sm:$0xff]  ;;  %v10010_v2 = vmov 0   ;;  %v401_v3 = vld [vmem:[%s12155_s1 + $0x18] sm:$0xff]  ;;  %p379_p3 = scmp.lt.s32.totalorder %s7853_s22, 1  ;;  %vm852_vm0 = vcmask 261120  }
  0x10   : > { %9961 = vset.pattern.permute.xlu1 %v10010_v2  ;;  %9960 = vset.pattern.permute.xlu0 %v10010_v2  ;;  %v399_v4 = vld [vmem:[%s12155_s1 + $0x8] sm:$0xff]  ;;  %v402_v6 = vld [vmem:[%s12155_s1 + $0x20] sm:$0xff]  ;;  %v405_v7 = vld [vmem:[%s12155_s1 + $0x38] sm:$0xff]  ;;  %s390_s10 = sld [smem:[#allocation4]] }
  0x11   : > { %618 = vperm.xlu1 %9961, %v400_v0   ;;  %608 = vperm.xlu0 %9960, %v398_v1   ;;  %v403_v5 = vld [vmem:[%s12155_s1 + $0x28] sm:$0xff]  ;;  %v404_v8 = vld [vmem:[%s12155_s1 + $0x30] sm:$0xff]  ;;  %v406_v10 = vld [vmem:[%s12155_s1 + $0x40] sm:$0xff]  ;;  %s12246_s22 = smov (!%p379_p3, %s7853_s22), 1  ;;  %s391_s28 = sld [smem:[#allocation5]] }
  0x12   : > { %v407_v9 = vld [vmem:[%s12155_s1 + $0x48] sm:$0xff]  ;;  %v409_v11 = vld [vmem:[%s12155_s1 + $0x58] sm:$0xff]  ;;  %v408_v12 = vld [vmem:[%s12155_s1 + $0x50] sm:$0xff]  ;;  %s9948_s30 = smul.u32 328, %s12246_s22 }
  0x13   : > { %v411_v13 = vld [vmem:[%s12155_s1 + $0x68] sm:$0xff]  ;;  %v410_v14 = vld [vmem:[%s12155_s1 + $0x60] sm:$0xff]  ;;  %v9962_v15 = vld [vmem:[%s12156_s2 + $0x10] sm:$0xff]  }
  0x14   : > { %v413_v16 = vld [vmem:[%s12155_s1 + $0x78] sm:$0xff]  ;;  %v412_v17 = vld [vmem:[%s12155_s1 + $0x70] sm:$0xff]  ;;  %8652 = vmatprep.subr.bf16.mxu0 %v9962_v15  ;;  %v415_v19 = vld [vmem:[%s12155_s1 + $0x88] sm:$0xff]  ;;  %s10209_s20 = scalar_lea.vmem %s12154_s0, %s9948_s30 }
  0x15   : > { %623 = vperm.xlu1 %9961, %v401_v3   ;;  %613 = vperm.xlu0 %9960, %v399_v4   ;;  %v9963_v18 = vld [vmem:[%s12156_s2 + $0x18] sm:$0xff]   ;;  %v414_v20 = vld [vmem:[%s12155_s1 + $0x80] sm:$0xff]  ;;  %v416_v23 = vld [vmem:[%s12155_s1 + $0x90] sm:$0xff] }
  0x16   : > { %8653 = vmatpush3.bf16.msra.mxu0 %v9962_v15  ;;  %v10149_v21 = vld [vmem:[%s12156_s2] sm:$0xff]   ;;  %v417_v22 = vld [vmem:[%s12155_s1 + $0x98] sm:$0xff]  ;;  %v419_v24 = vld [vmem:[%s12155_s1 + $0xa8] sm:$0xff] }
  0x17   : > { %8654 = vmatprep.subr.bf16.mxu0 %v9963_v18  ;;  %v418_v25 = vld [vmem:[%s12155_s1 + $0xa0] sm:$0xff]  ;;  %v421_v26 = vld [vmem:[%s12155_s1 + $0xb8] sm:$0xff]  ;;  %v420_v27 = vld [vmem:[%s12155_s1 + $0xb0] sm:$0xff] }
  0x18   : > { %v423_v28 = vld [vmem:[%s12155_s1 + $0xc8] sm:$0xff]  ;;  %v422_v29 = vld [vmem:[%s12155_s1 + $0xc0] sm:$0xff]  ;;  %v425_v30 = vld [vmem:[%s12155_s1 + $0xd8] sm:$0xff] }
  0x19   : > { %633 = vperm.xlu1 %9961, %v403_v5   ;;  %628 = vperm.xlu0 %9960, %v402_v6   ;;  %v424_v31 = vld [vmem:[%s12155_s1 + $0xd0] sm:$0xff]  ;;  %v427_v32 = vld [vmem:[%s12155_s1 + $0xe8] sm:$0xff]  ;;  %v426_v33 = vld [vmem:[%s12155_s1 + $0xe0] sm:$0xff] }
  0x1a   : > { %8655 = vmatpush3.bf16.msra.mxu0 %v9963_v18  ;;  %v429_v34 = vld [vmem:[%s12155_s1 + $0xf8] sm:$0xff]  ;;  %v428_v35 = vld [vmem:[%s12155_s1 + $0xf0] sm:$0xff]  ;;  %v10204_v36 = vld [vmem:[%s12158_s4] ss:$0 sm:$0xff] }
  0x1b   : > { %8692 = vmatprep.subr.bf16.mxu0 %v10149_v21  ;;  %v508_v37 = vld [vmem:[%s10209_s20 + $0x108] sm:$0xff]  ;;  %v507_v38 = vld [vmem:[%s10209_s20 + $0x100] sm:$0xff]  ;;  %v510_v46 = vld [vmem:[%s10209_s20 + $0x118] sm:$0xff] }
  0x1c   : > { %v431_v39 = vld [vmem:[%s12155_s1 + $0x108] sm:$0xff]  ;;  %v430_v40 = vld [vmem:[%s12155_s1 + $0x100] sm:$0xff]  ;;  %v553_v41 = vmul.f32 %v10204_v36, %v508_v37  ;;  %v552_v42 = vmul.f32 %v10204_v36, %v507_v38  ;;  %v509_v47 = vld [vmem:[%s10209_s20 + $0x110] sm:$0xff]  ;;  %v555_v50 = vmul.f32 %v10204_v36, %v510_v46 }
  0x1d   : > { %643 = vperm.xlu1 %9961, %v405_v7   ;;  %638 = vperm.xlu0 %9960, %v404_v8   ;;  %v10224_v43 = vld [vmem:[%s12158_s4 + $0x1] ss:$0 sm:$0xff]  ;;  %v433_v48 = vld [vmem:[%s12155_s1 + $0x118] sm:$0xff]  ;;  %v432_v49 = vld [vmem:[%s12155_s1 + $0x110] sm:$0xff]  ;;  %v554_v51 = vmul.f32 %v10204_v36, %v509_v47 }
  0x1e   : > { %v10227_v44 = vadd.f32 %v10224_v43, %v553_v41  ;;  %v10230_v45 = vadd.f32 %v10224_v43, %v552_v42  ;;  %v10243_v52 = vadd.f32 %v10224_v43, %v555_v50  ;;  %v512_v54 = vld [vmem:[%s10209_s20 + $0x128] sm:$0xff]  ;;  %v511_v55 = vld [vmem:[%s10209_s20 + $0x120] sm:$0xff]  ;;  %v514_v62 = vld [vmem:[%s10209_s20 + $0x138] sm:$0xff] }
  0x1f   : > { %v10246_v53 = vadd.f32 %v10224_v43, %v554_v51  ;;  %v435_v56 = vld [vmem:[%s12155_s1 + $0x128] sm:$0xff]  ;;  %v434_v57 = vld [vmem:[%s12155_s1 + $0x120] sm:$0xff]  ;;  %v557_v58 = vmul.f32 %v10204_v36, %v512_v54  ;;  %v556_v59 = vmul.f32 %v10204_v36, %v511_v55  ;;  %v513_v63 = vld [vmem:[%s10209_s20 + $0x130] sm:$0xff]  ;;  %v559_v2 = vmul.f32 %v10204_v36, %v514_v62 }
  0x20   : > { %v437_v0 = vld [vmem:[%s12155_s1 + $0x138] sm:$0xff]  ;;  %v436_v1 = vld [vmem:[%s12155_s1 + $0x130] sm:$0xff]  ;;  %v558_v3 = vmul.f32 %v10204_v36, %v513_v63  ;;  %v515_v6 = vld [vmem:[%s10209_s20 + $0x140] sm:$0xff] }
  0x21   : > { %653 = vperm.xlu1 %9961, %v407_v9   ;;  %648 = vperm.xlu0 %9960, %v406_v10   ;;  %v10259_v60 = vadd.f32 %v10224_v43, %v557_v58  ;;  %v10262_v61 = vadd.f32 %v10224_v43, %v556_v59  ;;  %v10275_v4 = vadd.f32 %v10224_v43, %v559_v2  ;;  %v439_v7 = vld [vmem:[%s12155_s1 + $0x13] sm:$0xff]  ;;  %v438_v8 = vld [vmem:[%s12155_s1 + $0x140] sm:$0xff]  ;;  %v446_v18 = vld [vmem:[%s12155_s1 + $0x4b] sm:$0xff] }
  0x22   : > { %v10278_v5 = vadd.f32 %v10224_v43, %v558_v3  ;;  %v560_v9 = vmul.f32 %v10204_v36, %v515_v6  ;;  %v445_v15 = vld [vmem:[%s12155_s1 + $0x43] sm:$0xff]  ;;  %v478_v37 = vld [vmem:[%s10209_s20 + $0x18] sm:$0xff]  ;;  %v462_v51 = vld [vmem:[%s12155_s1 + $0xcb] sm:$0xff] }
  0x23   : > { %v461_v38 = vld [vmem:[%s12155_s1 + $0xc3] sm:$0xff]  ;;  %v523_v41 = vmul.f32 %v10204_v36, %v478_v37  ;;  %v463_v50 = vld [vmem:[%s12155_s1 + $0xd3] sm:$0xff]  ;;  %v464_v2 = vld [vmem:[%s12155_s1 + $0xdb] sm:$0xff] }
  0x24   : > { %v10289_v10 = vadd.f32 %v10224_v43, %v560_v9  ;;  %v481_v3 = vld [vmem:[%s10209_s20 + $0x30] sm:$0xff] }
  0x25   : > { %663 = vperm.xlu1 %9961, %v409_v11   ;;  %658 = vperm.xlu0 %9960, %v408_v12   ;;  %v441_v11 = vld [vmem:[%s12155_s1 + $0x23] sm:$0xff]  ;;  %v440_v12 = vld [vmem:[%s12155_s1 + $0x1b] sm:$0xff] }
  0x29   : > { %673 = vperm.xlu1 %9961, %v411_v13   ;;  %668 = vperm.xlu0 %9960, %v410_v14   ;;  %v443_v13 = vld [vmem:[%s12155_s1 + $0x33] sm:$0xff]  ;;  %v442_v14 = vld [vmem:[%s12155_s1 + $0x2b] sm:$0xff] }
  0x2d   : > { %683 = vperm.xlu1 %9961, %v413_v16   ;;  %678 = vperm.xlu0 %9960, %v412_v17   ;;  %v444_v16 = vld [vmem:[%s12155_s1 + $0x3b] sm:$0xff]  ;;  %v447_v17 = vld [vmem:[%s12155_s1 + $0x53] sm:$0xff] }
  0x31   : > { %693 = vperm.xlu1 %9961, %v415_v19   ;;  %688 = vperm.xlu0 %9960, %v414_v20   ;;  %v449_v19 = vld [vmem:[%s12155_s1 + $0x63] sm:$0xff]  ;;  %v448_v20 = vld [vmem:[%s12155_s1 + $0x5b] sm:$0xff] }
  0x35   : > { %703 = vperm.xlu1 %9961, %v417_v22   ;;  %698 = vperm.xlu0 %9960, %v416_v23   ;;  %v451_v22 = vld [vmem:[%s12155_s1 + $0x73] sm:$0xff]  ;;  %v450_v23 = vld [vmem:[%s12155_s1 + $0x6b] sm:$0xff] }
  0x39   : > { %713 = vperm.xlu1 %9961, %v419_v24   ;;  %708 = vperm.xlu0 %9960, %v418_v25   ;;  %v453_v24 = vld [vmem:[%s12155_s1 + $0x83] sm:$0xff]  ;;  %v452_v25 = vld [vmem:[%s12155_s1 + $0x7b] sm:$0xff] }
  0x3d   : > { %723 = vperm.xlu1 %9961, %v421_v26   ;;  %718 = vperm.xlu0 %9960, %v420_v27   ;;  %v455_v26 = vld [vmem:[%s12155_s1 + $0x93] sm:$0xff]  ;;  %v454_v27 = vld [vmem:[%s12155_s1 + $0x8b] sm:$0xff] }
  0x41   : > { %733 = vperm.xlu1 %9961, %v423_v28   ;;  %728 = vperm.xlu0 %9960, %v422_v29   ;;  %v457_v28 = vld [vmem:[%s12155_s1 + $0xa3] sm:$0xff]  ;;  %v456_v29 = vld [vmem:[%s12155_s1 + $0x9b] sm:$0xff] }
  0x45   : > { %743 = vperm.xlu1 %9961, %v425_v30   ;;  %738 = vperm.xlu0 %9960, %v424_v31   ;;  %v459_v30 = vld [vmem:[%s12155_s1 + $0xb3] sm:$0xff]  ;;  %v458_v31 = vld [vmem:[%s12155_s1 + $0xab] sm:$0xff] }
  0x49   : > { %753 = vperm.xlu1 %9961, %v427_v32   ;;  %748 = vperm.xlu0 %9960, %v426_v33   ;;  %v477_v32 = vld [vmem:[%s10209_s20 + $0x10] sm:$0xff]  ;;  %v475_v33 = vld [vmem:[%s10209_s20] sm:$0xff] }
  0x4d   : > { %763 = vperm.xlu1 %9961, %v429_v34   ;;  %758 = vperm.xlu0 %9960, %v428_v35   ;;  %v522_v34 = vmul.f32 %v10204_v36, %v477_v32  ;;  %v520_v35 = vmul.f32 %v10204_v36, %v475_v33 }
  0x4f   : > { %v567_v42 = vadd.f32 %v10224_v43, %v522_v34  ;;  %v565_v46 = vadd.f32 %v10224_v43, %v520_v35 }
  0x51   : > { %773 = vperm.xlu1 %9961, %v431_v39   ;;  %768 = vperm.xlu0 %9960, %v430_v40   ;;  %v460_v39 = vld [vmem:[%s12155_s1 + $0xbb] sm:$0xff]  ;;  %v476_v40 = vld [vmem:[%s10209_s20 + $0x8] sm:$0xff] }
  0x52   : > { %v521_v47 = vmul.f32 %v10204_v36, %v476_v40  ;;  %v471_v40 = vld [vmem:[%s12155_s1 + $0x113] sm:$0xff] }
  0x54   : > { %v566_v63 = vadd.f32 %v10224_v43, %v521_v47  ;;  %v470_v47 = vld [vmem:[%s12155_s1 + $0x10b] sm:$0xff] }
  0x55   : > { %783 = vperm.xlu1 %9961, %v433_v48   ;;  %778 = vperm.xlu0 %9960, %v432_v49   ;;  %v480_v48 = vld [vmem:[%s10209_s20 + $0x28] sm:$0xff]  ;;  %v479_v49 = vld [vmem:[%s10209_s20 + $0x20] sm:$0xff] }
  0x56   : > { %v524_v58 = vmul.f32 %v10204_v36, %v479_v49 }
  0x58   : > { %v569_v9 = vadd.f32 %v10224_v43, %v524_v58 }
  0x59   : > { %793 = vperm.xlu1 %9961, %v435_v56   ;;  %788 = vperm.xlu0 %9960, %v434_v57   ;;  %v568_v56 = vadd.f32 %v10224_v43, %v523_v41  ;;  %v525_v57 = vmul.f32 %v10204_v36, %v480_v48 }
  0x5d   : > { %803 = vperm.xlu1 %9961, %v437_v0   ;;  %798 = vperm.xlu0 %9960, %v436_v1   ;;  %v482_v0 = vld [vmem:[%s10209_s20 + $0x38] sm:$0xff]  ;;  %v465_v1 = vld [vmem:[%s12155_s1 + $0xe3] sm:$0xff] }
  0x61   : > { %4095 = vperm.xlu1 %9961, %v439_v7   ;;  %808 = vperm.xlu0 %9960, %v438_v8   ;;  %v570_v8 = vadd.f32 %v10224_v43, %v525_v57 }
  0x65   : > { %4105 = vperm.xlu1 %9961, %v441_v11   ;;  %4100 = vperm.xlu0 %9960, %v440_v12   ;;  %v527_v11 = vmul.f32 %v10204_v36, %v482_v0  ;;  %v490_v0 = vld [vmem:[%s10209_s20 + $0x78] sm:$0xff] }
  0x69   : > { %4115 = vperm.xlu1 %9961, %v443_v13   ;;  %4110 = vperm.xlu0 %9960, %v442_v14   ;;  %v526_v14 = vmul.f32 %v10204_v36, %v481_v3 }
  0x6d   : > { %4125 = vperm.xlu1 %9961, %v445_v15   ;;  %4120 = vperm.xlu0 %9960, %v444_v16   ;;  %v484_v15 = vld [vmem:[%s10209_s20 + $0x48] sm:$0xff]  ;;  %v483_v16 = vld [vmem:[%s10209_s20 + $0x40] sm:$0xff] }
  0x71   : > { %4135 = vperm.xlu1 %9961, %v447_v17   ;;  %4130 = vperm.xlu0 %9960, %v446_v18   ;;  %v467_v17 = vld [vmem:[%s12155_s1 + $0xf3] sm:$0xff]  ;;  %v466_v18 = vld [vmem:[%s12155_s1 + $0xeb] sm:$0xff] }
  0x75   : > { %4145 = vperm.xlu1 %9961, %v449_v19   ;;  %4140 = vperm.xlu0 %9960, %v448_v20  }
  0x79   : > { %4155 = vperm.xlu1 %9961, %v451_v22   ;;  %4150 = vperm.xlu0 %9960, %v450_v23   ;;  %v572_v22 = vadd.f32 %v10224_v43, %v527_v11  ;;  %v529_v23 = vmul.f32 %v10204_v36, %v484_v15 }
  0x7b   : > { %v574_v34 = vadd.f32 %v10224_v43, %v529_v23 }
  0x7d   : > { %4165 = vperm.xlu1 %9961, %v453_v24   ;;  %4160 = vperm.xlu0 %9960, %v452_v25   ;;  %v528_v24 = vmul.f32 %v10204_v36, %v483_v16 }
  0x7f   : > { %v573_v35 = vadd.f32 %v10224_v43, %v528_v24 }
  0x81   : > { %4175 = vperm.xlu1 %9961, %v455_v26   ;;  %4170 = vperm.xlu0 %9960, %v454_v27   ;;  %v571_v27 = vadd.f32 %v10224_v43, %v526_v14  ;;  %v9965_v14 = vld [vmem:[%s12156_s2 + $0x8] sm:$0xff]  }
  0x85   : > { %4185 = vperm.xlu1 %9961, %v457_v28   ;;  %4180 = vperm.xlu0 %9960, %v456_v29   ;;  %v486_v28 = vld [vmem:[%s10209_s20 + $0x58] sm:$0xff]  ;;  %v469_v29 = vld [vmem:[%s12155_s1 + $0x103] sm:$0xff] }
  0x86   : > { %v531_v37 = vmul.f32 %v10204_v36, %v486_v28 }
  0x89   : > { %4195 = vperm.xlu1 %9961, %v459_v30   ;;  %4190 = vperm.xlu0 %9960, %v458_v31   ;;  %v468_v30 = vld [vmem:[%s12155_s1 + $0xfb] sm:$0xff]  ;;  %v485_v31 = vld [vmem:[%s10209_s20 + $0x50] sm:$0xff] }
  0x8a   : > { %v530_v41 = vmul.f32 %v10204_v36, %v485_v31 }
  0x8d   : > { %4205 = vperm.xlu1 %9961, %v461_v38   ;;  %4200 = vperm.xlu0 %9960, %v460_v39  }
  0x90   : > { %v619_v54 = vpop.permute.xlu1 %618  ;;  %v609_v55 = vpop.permute.xlu0 %608 }
  0x91   : > { %v813_v59 = vmul.f32 %v619_v54, %v567_v42  ;;  %v811_v62 = vmul.f32 %v609_v55, %v565_v46  ;;  %4215 = vperm.xlu1 %9961, %v463_v50   ;;  %4210 = vperm.xlu0 %9960, %v462_v51   ;;  %v488_v42 = vld [vmem:[%s10209_s20 + $0x68] sm:$0xff]  ;;  %v487_v46 = vld [vmem:[%s10209_s20 + $0x60] sm:$0xff]  ;;  %v576_v55 = vadd.f32 %v10224_v43, %v531_v37  ;;  %v493_v37 = vld [vmem:[%s10209_s20 + $0x90] sm:$0xff] }
  0x92   : > { %v532_v57 = vmul.f32 %v10204_v36, %v487_v46 }
  0x93   : > { %855 = vst.msk [vmem:[#allocation2 + $0x10] sm:$0xff] %vm852_vm0, %v813_v59  ;;  %853 = vst.msk [vmem:[#allocation2] sm:$0xff] %vm852_vm0, %v811_v62  ;;  %v575_v62 = vadd.f32 %v10224_v43, %v530_v41 }
  0x94   : > { %v624_v6 = vpop.permute.xlu1 %623  ;;  %v614_v7 = vpop.permute.xlu0 %613 }
  0x95   : > { %v814_v12 = vmul.f32 %v624_v6, %v568_v56  ;;  %v812_v13 = vmul.f32 %v614_v7, %v566_v63  ;;  %4225 = vperm.xlu1 %9961, %v465_v1   ;;  %4220 = vperm.xlu0 %9960, %v464_v2   ;;  %v533_v56 = vmul.f32 %v10204_v36, %v488_v42  ;;  %v473_v63 = vld [vmem:[%s12155_s1 + $0x123] sm:$0xff]  ;;  %v489_v1 = vld [vmem:[%s10209_s20 + $0x70] sm:$0xff]  ;;  %v472_v2 = vld [vmem:[%s12155_s1 + $0x11b] sm:$0xff] }
  0x97   : > { %856 = vst.msk [vmem:[#allocation2 + $0x18] sm:$0xff] %vm852_vm0, %v814_v12  ;;  %854 = vst.msk [vmem:[#allocation2 + $0x8] sm:$0xff] %vm852_vm0, %v812_v13  ;;  %v578_v11 = vadd.f32 %v10224_v43, %v533_v56  ;;  %v535_v12 = vmul.f32 %v10204_v36, %v490_v0  ;;  %v534_v13 = vmul.f32 %v10204_v36, %v489_v1 }
  0x98   : > { %v634_v19 = vpop.permute.xlu1 %633  ;;  %v629_v20 = vpop.permute.xlu0 %628 }
  0x99   : > { %v816_v25 = vmul.f32 %v634_v19, %v570_v8  ;;  %v815_v26 = vmul.f32 %v629_v20, %v569_v9  ;;  %4235 = vperm.xlu1 %9961, %v467_v17   ;;  %4230 = vperm.xlu0 %9960, %v466_v18   ;;  %v577_v17 = vadd.f32 %v10224_v43, %v532_v57  ;;  %v492_v18 = vld [vmem:[%s10209_s20 + $0x88] sm:$0xff]  ;;  %v491_v19 = vld [vmem:[%s10209_s20 + $0x80] sm:$0xff] }
  0x9a   : > { %v474_v20 = vld [vmem:[%s12155_s1 + $0x12b] sm:$0xff]  ;;  %v537_v28 = vmul.f32 %v10204_v36, %v492_v18 }
  0x9b   : > { %858 = vst.msk [vmem:[#allocation2 + $0x28] sm:$0xff] %vm852_vm0, %v816_v25  ;;  %857 = vst.msk [vmem:[#allocation2 + $0x20] sm:$0xff] %vm852_vm0, %v815_v26 }
  0x9c   : > { %v644_v32 = vpop.permute.xlu1 %643  ;;  %v639_v33 = vpop.permute.xlu0 %638  ;;  %v582_v41 = vadd.f32 %v10224_v43, %v537_v28 }
  0x9d   : > { %v818_v38 = vmul.f32 %v644_v32, %v572_v22  ;;  %v817_v39 = vmul.f32 %v639_v33, %v571_v27  ;;  %4245 = vperm.xlu1 %9961, %v469_v29   ;;  %4240 = vperm.xlu0 %9960, %v468_v30   ;;  %v580_v27 = vadd.f32 %v10224_v43, %v535_v12  ;;  %v10468_v30 = vld [vmem:[%s12156_s2 + $0x20] sm:$0xff]   ;;  %v494_v33 = vld [vmem:[%s10209_s20 + $0x98] sm:$0xff] }
  0x9e   : > { %v952_v48 = vld [vmem:[#allocation2 + $0x1] sm:$0xff]  ;;  %v953_v49 = vld [vmem:[#allocation2 + $0x9] sm:$0xff]  ;;  %v954_v3 = vld [vmem:[#allocation2 + $0x11] sm:$0xff]  ;;  %v536_v29 = vmul.f32 %v10204_v36, %v491_v19  ;;  %v539_v42 = vmul.f32 %v10204_v36, %v494_v33 }
  0x9f   : > { %860 = vst.msk [vmem:[#allocation2 + $0x38] sm:$0xff] %vm852_vm0, %v818_v38  ;;  %859 = vst.msk [vmem:[#allocation2 + $0x30] sm:$0xff] %vm852_vm0, %v817_v39  ;;  %v988_v50 = vpack.c.bf16 %v953_v49, %v952_v48  ;;  %v538_v49 = vmul.f32 %v10204_v36, %v493_v37  ;;  %v500_v19 = vld [vmem:[%s10209_s20 + $0xc8] sm:$0xff]  ;;  %v502_v33 = vld [vmem:[%s10209_s20 + $0xd8] sm:$0xff] }
  0xa0   : > { %v654_v51 = vpop.permute.xlu1 %653  ;;  %v649_v54 = vpop.permute.xlu0 %648  ;;  %v581_v48 = vadd.f32 %v10224_v43, %v536_v29  ;;  %v584_v1 = vadd.f32 %v10224_v43, %v539_v42  ;;  %v501_v37 = vld [vmem:[%s10209_s20 + $0xd0] sm:$0xff] }
  0xa1   : > { %v820_v58 = vmul.f32 %v654_v51, %v574_v34  ;;  %v819_v59 = vmul.f32 %v649_v54, %v573_v35  ;;  %4255 = vperm.xlu1 %9961, %v471_v40   ;;  %4250 = vperm.xlu0 %9960, %v470_v47   ;;  %v495_v51 = vld [vmem:[%s10209_s20 + $0xa0] sm:$0xff] }
  0xa2   : > { %8656 = vmatprep.mubr.msk.bf16.mxu0 %vm852_vm0, %v988_v50  ;;  %v955_v6 = vld [vmem:[#allocation2 + $0x19] sm:$0xff]  ;;  %v956_v22 = vld [vmem:[#allocation2 + $0x21] sm:$0xff] }
  0xa3   : > { %862 = vst.msk [vmem:[#allocation2 + $0x48] sm:$0xff] %vm852_vm0, %v820_v58  ;;  %861 = vst.msk [vmem:[#allocation2 + $0x40] sm:$0xff] %vm852_vm0, %v819_v59  ;;  %v989_v7 = vpack.c.bf16 %v955_v6, %v954_v3  ;;  %v496_v50 = vld [vmem:[%s10209_s20 + $0xa8] sm:$0xff]  ;;  %v498_v3 = vld [vmem:[%s10209_s20 + $0xb8] sm:$0xff] }
  0xa4   : > { %v664_v8 = vpop.permute.xlu1 %663  ;;  %v659_v9 = vpop.permute.xlu0 %658  ;;  %v541_v59 = vmul.f32 %v10204_v36, %v496_v50  ;;  %v504_v50 = vld [vmem:[%s10209_s20 + $0xe8] sm:$0xff] }
  0xa5   : > { %v822_v15 = vmul.f32 %v664_v8, %v576_v55  ;;  %v821_v16 = vmul.f32 %v659_v9, %v575_v62  ;;  %4265 = vperm.xlu1 %9961, %v473_v63   ;;  %4260 = vperm.xlu0 %9960, %v472_v2   ;;  %v540_v62 = vmul.f32 %v10204_v36, %v495_v51  ;;  %v497_v8 = vld [vmem:[%s10209_s20 + $0xb0] sm:$0xff]  ;;  %v503_v51 = vld [vmem:[%s10209_s20 + $0xe0] sm:$0xff] }
  0xa6   : > { %8657 = vmatmul.mubr.msk.bf16.vlgmr.msra.gmra.mrb[0].mxu0 %vm852_vm0, %v989_v7  ;;  %v957_v23 = vld [vmem:[#allocation2 + $0x29] sm:$0xff]  ;;  %v958_v34 = vld [vmem:[#allocation2 + $0x31] sm:$0xff]  ;;  %v583_v2 = vadd.f32 %v10224_v43, %v538_v49  ;;  %v542_v18 = vmul.f32 %v10204_v36, %v497_v8  ;;  %v546_v49 = vmul.f32 %v10204_v36, %v501_v37 }
  0xa7   : > { %864 = vst.msk [vmem:[#allocation2 + $0x58] sm:$0xff] %vm852_vm0, %v822_v15  ;;  %863 = vst.msk [vmem:[#allocation2 + $0x50] sm:$0xff] %vm852_vm0, %v821_v16  ;;  %8693 = vmatpush3.bf16.msra.mxu0 %v10149_v21  ;;  %v990_v24 = vpack.c.bf16 %v957_v23, %v956_v22  ;;  %v579_v21 = vadd.f32 %v10224_v43, %v534_v13  ;;  %v586_v13 = vadd.f32 %v10224_v43, %v541_v59  ;;  %v505_v8 = vld [vmem:[%s10209_s20 + $0xf0] sm:$0xff] }
  0xa8   : > { %v674_v25 = vpop.permute.xlu1 %673  ;;  %v669_v26 = vpop.permute.xlu0 %668  ;;  %8694 = vmatprep.subr.bf16.mxu0 %v9965_v14  ;;  %v549_v59 = vmul.f32 %v10204_v36, %v504_v50 }
  0xa9   : > { %v824_v31 = vmul.f32 %v674_v25, %v578_v11  ;;  %v823_v32 = vmul.f32 %v669_v26, %v577_v17  ;;  %4270 = vperm.xlu0 %9960, %v474_v20   ;;  %8660 = vmatprep.mubr.msk.bf16.mxu0 %vm852_vm0, %v990_v24  ;;  %v543_v17 = vmul.f32 %v10204_v36, %v498_v3  ;;  %v499_v20 = vld [vmem:[%s10209_s20 + $0xc0] sm:$0xff]  ;;  %v506_v3 = vld [vmem:[%s10209_s20 + $0xf8] sm:$0xff] }
  0xaa   : > { %v959_v35 = vld [vmem:[#allocation2 + $0x39] sm:$0xff]  ;;  %v960_v54 = vld [vmem:[#allocation2 + $0x41] sm:$0xff]  ;;  %v544_v28 = vmul.f32 %v10204_v36, %v499_v20 }
  0xab   : > { %866 = vst.msk [vmem:[#allocation2 + $0x68] sm:$0xff] %vm852_vm0, %v824_v31  ;;  %865 = vst.msk [vmem:[#allocation2 + $0x60] sm:$0xff] %vm852_vm0, %v823_v32  ;;  %v991_v38 = vpack.c.bf16 %v959_v35, %v958_v34  ;;  %8695 = vmatpush3.bf16.msra.mxu0 %v9965_v14  ;;  %v585_v14 = vadd.f32 %v10224_v43, %v540_v62  ;;  %v588_v32 = vadd.f32 %v10224_v43, %v543_v17 }
  0xac   : > { %v684_v39 = vpop.permute.xlu1 %683  ;;  %v679_v40 = vpop.permute.xlu0 %678  ;;  %8732 = vmatprep.subr.bf16.mxu0 %v10468_v30  ;;  %v589_v42 = vadd.f32 %v10224_v43, %v544_v28  ;;  %v548_v62 = vmul.f32 %v10204_v36, %v503_v51  ;;  %v551_v17 = vmul.f32 %v10204_v36, %v506_v3 }
  0xad   : > { %v826_v46 = vmul.f32 %v684_v39, %v580_v27  ;;  %v825_v47 = vmul.f32 %v679_v40, %v579_v21  ;;  %v545_v27 = vmul.f32 %v10204_v36, %v500_v19  ;;  %v587_v21 = vadd.f32 %v10224_v43, %v542_v18 }
  0xae   : > { %8661 = vmatmul.mubr.msk.bf16.gmra.mrb[4].mxu0 %vm852_vm0, %v991_v38  ;;  %v961_v55 = vld [vmem:[#allocation2 + $0x49] sm:$0xff]  ;;  %v962_v6 = vld [vmem:[#allocation2 + $0x51] sm:$0xff]  ;;  %v550_v18 = vmul.f32 %v10204_v36, %v505_v8 }
  0xaf   : > { %868 = vst.msk [vmem:[#allocation2 + $0x78] sm:$0xff] %vm852_vm0, %v826_v46  ;;  %867 = vst.msk [vmem:[#allocation2 + $0x70] sm:$0xff] %vm852_vm0, %v825_v47  ;;  %v992_v56 = vpack.c.bf16 %v961_v55, %v960_v54 }
  0xb0   : > { %v694_v57 = vpop.permute.xlu1 %693  ;;  %v689_v58 = vpop.permute.xlu0 %688  ;;  %v595_v28 = vadd.f32 %v10224_v43, %v550_v18  ;;  %v10580_v18 = vld [vmem:[%s12156_s2 + $0x30] sm:$0xff]  }
  0xb1   : > { %v828_v63 = vmul.f32 %v694_v57, %v582_v41  ;;  %v827_v0 = vmul.f32 %v689_v58, %v581_v48  ;;  %8664 = vmatprep.mubr.msk.bf16.mxu0 %vm852_vm0, %v992_v56  ;;  %v590_v41 = vadd.f32 %v10224_v43, %v545_v27  ;;  %v547_v48 = vmul.f32 %v10204_v36, %v502_v33 }
  0xb2   : > { %v963_v7 = vld [vmem:[#allocation2 + $0x59] sm:$0xff]  ;;  %v964_v22 = vld [vmem:[#allocation2 + $0x61] sm:$0xff]  ;;  %v596_v27 = vadd.f32 %v10224_v43, %v551_v17 }
  0xb3   : > { %870 = vst.msk [vmem:[#allocation2 + $0x88] sm:$0xff] %vm852_vm0, %v828_v63  ;;  %869 = vst.msk [vmem:[#allocation2 + $0x80] sm:$0xff] %vm852_vm0, %v827_v0  ;;  %v993_v9 = vpack.c.bf16 %v963_v7, %v962_v6 }
  0xb4   : > { %v704_v11 = vpop.permute.xlu1 %703  ;;  %v699_v12 = vpop.permute.xlu0 %698 }
  0xb5   : > { %v830_v15 = vmul.f32 %v704_v11, %v584_v1  ;;  %v829_v16 = vmul.f32 %v699_v12, %v583_v2  ;;  %v592_v1 = vadd.f32 %v10224_v43, %v547_v48  ;;  %v591_v2 = vadd.f32 %v10224_v43, %v546_v49 }
  0xb6   : > { %8665 = vmatmul.mubr.msk.bf16.gmra.mrb[8].mxu0 %vm852_vm0, %v993_v9  ;;  %v965_v23 = vld [vmem:[#allocation2 + $0x69] sm:$0xff]  ;;  %v966_v34 = vld [vmem:[#allocation2 + $0x71] sm:$0xff] }
  0xb7   : > { %872 = vst.msk [vmem:[#allocation2 + $0x98] sm:$0xff] %vm852_vm0, %v830_v15  ;;  %871 = vst.msk [vmem:[#allocation2 + $0x90] sm:$0xff] %vm852_vm0, %v829_v16  ;;  %v994_v24 = vpack.c.bf16 %v965_v23, %v964_v22 }
  0xb8   : > { %v714_v25 = vpop.permute.xlu1 %713  ;;  %v709_v26 = vpop.permute.xlu0 %708 }
  0xb9   : > { %v832_v29 = vmul.f32 %v714_v25, %v586_v13  ;;  %v831_v31 = vmul.f32 %v709_v26, %v585_v14  ;;  %8668 = vmatprep.mubr.msk.bf16.mxu0 %vm852_vm0, %v994_v24  ;;  %v594_v13 = vadd.f32 %v10224_v43, %v549_v59  ;;  %v593_v14 = vadd.f32 %v10224_v43, %v548_v62 }
  0xba   : > { %v967_v35 = vld [vmem:[#allocation2 + $0x79] sm:$0xff]  ;;  %v968_v54 = vld [vmem:[#allocation2 + $0x81] sm:$0xff] }
  0xbb   : > { %874 = vst.msk [vmem:[#allocation2 + $0xa8] sm:$0xff] %vm852_vm0, %v832_v29  ;;  %873 = vst.msk [vmem:[#allocation2 + $0xa0] sm:$0xff] %vm852_vm0, %v831_v31  ;;  %v995_v38 = vpack.c.bf16 %v967_v35, %v966_v34 }
  0xbc   : > { %v724_v39 = vpop.permute.xlu1 %723  ;;  %v719_v40 = vpop.permute.xlu0 %718 }
  0xbd   : > { %v834_v46 = vmul.f32 %v724_v39, %v588_v32  ;;  %v833_v47 = vmul.f32 %v719_v40, %v587_v21 }
  0xbe   : > { %8669 = vmatmul.mubr.msk.bf16.gmra.mrb[12].mxu0 %vm852_vm0, %v995_v38  ;;  %v969_v55 = vld [vmem:[#allocation2 + $0x89] sm:$0xff]  ;;  %v970_v6 = vld [vmem:[#allocation2 + $0x91] sm:$0xff] }
  0xbf   : > { %876 = vst.msk [vmem:[#allocation2 + $0xb8] sm:$0xff] %vm852_vm0, %v834_v46  ;;  %875 = vst.msk [vmem:[#allocation2 + $0xb0] sm:$0xff] %vm852_vm0, %v833_v47  ;;  %v996_v56 = vpack.c.bf16 %v969_v55, %v968_v54 }
  0xc0   : > { %v734_v57 = vpop.permute.xlu1 %733  ;;  %v729_v58 = vpop.permute.xlu0 %728 }
  0xc1   : > { %v836_v63 = vmul.f32 %v734_v57, %v590_v41  ;;  %v835_v0 = vmul.f32 %v729_v58, %v589_v42  ;;  %8672 = vmatprep.mubr.msk.bf16.mxu0 %vm852_vm0, %v996_v56 }
  0xc2   : > { %v971_v7 = vld [vmem:[#allocation2 + $0x99] sm:$0xff]  ;;  %v972_v19 = vld [vmem:[#allocation2 + $0xa1] sm:$0xff] }
  0xc3   : > { %878 = vst.msk [vmem:[#allocation2 + $0xc8] sm:$0xff] %vm852_vm0, %v836_v63  ;;  %877 = vst.msk [vmem:[#allocation2 + $0xc0] sm:$0xff] %vm852_vm0, %v835_v0  ;;  %v997_v9 = vpack.c.bf16 %v971_v7, %v970_v6 }
  0xc4   : > { %v744_v11 = vpop.permute.xlu1 %743  ;;  %v739_v12 = vpop.permute.xlu0 %738 }
  0xc5   : > { %v838_v15 = vmul.f32 %v744_v11, %v592_v1  ;;  %v837_v16 = vmul.f32 %v739_v12, %v591_v2  ;;  %v896_v12 = vld [vmem:[#allocation2 + $0x10] sm:$0xff] }
  0xc6   : > { %8673 = vmatmul.mubr.msk.bf16.gmra.mrb[16].mxu0 %vm852_vm0, %v997_v9  ;;  %v973_v20 = vld [vmem:[#allocation2 + $0xa9] sm:$0xff]  ;;  %v974_v36 = vld [vmem:[#allocation2 + $0xb1] sm:$0xff] }
  0xc7   : > { %880 = vst.msk [vmem:[#allocation2 + $0xd8] sm:$0xff] %vm852_vm0, %v838_v15  ;;  %879 = vst.msk [vmem:[#allocation2 + $0xd0] sm:$0xff] %vm852_vm0, %v837_v16  ;;  %v998_v22 = vpack.c.bf16 %v973_v20, %v972_v19  ;;  %v895_v9 = vld [vmem:[#allocation2 + $0x8] sm:$0xff]  ;;  %v900_v19 = vld [vmem:[#allocation2 + $0x30] sm:$0xff] }
  0xc8   : > { %v754_v23 = vpop.permute.xlu1 %753  ;;  %v749_v24 = vpop.permute.xlu0 %748  ;;  %v899_v15 = vld [vmem:[#allocation2 + $0x28] sm:$0xff]  ;;  %v901_v20 = vld [vmem:[#allocation2 + $0x38] sm:$0xff] }
  0xc9   : > { %v840_v25 = vmul.f32 %v754_v23, %v594_v13  ;;  %v839_v26 = vmul.f32 %v749_v24, %v593_v14  ;;  %8676 = vmatprep.mubr.msk.bf16.mxu0 %vm852_vm0, %v998_v22  ;;  %v897_v13 = vld [vmem:[#allocation2 + $0x18] sm:$0xff]  ;;  %v898_v14 = vld [vmem:[#allocation2 + $0x20] sm:$0xff]  ;;  %v903_v23 = vld [vmem:[#allocation2 + $0x48] sm:$0xff]  ;;  %v933_v24 = vpack.c.bf16 %v901_v20, %v900_v19 }
  0xca   : > { %v975_v29 = vld [vmem:[#allocation2 + $0xb9] sm:$0xff]  ;;  %v976_v35 = vld [vmem:[#allocation2 + $0xc1] sm:$0xff]  ;;  %v931_v16 = vpack.c.bf16 %v897_v13, %v896_v12  ;;  %v932_v17 = vpack.c.bf16 %v899_v15, %v898_v14  ;;  %v1506_v13 = vld [vmem:[#allocation2 + $0x4a] sm:$0xff] }
  0xcb   : > { %882 = vst.msk [vmem:[#allocation2 + $0xe8] sm:$0xff] %vm852_vm0, %v840_v25  ;;  %881 = vst.msk [vmem:[#allocation2 + $0xe0] sm:$0xff] %vm852_vm0, %v839_v26  ;;  %v999_v31 = vpack.c.bf16 %v975_v29, %v974_v36  ;;  %v902_v22 = vld [vmem:[#allocation2 + $0x40] sm:$0xff]  ;;  %v905_v26 = vld [vmem:[#allocation2 + $0x58] sm:$0xff] }
  0xcc   : > { %v764_v32 = vpop.permute.xlu1 %763  ;;  %v759_v21 = vpop.permute.xlu0 %758  ;;  %v934_v25 = vpack.c.bf16 %v903_v23, %v902_v22  ;;  %v1504_v12 = vld [vmem:[#allocation2 + $0x3a] sm:$0xff]  ;;  %v1503_v14 = vld [vmem:[#allocation2 + $0x32] sm:$0xff]  ;;  %v1509_v22 = vld [vmem:[#allocation2 + $0x62] sm:$0xff] }
  0xcd   : > { %v842_v33 = vmul.f32 %v764_v32, %v596_v27  ;;  %v841_v34 = vmul.f32 %v759_v21, %v595_v28  ;;  %v906_v27 = vld [vmem:[#allocation2 + $0x60] sm:$0xff]  ;;  %v907_v28 = vld [vmem:[#allocation2 + $0x68] sm:$0xff]  ;;  %v909_v32 = vld [vmem:[#allocation2 + $0x78] sm:$0xff]  ;;  %v1536_v15 = vpack.c.bf16 %v1504_v12, %v1503_v14 }
  0xce   : > { %8677 = vmatmul.mubr.msk.bf16.gmra.mrb[20].mxu0 %vm852_vm0, %v999_v31  ;;  %v977_v37 = vld [vmem:[#allocation2 + $0xc9] sm:$0xff]  ;;  %v978_v42 = vld [vmem:[#allocation2 + $0xd1] sm:$0xff]  ;;  %v936_v29 = vpack.c.bf16 %v907_v28, %v906_v27  ;;  %v910_v21 = vld [vmem:[#allocation2 + $0x80] sm:$0xff] }
  0xcf   : > { %884 = vst.msk [vmem:[#allocation2 + $0xf8] sm:$0xff] %vm852_vm0, %v842_v33  ;;  %883 = vst.msk [vmem:[#allocation2 + $0xf0] sm:$0xff] %vm852_vm0, %v841_v34  ;;  %v1000_v43 = vpack.c.bf16 %v977_v37, %v976_v35  ;;  %v908_v31 = vld [vmem:[#allocation2 + $0x70] sm:$0xff]  ;;  %v911_v33 = vld [vmem:[#allocation2 + $0x88] sm:$0xff] }
  0xd0   : > { %v774_v38 = vpop.permute.xlu1 %773  ;;  %v769_v39 = vpop.permute.xlu0 %768  ;;  %v937_v34 = vpack.c.bf16 %v909_v32, %v908_v31  ;;  %v938_v35 = vpack.c.bf16 %v911_v33, %v910_v21  ;;  %v912_v37 = vld [vmem:[#allocation2 + $0x90] sm:$0xff]  ;;  %v1513_v27 = vld [vmem:[#allocation2 + $0x82] sm:$0xff] }
  0xd1   : > { %v844_v40 = vmul.f32 %v774_v38, %v10227_v44  ;;  %v843_v41 = vmul.f32 %v769_v39, %v10230_v45  ;;  %8680 = vmatprep.mubr.msk.bf16.mxu0 %vm852_vm0, %v1000_v43  ;;  %v913_v43 = vld [vmem:[#allocation2 + $0x98] sm:$0xff]  ;;  %v914_v38 = vld [vmem:[#allocation2 + $0xa0] sm:$0xff]  ;;  %v915_v39 = vld [vmem:[#allocation2 + $0xa8] sm:$0xff] }
  0xd2   : > { %v979_v46 = vld [vmem:[#allocation2 + $0xd9] sm:$0xff]  ;;  %v980_v44 = vld [vmem:[#allocation2 + $0xe1] sm:$0xff] }
  0xd3   : > { %886 = vst.msk [vmem:[#allocation2 + $0x108] sm:$0xff] %vm852_vm0, %v844_v40  ;;  %885 = vst.msk [vmem:[#allocation2 + $0x100] sm:$0xff] %vm852_vm0, %v843_v41  ;;  %v1001_v47 = vpack.c.bf16 %v979_v46, %v978_v42  ;;  %v939_v40 = vpack.c.bf16 %v913_v43, %v912_v37  ;;  %v940_v41 = vpack.c.bf16 %v915_v39, %v914_v38  ;;  %v916_v42 = vld [vmem:[#allocation2 + $0xb0] sm:$0xff]  ;;  %v917_v46 = vld [vmem:[#allocation2 + $0xb8] sm:$0xff] }
  0xd4   : > { %v784_v48 = vpop.permute.xlu1 %783  ;;  %v779_v49 = vpop.permute.xlu0 %778  ;;  %v1507_v19 = vld [vmem:[#allocation2 + $0x52] sm:$0xff]  ;;  %v1517_v21 = vld [vmem:[#allocation2 + $0xa2] sm:$0xff] }
  0xd5   : > { %v846_v50 = vmul.f32 %v784_v48, %v10243_v52  ;;  %v845_v51 = vmul.f32 %v779_v49, %v10246_v53  ;;  %v919_v48 = vld [vmem:[#allocation2 + $0xc8] sm:$0xff]  ;;  %v941_v49 = vpack.c.bf16 %v917_v46, %v916_v42  ;;  %v1515_v31 = vld [vmem:[#allocation2 + $0x92] sm:$0xff] }
  0xd6   : > { %8681 = vmatmul.mubr.msk.bf16.gmra.mrb[24].mxu0 %vm852_vm0, %v1001_v47  ;;  %v981_v54 = vld [vmem:[#allocation2 + $0xe9] sm:$0xff]  ;;  %v982_v52 = vld [vmem:[#allocation2 + $0xf1] sm:$0xff]  ;;  %v918_v47 = vld [vmem:[#allocation2 + $0xc0] sm:$0xff] }
  0xd7   : > { %888 = vst.msk [vmem:[#allocation2 + $0x118] sm:$0xff] %vm852_vm0, %v846_v50  ;;  %887 = vst.msk [vmem:[#allocation2 + $0x110] sm:$0xff] %vm852_vm0, %v845_v51  ;;  %v1002_v45 = vpack.c.bf16 %v981_v54, %v980_v44  ;;  %v942_v50 = vpack.c.bf16 %v919_v48, %v918_v47  ;;  %v920_v51 = vld [vmem:[#allocation2 + $0xd0] sm:$0xff]  ;;  %v921_v44 = vld [vmem:[#allocation2 + $0xd8] sm:$0xff] }
  0xd8   : > { %v794_v55 = vpop.permute.xlu1 %793  ;;  %v789_v56 = vpop.permute.xlu0 %788  ;;  %v922_v54 = vld [vmem:[#allocation2 + $0xe0] sm:$0xff]  ;;  %v1519_v37 = vld [vmem:[#allocation2 + $0xb2] sm:$0xff] }
  0xd9   : > { %v848_v57 = vmul.f32 %v794_v55, %v10259_v60  ;;  %v847_v58 = vmul.f32 %v789_v56, %v10262_v61  ;;  %8684 = vmatprep.mubr.msk.bf16.mxu0 %vm852_vm0, %v1002_v45  ;;  %v923_v45 = vld [vmem:[#allocation2 + $0xe8] sm:$0xff]  ;;  %v943_v55 = vpack.c.bf16 %v921_v44, %v920_v51  ;;  %v1523_v42 = vld [vmem:[#allocation2 + $0xd2] sm:$0xff] }
  0xda   : > { %v983_v59 = vld [vmem:[#allocation2 + $0xf9] sm:$0xff]  ;;  %v984_v60 = vld [vmem:[#allocation2 + $0x101] sm:$0xff]  ;;  %v944_v56 = vpack.c.bf16 %v923_v45, %v922_v54 }
  0xdb   : > { %890 = vst.msk [vmem:[#allocation2 + $0x128] sm:$0xff] %vm852_vm0, %v848_v57  ;;  %889 = vst.msk [vmem:[#allocation2 + $0x120] sm:$0xff] %vm852_vm0, %v847_v58  ;;  %v1003_v53 = vpack.c.bf16 %v983_v59, %v982_v52  ;;  %v924_v57 = vld [vmem:[#allocation2 + $0xf0] sm:$0xff]  ;;  %v925_v58 = vld [vmem:[#allocation2 + $0xf8] sm:$0xff] }
  0xdc   : > { %v804_v62 = vpop.permute.xlu1 %803  ;;  %v799_v63 = vpop.permute.xlu0 %798  ;;  %v926_v52 = vld [vmem:[#allocation2 + $0x100] sm:$0xff]  ;;  %v927_v59 = vld [vmem:[#allocation2 + $0x108] sm:$0xff]  ;;  %v1527_v51 = vld [vmem:[#allocation2 + $0xf2] sm:$0xff] }
  0xdd   : > { %v850_v0 = vmul.f32 %v804_v62, %v10275_v4  ;;  %v849_v1 = vmul.f32 %v799_v63, %v10278_v5  ;;  %v894_v5 = vld [vmem:[#allocation2] sm:$0xff]  ;;  %v946_v62 = vpack.c.bf16 %v927_v59, %v926_v52  ;;  %v9972_v52 = vld [vmem:[%s12156_s2 + $0x50] sm:$0xff]  }
  0xde   : > { %8685 = vmatmul.mubr.msk.bf16.gmra.mrb[28].mxu0 %vm852_vm0, %v1003_v53  ;;  %v985_v2 = vld [vmem:[#allocation2 + $0x109] sm:$0xff]  ;;  %v986_v7 = vld [vmem:[#allocation2 + $0x111] sm:$0xff]  ;;  %v930_v11 = vpack.c.bf16 %v895_v9, %v894_v5  ;;  %v945_v53 = vpack.c.bf16 %v925_v58, %v924_v57 }
  0xdf   : > { %892 = vst.msk [vmem:[#allocation2 + $0x138] sm:$0xff] %vm852_vm0, %v850_v0  ;;  %891 = vst.msk [vmem:[#allocation2 + $0x130] sm:$0xff] %vm852_vm0, %v849_v1  ;;  %v1004_v61 = vpack.c.bf16 %v985_v2, %v984_v60  ;;  %v928_v63 = vld [vmem:[#allocation2 + $0x110] sm:$0xff]  ;;  %v929_v0 = vld [vmem:[#allocation2 + $0x118] sm:$0xff] }
  0xe0   : > { %v809_v3 = vpop.permute.xlu0 %808  ;;  %v1497_v1 = vld [vmem:[#allocation2 + $0x2] sm:$0xff]  ;;  %v1498_v60 = vld [vmem:[#allocation2 + $0xa] sm:$0xff]  ;;  %v947_v2 = vpack.c.bf16 %v929_v0, %v928_v63  ;;  %v2173_v0 = vld [vmem:[#allocation2 + $0x13] sm:$0xff] }
  0xe1   : > { %v851_v6 = vmul.f32 %v809_v3, %v10289_v10  ;;  %8688 = vmatprep.mubr.msk.bf16.mxu0 %vm852_vm0, %v1004_v61  ;;  %v9967_v10 = vld [vmem:[%s12156_s2 + $0x28] sm:$0xff]   ;;  %v1533_v61 = vpack.c.bf16 %v1498_v60, %v1497_v1  ;;  %v1500_v3 = vld [vmem:[#allocation2 + $0x1a] sm:$0xff] }
  0xe2   : > { %v987_v8 = vld [vmem:[#allocation2 + $0x119] sm:$0xff]  ;;  %v1501_v9 = vld [vmem:[#allocation2 + $0x22] sm:$0xff]  ;;  %v2176_v60 = vld [vmem:[#allocation2 + $0x2b] sm:$0xff] }
  0xe3   : > { %893 = vst.msk [vmem:[#allocation2 + $0x140] sm:$0xff] %vm852_vm0, %v851_v6  ;;  %v1005_v4 = vpack.c.bf16 %v987_v8, %v986_v7  ;;  %v1502_v6 = vld [vmem:[#allocation2 + $0x2a] sm:$0xff]  ;;  %v1499_v7 = vld [vmem:[#allocation2 + $0x12] sm:$0xff]  ;;  %v1521_v38 = vld [vmem:[#allocation2 + $0xc2] sm:$0xff] }
  0xe4   : > { %v10599_v8 = vpack.c.bf16 %v1500_v3, %v1499_v7  ;;  %v10604_v5 = vpack.c.bf16 %v1502_v6, %v1501_v9  ;;  %v1525_v47 = vld [vmem:[#allocation2 + $0xe2] sm:$0xff]  ;;  %v2177_v6 = vld [vmem:[#allocation2 + $0x33] sm:$0xff] }
  0xe5   : > { %v1529_v54 = vld [vmem:[#allocation2 + $0x102] sm:$0xff]  ;;  %v9973_v7 = vld [vmem:[%s12156_s2 + $0x58] sm:$0xff]  }
  0xe6   : > { %8689 = vmatmul.mubr.msk.bf16.gmra.mrb[32].mxu0 %vm852_vm0, %v1005_v4  ;;  %v9969_v4 = vld [vmem:[%s12156_s2 + $0x38] sm:$0xff]   ;;  %v9971_v58 = vld [vmem:[%s12156_s2 + $0x48] sm:$0xff]   ;;  %v10672_v9 = vld [vmem:[%s12156_s2 + $0x60] sm:$0xff]  }
  0xe7   : > { %8696 = vmatprep.mubr.msk.bf16.mxu0 %vm852_vm0, %v930_v11  ;;  %v10614_v11 = vld [vmem:[%s12156_s2 + $0x40] sm:$0xff]   ;;  %v1870_v59 = vld [vmem:[#allocation2 + $0x12a] sm:$0xff] }
  0xee   : > { %8697 = vmatmul.mubr.msk.bf16.vlgmr.msra.gmra.mrb[0].mxu0 %vm852_vm0, %v931_v16  ;;  %v1505_v16 = vld [vmem:[#allocation2 + $0x42] sm:$0xff] }
  0xef   : > { %8733 = vmatpush3.bf16.msra.mxu0 %v10468_v30  ;;  %8700 = vmatprep.mubr.msk.bf16.mxu0 %vm852_vm0, %v932_v17  ;;  %v904_v30 = vld [vmem:[#allocation2 + $0x50] sm:$0xff]  ;;  %v1508_v17 = vld [vmem:[#allocation2 + $0x5a] sm:$0xff] }
  0xf0   : > { %8734 = vmatprep.subr.bf16.mxu0 %v9967_v10  ;;  %v935_v36 = vpack.c.bf16 %v905_v26, %v904_v30  ;;  %v1538_v20 = vpack.c.bf16 %v1508_v17, %v1507_v19  ;;  %v1511_v30 = vld [vmem:[#allocation2 + $0x72] sm:$0xff] }
  0xf3   : > { %8735 = vmatpush3.bf16.msra.mxu0 %v9967_v10  ;;  %v10617_v10 = vpack.c.bf16 %v1506_v13, %v1505_v16  ;;  %v2181_v13 = vld [vmem:[#allocation2 + $0x53] sm:$0xff]  ;;  %v2186_v16 = vld [vmem:[#allocation2 + $0x7b] sm:$0xff] }
  0xf4   : > { %8772 = vmatprep.subr.bf16.mxu0 %v10580_v18 }
  0xf6   : > { %8701 = vmatmul.mubr.msk.bf16.gmra.mrb[4].mxu0 %vm852_vm0, %v933_v24  ;;  %v1512_v24 = vld [vmem:[#allocation2 + $0x7a] sm:$0xff] }
  0xf7   : > { %8704 = vmatprep.mubr.msk.bf16.mxu0 %vm852_vm0, %v934_v25  ;;  %v1514_v25 = vld [vmem:[#allocation2 + $0x8a] sm:$0xff]  ;;  %v1540_v26 = vpack.c.bf16 %v1512_v24, %v1511_v30 }
  0xf8   : > { %v1541_v28 = vpack.c.bf16 %v1514_v25, %v1513_v27  ;;  %v2189_v25 = vld [vmem:[#allocation2 + $0x93] sm:$0xff]  ;;  %v2194_v27 = vld [vmem:[#allocation2 + $0xbb] sm:$0xff] }
  0xfe   : > { %8705 = vmatmul.mubr.msk.bf16.gmra.mrb[8].mxu0 %vm852_vm0, %v935_v36  ;;  %v1516_v36 = vld [vmem:[#allocation2 + $0x9a] sm:$0xff] }
  0xff   : > { %8708 = vmatprep.mubr.msk.bf16.mxu0 %vm852_vm0, %v936_v29  ;;  %v1518_v29 = vld [vmem:[#allocation2 + $0xaa] sm:$0xff]  ;;  %v1542_v32 = vpack.c.bf16 %v1516_v36, %v1515_v31 }
 0x100   : > { %v1543_v33 = vpack.c.bf16 %v1518_v29, %v1517_v21  ;;  %v2193_v29 = vld [vmem:[#allocation2 + $0xb3] sm:$0xff]  ;;  %v2198_v21 = vld [vmem:[#allocation2 + $0xdb] sm:$0xff] }
 0x101   : > { %v2219_v31 = vpack.c.bf16 %v2194_v27, %v2193_v29  ;;  %v2538_v29 = vld [vmem:[#allocation2 + $0xec] sm:$0xff] }
 0x106   : > { %8709 = vmatmul.mubr.msk.bf16.gmra.mrb[12].mxu0 %vm852_vm0, %v937_v34  ;;  %v1520_v34 = vld [vmem:[#allocation2 + $0xba] sm:$0xff] }
 0x107   : > { %8712 = vmatprep.mubr.msk.bf16.mxu0 %vm852_vm0, %v938_v35  ;;  %v1522_v35 = vld [vmem:[#allocation2 + $0xca] sm:$0xff]  ;;  %v1544_v43 = vpack.c.bf16 %v1520_v34, %v1519_v37 }
 0x108   : > { %v1545_v39 = vpack.c.bf16 %v1522_v35, %v1521_v38  ;;  %v2197_v35 = vld [vmem:[#allocation2 + $0xd3] sm:$0xff]  ;;  %v2202_v38 = vld [vmem:[#allocation2 + $0xfb] sm:$0xff] }
 0x109   : > { %v2221_v37 = vpack.c.bf16 %v2198_v21, %v2197_v35  ;;  %v2542_v35 = vld [vmem:[#allocation2 + $0x10c] sm:$0xff] }
 0x10e   : > { %8713 = vmatmul.mubr.msk.bf16.gmra.mrb[16].mxu0 %vm852_vm0, %v939_v40  ;;  %v1524_v40 = vld [vmem:[#allocation2 + $0xda] sm:$0xff] }
 0x10f   : > { %8716 = vmatprep.mubr.msk.bf16.mxu0 %vm852_vm0, %v940_v41  ;;  %v1526_v41 = vld [vmem:[#allocation2 + $0xea] sm:$0xff]  ;;  %v1546_v46 = vpack.c.bf16 %v1524_v40, %v1523_v42 }
 0x110   : > { %v1547_v48 = vpack.c.bf16 %v1526_v41, %v1525_v47  ;;  %v2201_v41 = vld [vmem:[#allocation2 + $0xf3] sm:$0xff]  ;;  %v2206_v47 = vld [vmem:[#allocation2 + $0x11b] sm:$0xff] }
 0x111   : > { %v2223_v42 = vpack.c.bf16 %v2202_v38, %v2201_v41  ;;  %v2546_v41 = vld [vmem:[#allocation2 + $0x12c] sm:$0xff] }
 0x116   : > { %8717 = vmatmul.mubr.msk.bf16.gmra.mrb[20].mxu0 %vm852_vm0, %v941_v49  ;;  %v1528_v49 = vld [vmem:[#allocation2 + $0xfa] sm:$0xff] }
 0x117   : > { %8720 = vmatprep.mubr.msk.bf16.mxu0 %vm852_vm0, %v942_v50  ;;  %v1530_v50 = vld [vmem:[#allocation2 + $0x10a] sm:$0xff]  ;;  %v1548_v44 = vpack.c.bf16 %v1528_v49, %v1527_v51 }
 0x118   : > { %v1549_v45 = vpack.c.bf16 %v1530_v50, %v1529_v54  ;;  %v2205_v50 = vld [vmem:[#allocation2 + $0x113] sm:$0xff]  ;;  %v2512_v54 = vld [vmem:[#allocation2 + $0x1c] sm:$0xff] }
 0x119   : > { %v2225_v51 = vpack.c.bf16 %v2206_v47, %v2205_v50  ;;  %v9977_v47 = vld [vmem:[%s12156_s2 + $0x78] sm:$0xff]   ;;  %v3188_v50 = vld [vmem:[#allocation2 + $0x2d] sm:$0xff] }
 0x11e   : > { %8721 = vmatmul.mubr.msk.bf16.gmra.mrb[24].mxu0 %vm852_vm0, %v943_v55  ;;  %v1532_v55 = vld [vmem:[#allocation2 + $0x11a] sm:$0xff] }
 0x11f   : > { %8724 = vmatprep.mubr.msk.bf16.mxu0 %vm852_vm0, %v944_v56  ;;  %v1531_v56 = vld [vmem:[#allocation2 + $0x112] sm:$0xff] }
 0x120   : > { %v1550_v57 = vpack.c.bf16 %v1532_v55, %v1531_v56  ;;  %v2511_v56 = vld [vmem:[#allocation2 + $0x14] sm:$0xff] }
 0x126   : > { %8725 = vmatmul.mubr.msk.bf16.gmra.mrb[28].mxu0 %vm852_vm0, %v945_v53  ;;  %v2174_v53 = vld [vmem:[#allocation2 + $0x1b] sm:$0xff] }
 0x127   : > { %8728 = vmatprep.mubr.msk.bf16.mxu0 %vm852_vm0, %v946_v62  ;;  %v1869_v62 = vld [vmem:[#allocation2 + $0x122] sm:$0xff]  ;;  %v2209_v1 = vpack.c.bf16 %v2174_v53, %v2173_v0 }
 0x128   : > { %v1888_v63 = vpack.c.bf16 %v1870_v59, %v1869_v62  ;;  %v2513_v59 = vld [vmem:[#allocation2 + $0x24] sm:$0xff]  ;;  %v2515_v62 = vld [vmem:[#allocation2 + $0x34] sm:$0xff] }
 0x12e   : > { %8729 = vmatmul.mubr.msk.bf16.gmra.mrb[32].mxu0 %vm852_vm0, %v947_v2  ;;  %v2178_v2 = vld [vmem:[#allocation2 + $0x3b] sm:$0xff] }
 0x12f   : > { %8736 = vmatprep.mubr.msk.bf16.mxu0 %vm852_vm0, %v1533_v61  ;;  %v2175_v61 = vld [vmem:[#allocation2 + $0x23] sm:$0xff] }
 0x130   : > { %v2210_v3 = vpack.c.bf16 %v2176_v60, %v2175_v61  ;;  %v2518_v60 = vld [vmem:[#allocation2 + $0x4c] sm:$0xff]  ;;  %v2517_v61 = vld [vmem:[#allocation2 + $0x44] sm:$0xff] }
 0x136   : > { %8737 = vmatmul.mubr.msk.bf16.vlgmr.msra.gmra.mrb[0].mxu0 %vm852_vm0, %v10599_v8 }
 0x137   : > { %8773 = vmatpush3.bf16.msra.mxu0 %v10580_v18  ;;  %8740 = vmatprep.mubr.msk.bf16.mxu0 %vm852_vm0, %v10604_v5  ;;  %v1510_v18 = vld [vmem:[#allocation2 + $0x6a] sm:$0xff] }
 0x138   : > { %8774 = vmatprep.subr.bf16.mxu0 %v9969_v4  ;;  %v1539_v23 = vpack.c.bf16 %v1510_v18, %v1509_v22  ;;  %v2185_v18 = vld [vmem:[#allocation2 + $0x73] sm:$0xff]  ;;  %v2190_v22 = vld [vmem:[#allocation2 + $0x9b] sm:$0xff] }
 0x139   : > { %v2215_v19 = vpack.c.bf16 %v2186_v16, %v2185_v18  ;;  %v2217_v30 = vpack.c.bf16 %v2190_v22, %v2189_v25  ;;  %v2530_v18 = vld [vmem:[#allocation2 + $0xac] sm:$0xff] }
 0x13a   : > { %v2534_v25 = vld [vmem:[#allocation2 + $0xcc] sm:$0xff] }
 0x13b   : > { %8775 = vmatpush3.bf16.msra.mxu0 %v9969_v4  ;;  %v2180_v4 = vld [vmem:[#allocation2 + $0x4b] sm:$0xff] }
 0x13c   : > { %8812 = vmatprep.subr.bf16.mxu0 %v10614_v11 }
 0x13e   : > { %8741 = vmatmul.mubr.msk.bf16.gmra.mrb[4].mxu0 %vm852_vm0, %v1536_v15 }
 0x13f   : > { %8744 = vmatprep.mubr.msk.bf16.mxu0 %vm852_vm0, %v10617_v10 }
 0x146   : > { %8745 = vmatmul.mubr.msk.bf16.gmra.mrb[8].mxu0 %vm852_vm0, %v1538_v20 }
 0x147   : > { %8748 = vmatprep.mubr.msk.bf16.mxu0 %vm852_vm0, %v1539_v23 }
 0x14e   : > { %8749 = vmatmul.mubr.msk.bf16.gmra.mrb[12].mxu0 %vm852_vm0, %v1540_v26 }
 0x14f   : > { %8752 = vmatprep.mubr.msk.bf16.mxu0 %vm852_vm0, %v1541_v28 }
 0x156   : > { %8753 = vmatmul.mubr.msk.bf16.gmra.mrb[16].mxu0 %vm852_vm0, %v1542_v32 }
 0x157   : > { %8756 = vmatprep.mubr.msk.bf16.mxu0 %vm852_vm0, %v1543_v33 }
 0x15e   : > { %8757 = vmatmul.mubr.msk.bf16.gmra.mrb[20].mxu0 %vm852_vm0, %v1544_v43 }
 0x15f   : > { %8760 = vmatprep.mubr.msk.bf16.mxu0 %vm852_vm0, %v1545_v39 }
 0x166   : > { %8761 = vmatmul.mubr.msk.bf16.gmra.mrb[24].mxu0 %vm852_vm0, %v1546_v46 }
 0x167   : > { %8764 = vmatprep.mubr.msk.bf16.mxu0 %vm852_vm0, %v1547_v48 }
 0x16e   : > { %8765 = vmatmul.mubr.msk.bf16.gmra.mrb[28].mxu0 %vm852_vm0, %v1548_v44 }
 0x16f   : > { %8768 = vmatprep.mubr.msk.bf16.mxu0 %vm852_vm0, %v1549_v45 }
 0x176   : > { %8769 = vmatmul.mubr.msk.bf16.gmra.mrb[32].mxu0 %vm852_vm0, %v1550_v57 }
 0x177   : > { %8776 = vmatprep.mubr.msk.bf16.mxu0 %vm852_vm0, %v10599_v8  ;;  %v2211_v8 = vpack.c.bf16 %v2178_v2, %v2177_v6  ;;  %v2520_v2 = vld [vmem:[#allocation2 + $0x5c] sm:$0xff]  ;;  %v2519_v6 = vld [vmem:[#allocation2 + $0x54] sm:$0xff] }
 0x17e   : > { %8777 = vmatmul.mubr.msk.bf16.vlgmr.msra.gmra.mrb[0].mxu0 %vm852_vm0, %v10604_v5  ;;  %v2182_v5 = vld [vmem:[#allocation2 + $0x5b] sm:$0xff] }
 0x17f   : > { %8813 = vmatpush3.bf16.msra.mxu0 %v10614_v11  ;;  %8780 = vmatprep.mubr.msk.bf16.mxu0 %vm852_vm0, %v1536_v15  ;;  %v2179_v11 = vld [vmem:[#allocation2 + $0x43] sm:$0xff]  ;;  %v2213_v14 = vpack.c.bf16 %v2182_v5, %v2181_v13  ;;  %v2184_v15 = vld [vmem:[#allocation2 + $0x6b] sm:$0xff] }
 0x180   : > { %8814 = vmatprep.subr.bf16.mxu0 %v9971_v58  ;;  %v2212_v12 = vpack.c.bf16 %v2180_v4, %v2179_v11  ;;  %v2521_v4 = vld [vmem:[#allocation2 + $0x64] sm:$0xff]  ;;  %v2523_v11 = vld [vmem:[#allocation2 + $0x74] sm:$0xff]  ;;  %v2526_v13 = vld [vmem:[#allocation2 + $0x8c] sm:$0xff] }
 0x183   : > { %8815 = vmatpush3.bf16.msra.mxu0 %v9971_v58  ;;  %v2514_v58 = vld [vmem:[#allocation2 + $0x2c] sm:$0xff] }
 0x184   : > { %8852 = vmatprep.subr.bf16.mxu0 %v9972_v52  ;;  %v10691_v53 = vpack.c.bf16 %v2514_v58, %v2513_v59  ;;  %v9979_v59 = vld [vmem:[%s12156_s2 + $0x88] sm:$0xff]  }
 0x186   : > { %8781 = vmatmul.mubr.msk.bf16.gmra.mrb[4].mxu0 %vm852_vm0, %v10617_v10  ;;  %v2183_v10 = vld [vmem:[#allocation2 + $0x63] sm:$0xff] }
 0x187   : > { %8784 = vmatprep.mubr.msk.bf16.mxu0 %vm852_vm0, %v1538_v20  ;;  %v2214_v17 = vpack.c.bf16 %v2184_v15, %v2183_v10  ;;  %v2188_v20 = vld [vmem:[#allocation2 + $0x8b] sm:$0xff]  ;;  %v2527_v10 = vld [vmem:[#allocation2 + $0x94] sm:$0xff] }
 0x188   : > { %v2525_v15 = vld [vmem:[#allocation2 + $0x84] sm:$0xff] }
 0x189   : > { %v2554_v16 = vpack.c.bf16 %v2526_v13, %v2525_v15  ;;  %v3203_v13 = vld [vmem:[#allocation2 + $0xa5] sm:$0xff]  ;;  %v3206_v15 = vld [vmem:[#allocation2 + $0xbd] sm:$0xff] }
 0x18e   : > { %8785 = vmatmul.mubr.msk.bf16.gmra.mrb[8].mxu0 %vm852_vm0, %v1539_v23  ;;  %v2187_v23 = vld [vmem:[#allocation2 + $0x83] sm:$0xff] }
 0x18f   : > { %8788 = vmatprep.mubr.msk.bf16.mxu0 %vm852_vm0, %v1540_v26  ;;  %v2216_v24 = vpack.c.bf16 %v2188_v20, %v2187_v23  ;;  %v2192_v26 = vld [vmem:[#allocation2 + $0xab] sm:$0xff]  ;;  %v2531_v23 = vld [vmem:[#allocation2 + $0xb4] sm:$0xff] }
 0x190   : > { %v2529_v20 = vld [vmem:[#allocation2 + $0xa4] sm:$0xff] }
 0x191   : > { %v2556_v22 = vpack.c.bf16 %v2530_v18, %v2529_v20  ;;  %v3207_v18 = vld [vmem:[#allocation2 + $0xc5] sm:$0xff]  ;;  %v3210_v20 = vld [vmem:[#allocation2 + $0xdd] sm:$0xff] }
 0x196   : > { %8789 = vmatmul.mubr.msk.bf16.gmra.mrb[12].mxu0 %vm852_vm0, %v1541_v28  ;;  %v2191_v28 = vld [vmem:[#allocation2 + $0xa3] sm:$0xff] }
 0x197   : > { %8792 = vmatprep.mubr.msk.bf16.mxu0 %vm852_vm0, %v1542_v32  ;;  %v2218_v36 = vpack.c.bf16 %v2192_v26, %v2191_v28  ;;  %v2196_v32 = vld [vmem:[#allocation2 + $0xcb] sm:$0xff]  ;;  %v2535_v28 = vld [vmem:[#allocation2 + $0xd4] sm:$0xff] }
 0x198   : > { %v2533_v26 = vld [vmem:[#allocation2 + $0xc4] sm:$0xff] }
 0x199   : > { %v2558_v27 = vpack.c.bf16 %v2534_v25, %v2533_v26  ;;  %v3211_v25 = vld [vmem:[#allocation2 + $0xe5] sm:$0xff]  ;;  %v3214_v26 = vld [vmem:[#allocation2 + $0xfd] sm:$0xff] }
 0x19e   : > { %8793 = vmatmul.mubr.msk.bf16.gmra.mrb[16].mxu0 %vm852_vm0, %v1543_v33  ;;  %v2195_v33 = vld [vmem:[#allocation2 + $0xc3] sm:$0xff] }
 0x19f   : > { %8796 = vmatprep.mubr.msk.bf16.mxu0 %vm852_vm0, %v1544_v43  ;;  %v2220_v34 = vpack.c.bf16 %v2196_v32, %v2195_v33  ;;  %v2200_v43 = vld [vmem:[#allocation2 + $0xeb] sm:$0xff]  ;;  %v2539_v33 = vld [vmem:[#allocation2 + $0xf4] sm:$0xff] }
 0x1a0   : > { %v2537_v32 = vld [vmem:[#allocation2 + $0xe4] sm:$0xff] }
 0x1a1   : > { %v2560_v21 = vpack.c.bf16 %v2538_v29, %v2537_v32  ;;  %v3215_v29 = vld [vmem:[#allocation2 + $0x105] sm:$0xff]  ;;  %v3218_v32 = vld [vmem:[#allocation2 + $0x11d] sm:$0xff] }
 0x1a6   : > { %8797 = vmatmul.mubr.msk.bf16.gmra.mrb[20].mxu0 %vm852_vm0, %v1545_v39  ;;  %v2199_v39 = vld [vmem:[#allocation2 + $0xe3] sm:$0xff] }
 0x1a7   : > { %8800 = vmatprep.mubr.msk.bf16.mxu0 %vm852_vm0, %v1546_v46  ;;  %v2222_v40 = vpack.c.bf16 %v2200_v43, %v2199_v39  ;;  %v2204_v46 = vld [vmem:[#allocation2 + $0x10b] sm:$0xff]  ;;  %v2543_v39 = vld [vmem:[#allocation2 + $0x114] sm:$0xff] }
 0x1a8   : > { %v2541_v43 = vld [vmem:[#allocation2 + $0x104] sm:$0xff] }
 0x1a9   : > { %v2562_v38 = vpack.c.bf16 %v2542_v35, %v2541_v43  ;;  %v3219_v35 = vld [vmem:[#allocation2 + $0x125] sm:$0xff]  ;;  %v3222_v43 = vld [vmem:[#allocation2 + $0x13d] sm:$0xff] }
 0x1ae   : > { %8801 = vmatmul.mubr.msk.bf16.gmra.mrb[24].mxu0 %vm852_vm0, %v1547_v48  ;;  %v2203_v48 = vld [vmem:[#allocation2 + $0x103] sm:$0xff] }
 0x1af   : > { %8804 = vmatprep.mubr.msk.bf16.mxu0 %vm852_vm0, %v1548_v44  ;;  %v2224_v49 = vpack.c.bf16 %v2204_v46, %v2203_v48  ;;  %v2208_v44 = vld [vmem:[#allocation2 + $0x12b] sm:$0xff]  ;;  %v9978_v48 = vld [vmem:[%s12156_s2 + $0x80] sm:$0xff]  }
 0x1b6   : > { %8805 = vmatmul.mubr.msk.bf16.gmra.mrb[28].mxu0 %vm852_vm0, %v1549_v45  ;;  %v2207_v45 = vld [vmem:[#allocation2 + $0x123] sm:$0xff] }
 0x1b7   : > { %8808 = vmatprep.mubr.msk.bf16.mxu0 %vm852_vm0, %v1550_v57  ;;  %v2226_v55 = vpack.c.bf16 %v2208_v44, %v2207_v45  ;;  %v2547_v57 = vpack.c.bf16 %v2512_v54, %v2511_v56  ;;  %v3187_v54 = vld [vmem:[#allocation2 + $0x25] sm:$0xff]  ;;  %v3192_v56 = vld [vmem:[#allocation2 + $0x4d] sm:$0xff] }
 0x1b8   : > { %v3223_v45 = vpack.c.bf16 %v3188_v50, %v3187_v54  ;;  %v3529_v50 = vld [vmem:[#allocation2 + $0x46] sm:$0xff]  ;;  %v3534_v54 = vld [vmem:[#allocation2 + $0x6e] sm:$0xff] }
 0x1be   : > { %8809 = vmatmul.mubr.msk.bf16.gmra.mrb[32].mxu0 %vm852_vm0, %v1888_v63  ;;  %v9975_v63 = vld [vmem:[%s12156_s2 + $0x68] sm:$0xff]  }
 0x1bf   : > { %8816 = vmatprep.mubr.msk.bf16.mxu0 %vm852_vm0, %v2209_v1  ;;  %v10706_v1 = vld [vmem:[%s12156_s2 + $0x70] sm:$0xff]  }
 0x1c6   : > { %8817 = vmatmul.mubr.msk.bf16.vlgmr.msra.gmra.mrb[0].mxu0 %vm852_vm0, %v2210_v3  ;;  %v2550_v3 = vpack.c.bf16 %v2518_v60, %v2517_v61  ;;  %v3195_v60 = vld [vmem:[#allocation2 + $0x65] sm:$0xff]  ;;  %v3198_v61 = vld [vmem:[#allocation2 + $0x7d] sm:$0xff] }
 0x1c7   : > { %8853 = vmatpush3.bf16.msra.mxu0 %v9972_v52  ;;  %8820 = vmatprep.mubr.msk.bf16.mxu0 %vm852_vm0, %v2211_v8  ;;  %v2516_v52 = vld [vmem:[#allocation2 + $0x3c] sm:$0xff]  ;;  %v2522_v8 = vld [vmem:[#allocation2 + $0x6c] sm:$0xff] }
 0x1c8   : > { %8854 = vmatprep.subr.bf16.mxu0 %v9973_v7  ;;  %v10696_v0 = vpack.c.bf16 %v2516_v52, %v2515_v62  ;;  %v2552_v5 = vpack.c.bf16 %v2522_v8, %v2521_v4  ;;  %v3191_v52 = vld [vmem:[#allocation2 + $0x45] sm:$0xff]  ;;  %v3194_v62 = vld [vmem:[#allocation2 + $0x5d] sm:$0xff] }
 0x1c9   : > { %v3199_v8 = vld [vmem:[#allocation2 + $0x85] sm:$0xff]  ;;  %v3202_v4 = vld [vmem:[#allocation2 + $0x9d] sm:$0xff] }
 0x1cb   : > { %8855 = vmatpush3.bf16.msra.mxu0 %v9973_v7  ;;  %v10709_v7 = vpack.c.bf16 %v2520_v2, %v2519_v6  ;;  %v3197_v6 = vld [vmem:[#allocation2 + $0x75] sm:$0xff] }
 0x1cc   : > { %8892 = vmatprep.subr.bf16.mxu0 %v10672_v9 }
 0x1ce   : > { %8821 = vmatmul.mubr.msk.bf16.gmra.mrb[4].mxu0 %vm852_vm0, %v2212_v12 }
 0x1cf   : > { %8824 = vmatprep.mubr.msk.bf16.mxu0 %vm852_vm0, %v2213_v14  ;;  %v2528_v14 = vld [vmem:[#allocation2 + $0x9c] sm:$0xff] }
 0x1d6   : > { %8825 = vmatmul.mubr.msk.bf16.gmra.mrb[8].mxu0 %vm852_vm0, %v2214_v17  ;;  %v2555_v17 = vpack.c.bf16 %v2528_v14, %v2527_v10  ;;  %v3205_v10 = vld [vmem:[#allocation2 + $0xb5] sm:$0xff] }
 0x1d7   : > { %8828 = vmatprep.mubr.msk.bf16.mxu0 %vm852_vm0, %v2215_v19  ;;  %v2532_v19 = vld [vmem:[#allocation2 + $0xbc] sm:$0xff] }
 0x1de   : > { %8829 = vmatmul.mubr.msk.bf16.gmra.mrb[12].mxu0 %vm852_vm0, %v2216_v24  ;;  %v2557_v24 = vpack.c.bf16 %v2532_v19, %v2531_v23  ;;  %v3209_v23 = vld [vmem:[#allocation2 + $0xd5] sm:$0xff] }
 0x1df   : > { %8832 = vmatprep.mubr.msk.bf16.mxu0 %vm852_vm0, %v2217_v30  ;;  %v2536_v30 = vld [vmem:[#allocation2 + $0xdc] sm:$0xff] }
 0x1e6   : > { %8833 = vmatmul.mubr.msk.bf16.gmra.mrb[16].mxu0 %vm852_vm0, %v2218_v36  ;;  %v2559_v36 = vpack.c.bf16 %v2536_v30, %v2535_v28  ;;  %v3213_v28 = vld [vmem:[#allocation2 + $0xf5] sm:$0xff] }
 0x1e7   : > { %8836 = vmatprep.mubr.msk.bf16.mxu0 %vm852_vm0, %v2219_v31  ;;  %v2540_v31 = vld [vmem:[#allocation2 + $0xfc] sm:$0xff] }
 0x1ee   : > { %8837 = vmatmul.mubr.msk.bf16.gmra.mrb[20].mxu0 %vm852_vm0, %v2220_v34  ;;  %v2561_v34 = vpack.c.bf16 %v2540_v31, %v2539_v33  ;;  %v3217_v33 = vld [vmem:[#allocation2 + $0x115] sm:$0xff] }
 0x1ef   : > { %8840 = vmatprep.mubr.msk.bf16.mxu0 %vm852_vm0, %v2221_v37  ;;  %v2544_v37 = vld [vmem:[#allocation2 + $0x11c] sm:$0xff] }
 0x1f6   : > { %8841 = vmatmul.mubr.msk.bf16.gmra.mrb[24].mxu0 %vm852_vm0, %v2222_v40  ;;  %v2563_v40 = vpack.c.bf16 %v2544_v37, %v2543_v39  ;;  %v3221_v39 = vld [vmem:[#allocation2 + $0x135] sm:$0xff] }
 0x1f7   : > { %8844 = vmatprep.mubr.msk.bf16.mxu0 %vm852_vm0, %v2223_v42  ;;  %v2545_v42 = vld [vmem:[#allocation2 + $0x124] sm:$0xff] }
 0x1f8   : > { %v2564_v46 = vpack.c.bf16 %v2546_v41, %v2545_v42  ;;  %v3525_v41 = vld [vmem:[#allocation2 + $0x26] sm:$0xff] }
 0x1fe   : > { %8845 = vmatmul.mubr.msk.bf16.gmra.mrb[28].mxu0 %vm852_vm0, %v2224_v49  ;;  %v2884_v49 = vld [vmem:[#allocation2 + $0x13c] sm:$0xff] }
 0x1ff   : > { %8848 = vmatprep.mubr.msk.bf16.mxu0 %vm852_vm0, %v2225_v51  ;;  %v2883_v51 = vld [vmem:[#allocation2 + $0x134] sm:$0xff] }
 0x200   : > { %v2902_v44 = vpack.c.bf16 %v2884_v49, %v2883_v51 }
 0x206   : > { %8849 = vmatmul.mubr.msk.bf16.gmra.mrb[32].mxu0 %vm852_vm0, %v2226_v55  ;;  %v3190_v55 = vld [vmem:[#allocation2 + $0x3d] sm:$0xff] }
 0x207   : > { %8856 = vmatprep.mubr.msk.bf16.mxu0 %vm852_vm0, %v2547_v57  ;;  %v3189_v57 = vld [vmem:[#allocation2 + $0x35] sm:$0xff] }
 0x208   : > { %v3224_v58 = vpack.c.bf16 %v3190_v55, %v3189_v57 }
 0x20e   : > { %8857 = vmatmul.mubr.msk.bf16.vlgmr.msra.gmra.mrb[0].mxu0 %vm852_vm0, %v10691_v53 }
 0x20f   : > { %8893 = vmatpush3.bf16.msra.mxu0 %v10672_v9  ;;  %8860 = vmatprep.mubr.msk.bf16.mxu0 %vm852_vm0, %v10696_v0  ;;  %v2524_v9 = vld [vmem:[#allocation2 + $0x7c] sm:$0xff] }
 0x210   : > { %8894 = vmatprep.subr.bf16.mxu0 %v9975_v63  ;;  %v2553_v12 = vpack.c.bf16 %v2524_v9, %v2523_v11  ;;  %v3201_v11 = vld [vmem:[#allocation2 + $0x95] sm:$0xff] }
 0x213   : > { %8895 = vmatpush3.bf16.msra.mxu0 %v9975_v63  ;;  %v3196_v63 = vld [vmem:[#allocation2 + $0x6d] sm:$0xff] }
 0x214   : > { %8932 = vmatprep.subr.bf16.mxu0 %v10706_v1  ;;  %v3227_v2 = vpack.c.bf16 %v3196_v63, %v3195_v60  ;;  %v3539_v60 = vld [vmem:[#allocation2 + $0x96] sm:$0xff] }
 0x216   : > { %8861 = vmatmul.mubr.msk.bf16.gmra.mrb[4].mxu0 %vm852_vm0, %v2550_v3 }
 0x217   : > { %8864 = vmatprep.mubr.msk.bf16.mxu0 %vm852_vm0, %v10709_v7 }
 0x21e   : > { %8865 = vmatmul.mubr.msk.bf16.gmra.mrb[8].mxu0 %vm852_vm0, %v2552_v5 }
 0x21f   : > { %8868 = vmatprep.mubr.msk.bf16.mxu0 %vm852_vm0, %v2553_v12 }
 0x226   : > { %8869 = vmatmul.mubr.msk.bf16.gmra.mrb[12].mxu0 %vm852_vm0, %v2554_v16 }
 0x227   : > { %8872 = vmatprep.mubr.msk.bf16.mxu0 %vm852_vm0, %v2555_v17 }
 0x22e   : > { %8873 = vmatmul.mubr.msk.bf16.gmra.mrb[16].mxu0 %vm852_vm0, %v2556_v22 }
 0x22f   : > { %8876 = vmatprep.mubr.msk.bf16.mxu0 %vm852_vm0, %v2557_v24 }
 0x236   : > { %8877 = vmatmul.mubr.msk.bf16.gmra.mrb[20].mxu0 %vm852_vm0, %v2558_v27 }
 0x237   : > { %8880 = vmatprep.mubr.msk.bf16.mxu0 %vm852_vm0, %v2559_v36 }
 0x23e   : > { %8881 = vmatmul.mubr.msk.bf16.gmra.mrb[24].mxu0 %vm852_vm0, %v2560_v21 }
 0x23f   : > { %8884 = vmatprep.mubr.msk.bf16.mxu0 %vm852_vm0, %v2561_v34 }
 0x246   : > { %8885 = vmatmul.mubr.msk.bf16.gmra.mrb[28].mxu0 %vm852_vm0, %v2562_v38 }
 0x247   : > { %8888 = vmatprep.mubr.msk.bf16.mxu0 %vm852_vm0, %v2563_v40 }
 0x24e   : > { %8889 = vmatmul.mubr.msk.bf16.gmra.mrb[32].mxu0 %vm852_vm0, %v2564_v46 }
 0x24f   : > { %8896 = vmatprep.mubr.msk.bf16.mxu0 %vm852_vm0, %v10691_v53  ;;  %v3225_v53 = vpack.c.bf16 %v3192_v56, %v3191_v52  ;;  %v3533_v56 = vld [vmem:[#allocation2 + $0x66] sm:$0xff]  ;;  %v3538_v52 = vld [vmem:[#allocation2 + $0x8e] sm:$0xff] }
 0x250   : > { %v3565_v57 = vpack.c.bf16 %v3534_v54, %v3533_v56 }
 0x256   : > { %8897 = vmatmul.mubr.msk.bf16.vlgmr.msra.gmra.mrb[0].mxu0 %vm852_vm0, %v10696_v0  ;;  %v3193_v0 = vld [vmem:[#allocation2 + $0x55] sm:$0xff] }
 0x257   : > { %8933 = vmatpush3.bf16.msra.mxu0 %v10706_v1  ;;  %8900 = vmatprep.mubr.msk.bf16.mxu0 %vm852_vm0, %v2550_v3  ;;  %v3226_v1 = vpack.c.bf16 %v3194_v62, %v3193_v0  ;;  %v3200_v3 = vld [vmem:[#allocation2 + $0x8d] sm:$0xff]  ;;  %v3540_v0 = vld [vmem:[#allocation2 + $0x9e] sm:$0xff] }
 0x258   : > { %8934 = vmatprep.subr.bf16.mxu0 %v9977_v47  ;;  %v3229_v9 = vpack.c.bf16 %v3200_v3, %v3199_v8  ;;  %v3537_v62 = vld [vmem:[#allocation2 + $0x86] sm:$0xff]  ;;  %v3543_v8 = vld [vmem:[#allocation2 + $0xb6] sm:$0xff] }
 0x259   : > { %v3567_v63 = vpack.c.bf16 %v3538_v52, %v3537_v62 }
 0x25b   : > { %8935 = vmatpush3.bf16.msra.mxu0 %v9977_v47  ;;  %v3530_v47 = vld [vmem:[#allocation2 + $0x4e] sm:$0xff] }
 0x25c   : > { %8972 = vmatprep.subr.bf16.mxu0 %v9978_v48  ;;  %v3563_v51 = vpack.c.bf16 %v3530_v47, %v3529_v50  ;;  %v10871_v50 = vld [vmem:[%s12158_s4 + $0x2] ss:$0 sm:$0xff] }
 0x25e   : > { %8901 = vmatmul.mubr.msk.bf16.gmra.mrb[4].mxu0 %vm852_vm0, %v10709_v7  ;;  %v3228_v7 = vpack.c.bf16 %v3198_v61, %v3197_v6  ;;  %v3541_v61 = vld [vmem:[#allocation2 + $0xa6] sm:$0xff]  ;;  %v3544_v6 = vld [vmem:[#allocation2 + $0xbe] sm:$0xff] }
 0x25f   : > { %8904 = vmatprep.mubr.msk.bf16.mxu0 %vm852_vm0, %v2552_v5  ;;  %v3204_v5 = vld [vmem:[#allocation2 + $0xad] sm:$0xff] }
 0x260   : > { %v3231_v14 = vpack.c.bf16 %v3204_v5, %v3203_v13  ;;  %v3547_v13 = vld [vmem:[#allocation2 + $0xd6] sm:$0xff] }
 0x266   : > { %8905 = vmatmul.mubr.msk.bf16.gmra.mrb[8].mxu0 %vm852_vm0, %v2553_v12  ;;  %v3230_v12 = vpack.c.bf16 %v3202_v4, %v3201_v11  ;;  %v3545_v4 = vld [vmem:[#allocation2 + $0xc6] sm:$0xff]  ;;  %v3548_v11 = vld [vmem:[#allocation2 + $0xde] sm:$0xff] }
 0x267   : > { %8908 = vmatprep.mubr.msk.bf16.mxu0 %vm852_vm0, %v2554_v16  ;;  %v3208_v16 = vld [vmem:[#allocation2 + $0xcd] sm:$0xff] }
 0x268   : > { %v3233_v19 = vpack.c.bf16 %v3208_v16, %v3207_v18  ;;  %v3551_v18 = vld [vmem:[#allocation2 + $0xf6] sm:$0xff] }
 0x26e   : > { %8909 = vmatmul.mubr.msk.bf16.gmra.mrb[12].mxu0 %vm852_vm0, %v2555_v17  ;;  %v3232_v17 = vpack.c.bf16 %v3206_v15, %v3205_v10  ;;  %v3549_v15 = vld [vmem:[#allocation2 + $0xe6] sm:$0xff]  ;;  %v3552_v10 = vld [vmem:[#allocation2 + $0xfe] sm:$0xff] }
 0x26f   : > { %8912 = vmatprep.mubr.msk.bf16.mxu0 %vm852_vm0, %v2556_v22  ;;  %v3212_v22 = vld [vmem:[#allocation2 + $0xed] sm:$0xff] }
 0x270   : > { %v3235_v30 = vpack.c.bf16 %v3212_v22, %v3211_v25  ;;  %v3555_v25 = vld [vmem:[#allocation2 + $0x116] sm:$0xff] }
 0x276   : > { %8913 = vmatmul.mubr.msk.bf16.gmra.mrb[16].mxu0 %vm852_vm0, %v2557_v24  ;;  %v3234_v24 = vpack.c.bf16 %v3210_v20, %v3209_v23  ;;  %v3553_v20 = vld [vmem:[#allocation2 + $0x106] sm:$0xff]  ;;  %v3556_v23 = vld [vmem:[#allocation2 + $0x11e] sm:$0xff] }
 0x277   : > { %8916 = vmatprep.mubr.msk.bf16.mxu0 %vm852_vm0, %v2558_v27  ;;  %v3216_v27 = vld [vmem:[#allocation2 + $0x10d] sm:$0xff] }
 0x278   : > { %v3237_v31 = vpack.c.bf16 %v3216_v27, %v3215_v29 }
 0x27e   : > { %8917 = vmatmul.mubr.msk.bf16.gmra.mrb[20].mxu0 %vm852_vm0, %v2559_v36  ;;  %v3236_v36 = vpack.c.bf16 %v3214_v26, %v3213_v28  ;;  %v3557_v26 = vld [vmem:[#allocation2 + $0x126] sm:$0xff]  ;;  %v3560_v28 = vld [vmem:[#allocation2 + $0x13e] sm:$0xff] }
 0x27f   : > { %8920 = vmatprep.mubr.msk.bf16.mxu0 %vm852_vm0, %v2560_v21  ;;  %v3220_v21 = vld [vmem:[#allocation2 + $0x12d] sm:$0xff] }
 0x280   : > { %v3239_v37 = vpack.c.bf16 %v3220_v21, %v3219_v35  ;;  %v9981_v21 = vld [vmem:[%s12157_s3 + $0x18] sm:$0xff]   ;;  %v10844_v35 = vld [vmem:[%s12157_s3] sm:$0xff]  }
 0x286   : > { %8921 = vmatmul.mubr.msk.bf16.gmra.mrb[24].mxu0 %vm852_vm0, %v2561_v34  ;;  %v3238_v34 = vpack.c.bf16 %v3218_v32, %v3217_v33  ;;  %v9980_v32 = vld [vmem:[%s12157_s3 + $0x10] sm:$0xff]  }
 0x287   : > { %8924 = vmatprep.mubr.msk.bf16.mxu0 %vm852_vm0, %v2562_v38  ;;  %v3526_v38 = vld [vmem:[#allocation2 + $0x2e] sm:$0xff]  ;;  %9012 = vmatprep.subr.bf16.mxu1 %v9980_v32 }
 0x288   : > { %v3561_v42 = vpack.c.bf16 %v3526_v38, %v3525_v41  ;;  %9013 = vmatpush3.bf16.msra.mxu1 %v9980_v32  ;;  %v10850_v38 = vpop.permute.xlu0 %4100 }
 0x289   : > { %9014 = vmatprep.subr.bf16.mxu1 %v9981_v21 }
 0x28c   : > { %9015 = vmatpush3.bf16.msra.mxu1 %v9981_v21 }
 0x28d   : > { %9052 = vmatprep.subr.bf16.mxu1 %v10844_v35 }
 0x28e   : > { %8925 = vmatmul.mubr.msk.bf16.gmra.mrb[28].mxu0 %vm852_vm0, %v2563_v40  ;;  %v3240_v40 = vpack.c.bf16 %v3222_v43, %v3221_v39  ;;  %v10848_v43 = vpop.permute.xlu1 %4095 }
 0x28f   : > { %8928 = vmatprep.mubr.msk.bf16.mxu0 %vm852_vm0, %v2564_v46  ;;  %v3528_v46 = vld [vmem:[#allocation2 + $0x3e] sm:$0xff] }
 0x292   : > { %v10852_v39 = vpop.permute.xlu1 %4105 }
 0x296   : > { %8929 = vmatmul.mubr.msk.bf16.gmra.mrb[32].mxu0 %vm852_vm0, %v2902_v44  ;;  %v3532_v44 = vld [vmem:[#allocation2 + $0x5e] sm:$0xff]  ;;  %v10856_v41 = vpop.permute.xlu1 %4115 }
 0x297   : > { %8936 = vmatprep.mubr.msk.bf16.mxu0 %vm852_vm0, %v3223_v45  ;;  %v3531_v45 = vld [vmem:[#allocation2 + $0x56] sm:$0xff] }
 0x298   : > { %v3564_v55 = vpack.c.bf16 %v3532_v44, %v3531_v45  ;;  %v10878_v44 = vld [vmem:[%s12158_s4 + $0x3] ss:$0 sm:$0xff] }
 0x29e   : > { %8937 = vmatmul.mubr.msk.bf16.vlgmr.msra.gmra.mrb[0].mxu0 %vm852_vm0, %v3224_v58  ;;  %v3536_v58 = vld [vmem:[#allocation2 + $0x7e] sm:$0xff] }
 0x29f   : > { %8973 = vmatpush3.bf16.msra.mxu0 %v9978_v48  ;;  %8940 = vmatprep.mubr.msk.bf16.mxu0 %vm852_vm0, %v3225_v53  ;;  %v3527_v48 = vld [vmem:[#allocation2 + $0x36] sm:$0xff] }
 0x2a0   : > { %8974 = vmatprep.subr.bf16.mxu0 %v9979_v59  ;;  %v3562_v49 = vpack.c.bf16 %v3528_v46, %v3527_v48  ;;  %v10860_v46 = vpop.permute.xlu1 %4125 }
 0x2a3   : > { %8975 = vmatpush3.bf16.msra.mxu0 %v9979_v59  ;;  %v3535_v59 = vld [vmem:[#allocation2 + $0x76] sm:$0xff] }
 0x2a4   : > { %v3566_v53 = vpack.c.bf16 %v3536_v58, %v3535_v59  ;;  %v10864_v48 = vpop.permute.xlu1 %4135 }
 0x2a6   : > { %8941 = vmatmul.mubr.msk.bf16.gmra.mrb[4].mxu0 %vm852_vm0, %v3226_v1  ;;  %v3542_v1 = vld [vmem:[#allocation2 + $0xae] sm:$0xff] }
 0x2a7   : > { %8944 = vmatprep.mubr.msk.bf16.mxu0 %vm852_vm0, %v3227_v2  ;;  %v3568_v2 = vpack.c.bf16 %v3540_v0, %v3539_v60  ;;  %v3569_v3 = vpack.c.bf16 %v3542_v1, %v3541_v61 }
 0x2ae   : > { %8945 = vmatmul.mubr.msk.bf16.gmra.mrb[8].mxu0 %vm852_vm0, %v3228_v7  ;;  %v3546_v7 = vld [vmem:[#allocation2 + $0xce] sm:$0xff] }
 0x2af   : > { %8948 = vmatprep.mubr.msk.bf16.mxu0 %vm852_vm0, %v3229_v9  ;;  %v3570_v9 = vpack.c.bf16 %v3544_v6, %v3543_v8  ;;  %v3571_v5 = vpack.c.bf16 %v3546_v7, %v3545_v4 }
 0x2b6   : > { %8949 = vmatmul.mubr.msk.bf16.gmra.mrb[12].mxu0 %vm852_vm0, %v3230_v12  ;;  %v3550_v12 = vld [vmem:[#allocation2 + $0xee] sm:$0xff] }
 0x2b7   : > { %8952 = vmatprep.mubr.msk.bf16.mxu0 %vm852_vm0, %v3231_v14  ;;  %v3572_v14 = vpack.c.bf16 %v3548_v11, %v3547_v13  ;;  %v3573_v16 = vpack.c.bf16 %v3550_v12, %v3549_v15 }
 0x2be   : > { %8953 = vmatmul.mubr.msk.bf16.gmra.mrb[16].mxu0 %vm852_vm0, %v3232_v17  ;;  %v3554_v17 = vld [vmem:[#allocation2 + $0x10e] sm:$0xff] }
 0x2bf   : > { %8956 = vmatprep.mubr.msk.bf16.mxu0 %vm852_vm0, %v3233_v19  ;;  %v3574_v19 = vpack.c.bf16 %v3552_v10, %v3551_v18  ;;  %v3575_v22 = vpack.c.bf16 %v3554_v17, %v3553_v20 }
 0x2c6   : > { %8957 = vmatmul.mubr.msk.bf16.gmra.mrb[20].mxu0 %vm852_vm0, %v3234_v24  ;;  %v3558_v24 = vld [vmem:[#allocation2 + $0x12e] sm:$0xff] }
 0x2c7   : > { %8960 = vmatprep.mubr.msk.bf16.mxu0 %vm852_vm0, %v3235_v30  ;;  %v3576_v30 = vpack.c.bf16 %v3556_v23, %v3555_v25  ;;  %v3577_v27 = vpack.c.bf16 %v3558_v24, %v3557_v26 }
 0x2ce   : > { %8961 = vmatmul.mubr.msk.bf16.gmra.mrb[24].mxu0 %vm852_vm0, %v3236_v36  ;;  %v3559_v36 = vld [vmem:[#allocation2 + $0x136] sm:$0xff] }
 0x2cf   : > { %8964 = vmatprep.mubr.msk.bf16.mxu0 %vm852_vm0, %v3237_v31  ;;  %v3578_v29 = vpack.c.bf16 %v3560_v28, %v3559_v36  ;;  %v10011_v31 = vmov 0.0  }
 0x2d0   : > { %4056 = vst.msk [vmem:[#allocation3 + $0x20] sm:$0xff] %vm852_vm0, %v10011_v31  ;;  %4057 = vst.msk [vmem:[#allocation3 + $0x28] sm:$0xff] %vm852_vm0, %v10011_v31 }
 0x2d1   : > { %4052 = vst.msk [vmem:[#allocation3] sm:$0xff] %vm852_vm0, %v10011_v31  ;;  %4053 = vst.msk [vmem:[#allocation3 + $0x8] sm:$0xff] %vm852_vm0, %v10011_v31 }
 0x2d2   : > { %4054 = vst.msk [vmem:[#allocation3 + $0x10] sm:$0xff] %vm852_vm0, %v10011_v31  ;;  %4055 = vst.msk [vmem:[#allocation3 + $0x18] sm:$0xff] %vm852_vm0, %v10011_v31 }
 0x2d3   : > { %4058 = vst.msk [vmem:[#allocation3 + $0x30] sm:$0xff] %vm852_vm0, %v10011_v31  ;;  %4059 = vst.msk [vmem:[#allocation3 + $0x38] sm:$0xff] %vm852_vm0, %v10011_v31 }
 0x2d4   : > { %4060 = vst.msk [vmem:[#allocation3 + $0x40] sm:$0xff] %vm852_vm0, %v10011_v31  ;;  %4061 = vst.msk [vmem:[#allocation3 + $0x48] sm:$0xff] %vm852_vm0, %v10011_v31 }
 0x2d5   : > { %4062 = vst.msk [vmem:[#allocation3 + $0x50] sm:$0xff] %vm852_vm0, %v10011_v31  ;;  %4063 = vst.msk [vmem:[#allocation3 + $0x58] sm:$0xff] %vm852_vm0, %v10011_v31 }
 0x2d6   : > { %8965 = vmatmul.mubr.msk.bf16.gmra.mrb[28].mxu0 %vm852_vm0, %v3238_v34  ;;  %4064 = vst.msk [vmem:[#allocation3 + $0x60] sm:$0xff] %vm852_vm0, %v10011_v31  ;;  %4065 = vst.msk [vmem:[#allocation3 + $0x68] sm:$0xff] %vm852_vm0, %v10011_v31 }
 0x2d7   : > { %8968 = vmatprep.mubr.msk.bf16.mxu0 %vm852_vm0, %v3239_v37  ;;  %4066 = vst.msk [vmem:[#allocation3 + $0x70] sm:$0xff] %vm852_vm0, %v10011_v31  ;;  %4067 = vst.msk [vmem:[#allocation3 + $0x78] sm:$0xff] %vm852_vm0, %v10011_v31 }
 0x2d8   : > { %4068 = vst.msk [vmem:[#allocation3 + $0x80] sm:$0xff] %vm852_vm0, %v10011_v31  ;;  %4069 = vst.msk [vmem:[#allocation3 + $0x88] sm:$0xff] %vm852_vm0, %v10011_v31  ;;  %v4403_v33 = vld [vmem:[#allocation3 + $0x1] sm:$0xff] }
 0x2d9   : > { %4070 = vst.msk [vmem:[#allocation3 + $0x90] sm:$0xff] %vm852_vm0, %v10011_v31  ;;  %4071 = vst.msk [vmem:[#allocation3 + $0x98] sm:$0xff] %vm852_vm0, %v10011_v31  ;;  %v4404_v34 = vld [vmem:[#allocation3 + $0x9] sm:$0xff] }
 0x2da   : > { %4072 = vst.msk [vmem:[#allocation3 + $0xa0] sm:$0xff] %vm852_vm0, %v10011_v31  ;;  %4073 = vst.msk [vmem:[#allocation3 + $0xa8] sm:$0xff] %vm852_vm0, %v10011_v31  ;;  %v4439_v37 = vpack.c.bf16 %v4404_v34, %v4403_v33 }
 0x2db   : > { %4074 = vst.msk [vmem:[#allocation3 + $0xb0] sm:$0xff] %vm852_vm0, %v10011_v31  ;;  %4075 = vst.msk [vmem:[#allocation3 + $0xb8] sm:$0xff] %vm852_vm0, %v10011_v31 }
 0x2dc   : > { %4076 = vst.msk [vmem:[#allocation3 + $0xc0] sm:$0xff] %vm852_vm0, %v10011_v31  ;;  %4077 = vst.msk [vmem:[#allocation3 + $0xc8] sm:$0xff] %vm852_vm0, %v10011_v31  ;;  %9016 = vmatprep.mubr.msk.bf16.mxu1 %vm852_vm0, %v4439_v37 }
 0x2dd   : > { %4078 = vst.msk [vmem:[#allocation3 + $0xd0] sm:$0xff] %vm852_vm0, %v10011_v31  ;;  %4079 = vst.msk [vmem:[#allocation3 + $0xd8] sm:$0xff] %vm852_vm0, %v10011_v31 }
 0x2de   : > { %8969 = vmatmul.mubr.msk.bf16.gmra.mrb[32].mxu0 %vm852_vm0, %v3240_v40  ;;  %4080 = vst.msk [vmem:[#allocation3 + $0xe0] sm:$0xff] %vm852_vm0, %v10011_v31  ;;  %4081 = vst.msk [vmem:[#allocation3 + $0xe8] sm:$0xff] %vm852_vm0, %v10011_v31  ;;  %v10854_v40 = vpop.permute.xlu0 %4110 }
 0x2df   : > { %8976 = vmatprep.mubr.msk.bf16.mxu0 %vm852_vm0, %v3561_v42  ;;  %4082 = vst.msk [vmem:[#allocation3 + $0xf0] sm:$0xff] %vm852_vm0, %v10011_v31  ;;  %4083 = vst.msk [vmem:[#allocation3 + $0xf8] sm:$0xff] %vm852_vm0, %v10011_v31 }
 0x2e0   : > { %4084 = vst.msk [vmem:[#allocation3 + $0x100] sm:$0xff] %vm852_vm0, %v10011_v31  ;;  %4085 = vst.msk [vmem:[#allocation3 + $0x108] sm:$0xff] %vm852_vm0, %v10011_v31 }
 0x2e1   : > { %4086 = vst.msk [vmem:[#allocation3 + $0x110] sm:$0xff] %vm852_vm0, %v10011_v31  ;;  %4087 = vst.msk [vmem:[#allocation3 + $0x118] sm:$0xff] %vm852_vm0, %v10011_v31 }
 0x2e2   : > { %4088 = vst.msk [vmem:[#allocation3 + $0x120] sm:$0xff] %vm852_vm0, %v10011_v31  ;;  %4089 = vst.msk [vmem:[#allocation3 + $0x128] sm:$0xff] %vm852_vm0, %v10011_v31  ;;  %v10858_v42 = vpop.permute.xlu0 %4120 }
 0x2e3   : > { %4090 = vst.msk [vmem:[#allocation3 + $0x130] sm:$0xff] %vm852_vm0, %v10011_v31  ;;  %4091 = vst.msk [vmem:[#allocation3 + $0x138] sm:$0xff] %vm852_vm0, %v10011_v31 }
 0x2e4   : > { %4092 = vst.msk [vmem:[#allocation3 + $0x140] sm:$0xff] %vm852_vm0, %v10011_v31 }
 0x2e6   : > { %8977 = vmatmul.mubr.msk.bf16.vlgmr.msra.gmra.mrb[0].mxu0 %vm852_vm0, %v3562_v49  ;;  %v10862_v47 = vpop.permute.xlu0 %4130 }
 0x2e7   : > { %8980 = vmatprep.mubr.msk.bf16.mxu0 %vm852_vm0, %v3563_v51  ;;  %v10873_v51 = vpop.permute.xlu1 %4145 }
 0x2ea   : > { %v10866_v49 = vpop.permute.xlu0 %4140 }
 0x2eb   : > { %v10890_v1 = vpop.permute.xlu1 %4155 }
 0x2ee   : > { %8981 = vmatmul.mubr.msk.bf16.gmra.mrb[4].mxu0 %vm852_vm0, %v3564_v55  ;;  %v10880_v45 = vpop.permute.xlu0 %4150 }
 0x2ef   : > { %8984 = vmatprep.mubr.msk.bf16.mxu0 %vm852_vm0, %v3565_v57  ;;  %v10883_v57 = vstv %s390_s10 }
 0x2f0   : > { %12192 = vst [vmem:[#allocation6_spill] sm:$0xff] %v10883_v57 }
 0x2f2   : > { %v10896_v6 = vpop.permute.xlu0 %4160 }
 0x2f6   : > { %8985 = vmatmul.mubr.msk.bf16.gmra.mrb[8].mxu0 %vm852_vm0, %v3566_v53  ;;  %v10915_v26 = vpop.permute.xlu0 %4170 }
 0x2f7   : > { %8988 = vmatprep.mubr.msk.bf16.mxu0 %vm852_vm0, %v3567_v63 }
 0x2fe   : > { %8989 = vmatmul.mubr.msk.bf16.gmra.mrb[12].mxu0 %vm852_vm0, %v3568_v2 }
 0x2ff   : > { %8992 = vmatprep.mubr.msk.bf16.mxu0 %vm852_vm0, %v3569_v3 }
 0x306   : > { %8993 = vmatmul.mubr.msk.bf16.gmra.mrb[16].mxu0 %vm852_vm0, %v3570_v9 }
 0x307   : > { %8996 = vmatprep.mubr.msk.bf16.mxu0 %vm852_vm0, %v3571_v5 }
 0x30e   : > { %8997 = vmatmul.mubr.msk.bf16.gmra.mrb[20].mxu0 %vm852_vm0, %v3572_v14 }
 0x30f   : > { %9000 = vmatprep.mubr.msk.bf16.mxu0 %vm852_vm0, %v3573_v16 }
 0x316   : > { %9001 = vmatmul.mubr.msk.bf16.gmra.mrb[24].mxu0 %vm852_vm0, %v3574_v19  ;;  %v10906_v19 = vpop.permute.xlu1 %4165 }
 0x317   : > { %9004 = vmatprep.mubr.msk.bf16.mxu0 %vm852_vm0, %v3575_v22 }
 0x31e   : > { %9005 = vmatmul.mubr.msk.bf16.gmra.mrb[28].mxu0 %vm852_vm0, %v3576_v30 }
 0x31f   : > { %9008 = vmatprep.mubr.msk.bf16.mxu0 %vm852_vm0, %v3577_v27 }
 0x326   : > { %9009 = vmatmul.mubr.msk.bf16.gmra.mrb[32].mxu0 %vm852_vm0, %v3578_v29 }
 0x3b9   : > { %v8978_v54 = vpop.f32.mrb[0].mxu0 }
 0x3ba   : > { %v3869_v55 = vmul.f32 %v8978_v54, %v10871_v50  ;;  %v3684_v56 = vpop.f32.mrb[1].mxu0  ;;  %v10925_v54 = vpop.permute.xlu1 %4175 }
 0x3bb   : > { %v3867_v58 = vmul.f32 %v10871_v50, %v3684_v56  ;;  %v8979_v52 = vpop.f32.mrb[2].mxu0 }
 0x3bc   : > { %v3909_v59 = vadd.f32 %v10878_v44, %v3869_v55  ;;  %v3870_v53 = vmul.f32 %v8979_v52, %v10871_v50  ;;  %v3687_v62 = vpop.f32.mrb[3].mxu0 }
 0x3bd   : > { %v3907_v63 = vadd.f32 %v10878_v44, %v3867_v58  ;;  %v3868_v0 = vmul.f32 %v10871_v50, %v3687_v62 }
 0x3be   : > { %vm3945_vm1 = vcmp.ge.f32.partialorder %v3909_v59, 0.0  ;;  %v3982_v60 = vmul.f32 %v10883_v57, %v3909_v59  ;;  %v3910_v2 = vadd.f32 %v10878_v44, %v3870_v53 }
 0x3bf   : > { %vm3943_vm2 = vcmp.ge.f32.partialorder %v3907_v63, 0.0  ;;  %v3980_v61 = vmul.f32 %v10883_v57, %v3907_v63  ;;  %v3908_v3 = vadd.f32 %v10878_v44, %v3868_v0  ;;  %v10932_v0 = vpop.permute.xlu0 %4180 }
 0x3c0   : > { %v4018_v7 = vsel %vm3945_vm1, %v3909_v59, %v3982_v60  ;;  %vm3946_vm3 = vcmp.ge.f32.partialorder %v3910_v2, 0.0  ;;  %v3983_v8 = vmul.f32 %v10883_v57, %v3910_v2 }
 0x3c1   : > { %v4275_v9 = vmul.f32 %v10852_v39, %v4018_v7  ;;  %v4016_v4 = vsel %vm3943_vm2, %v3907_v63, %v3980_v61  ;;  %vm3944_vm4 = vcmp.ge.f32.partialorder %v3908_v3, 0.0  ;;  %v3981_v5 = vmul.f32 %v10883_v57, %v3908_v3  ;;  %v8982_v11 = vpop.f32.mrb[4].mxu0 }
 0x3c2   : > { %v4273_v12 = vmul.f32 %v10848_v43, %v4016_v4  ;;  %v4019_v13 = vsel %vm3946_vm3, %v3910_v2, %v3983_v8  ;;  %v3873_v14 = vmul.f32 %v8982_v11, %v10871_v50  ;;  %v3700_v15 = vpop.f32.mrb[5].mxu0 }
 0x3c3   : > { %4311 = vst.msk [vmem:[#allocation3 + $0x23] sm:$0xff] %vm852_vm0, %v4275_v9  ;;  %v4276_v16 = vmul.f32 %v10854_v40, %v4019_v13  ;;  %v4017_v10 = vsel %vm3944_vm4, %v3908_v3, %v3981_v5  ;;  %v3871_v17 = vmul.f32 %v10871_v50, %v3700_v15  ;;  %v8983_v18 = vpop.f32.mrb[6].mxu0  ;;  %v9983_v15 = vld [vmem:[%s12157_s3 + $0x8] sm:$0xff]  }
 0x3c4   : > { %4309 = vst.msk [vmem:[#allocation3 + $0x13] sm:$0xff] %vm852_vm0, %v4273_v12  ;;  %v4274_v20 = vmul.f32 %v10850_v38, %v4017_v10  ;;  %v3913_v22 = vadd.f32 %v10878_v44, %v3873_v14  ;;  %v3874_v23 = vmul.f32 %v8983_v18, %v10871_v50  ;;  %v3703_v24 = vpop.f32.mrb[7].mxu0  ;;  %v10949_v18 = vpop.permute.xlu1 %4185 }
 0x3c5   : > { %4312 = vst.msk [vmem:[#allocation3 + $0x2b] sm:$0xff] %vm852_vm0, %v4276_v16  ;;  %v3911_v25 = vadd.f32 %v10878_v44, %v3871_v17  ;;  %v3872_v30 = vmul.f32 %v10871_v50, %v3703_v24 }
 0x3c6   : > { %4310 = vst.msk [vmem:[#allocation3 + $0x1b] sm:$0xff] %vm852_vm0, %v4274_v20  ;;  %vm3949_vm5 = vcmp.ge.f32.partialorder %v3913_v22, 0.0  ;;  %v3986_v27 = vmul.f32 %v10883_v57, %v3913_v22  ;;  %v3914_v28 = vadd.f32 %v10878_v44, %v3874_v23 }
 0x3c7   : > { %vm3947_vm6 = vcmp.ge.f32.partialorder %v3911_v25, 0.0  ;;  %v3984_v36 = vmul.f32 %v10883_v57, %v3911_v25  ;;  %v3912_v29 = vadd.f32 %v10878_v44, %v3872_v30 }
 0x3c8   : > { %v4022_v31 = vsel %vm3949_vm5, %v3913_v22, %v3986_v27  ;;  %vm3950_vm7 = vcmp.ge.f32.partialorder %v3914_v28, 0.0  ;;  %v3987_v32 = vmul.f32 %v10883_v57, %v3914_v28  ;;  %v10957_v27 = vpop.permute.xlu0 %4190 }
 0x3c9   : > { %v4279_v21 = vmul.f32 %v10860_v46, %v4022_v31  ;;  %v4020_v33 = vsel %vm3947_vm6, %v3911_v25, %v3984_v36  ;;  %vm3948_vm8 = vcmp.ge.f32.partialorder %v3912_v29, 0.0  ;;  %v3985_v34 = vmul.f32 %v10883_v57, %v3912_v29  ;;  %v8986_v37 = vpop.f32.mrb[8].mxu0 }
 0x3ca   : > { %v4277_v55 = vmul.f32 %v10856_v41, %v4020_v33  ;;  %v4023_v56 = vsel %vm3950_vm7, %v3914_v28, %v3987_v32  ;;  %v3877_v58 = vmul.f32 %v8986_v37, %v10871_v50  ;;  %v3716_v52 = vpop.f32.mrb[9].mxu0  ;;  %v10964_v32 = vld [vmem:[%s12157_s3 + $0x20] sm:$0xff]  }
 0x3cb   : > { %4315 = vst.msk [vmem:[#allocation3 + $0x43] sm:$0xff] %vm852_vm0, %v4279_v21  ;;  %v4280_v59 = vmul.f32 %v10862_v47, %v4023_v56  ;;  %v4021_v53 = vsel %vm3948_vm8, %v3912_v29, %v3985_v34  ;;  %v3875_v62 = vmul.f32 %v10871_v50, %v3716_v52  ;;  %v8987_v63 = vpop.f32.mrb[10].mxu0  ;;  %v4405_v4 = vld [vmem:[#allocation3 + $0x11] sm:$0xff] }
 0x3cc   : > { %4313 = vst.msk [vmem:[#allocation3 + $0x33] sm:$0xff] %vm852_vm0, %v4277_v55  ;;  %v4278_v60 = vmul.f32 %v10858_v42, %v4021_v53  ;;  %v3917_v2 = vadd.f32 %v10878_v44, %v3877_v58  ;;  %v3878_v61 = vmul.f32 %v8987_v63, %v10871_v50  ;;  %v3719_v3 = vpop.f32.mrb[11].mxu0  ;;  %v4408_v7 = vld [vmem:[#allocation3 + $0x29] sm:$0xff] }
 0x3cd   : > { %4316 = vst.msk [vmem:[#allocation3 + $0x4b] sm:$0xff] %vm852_vm0, %v4280_v59  ;;  %v3915_v8 = vadd.f32 %v10878_v44, %v3875_v62  ;;  %v3876_v9 = vmul.f32 %v10871_v50, %v3719_v3  ;;  %v4406_v5 = vld [vmem:[#allocation3 + $0x19] sm:$0xff]  ;;  %v4407_v11 = vld [vmem:[#allocation3 + $0x21] sm:$0xff] }
 0x3ce   : > { %4314 = vst.msk [vmem:[#allocation3 + $0x3b] sm:$0xff] %vm852_vm0, %v4278_v60  ;;  %vm3953_vm9 = vcmp.ge.f32.partialorder %v3917_v2, 0.0  ;;  %v3990_v12 = vmul.f32 %v10883_v57, %v3917_v2  ;;  %v3918_v13 = vadd.f32 %v10878_v44, %v3878_v61  ;;  %v4440_v14 = vpack.c.bf16 %v4406_v5, %v4405_v4  ;;  %v10984_v5 = vpop.permute.xlu0 %4200 }
 0x3cf   : > { %vm3951_vm10 = vcmp.ge.f32.partialorder %v3915_v8, 0.0  ;;  %v3988_v16 = vmul.f32 %v10883_v57, %v3915_v8  ;;  %v3916_v10 = vadd.f32 %v10878_v44, %v3876_v9  ;;  %v4441_v17 = vpack.c.bf16 %v4408_v7, %v4407_v11 }
 0x3d0   : > { %v4026_v20 = vsel %vm3953_vm9, %v3917_v2, %v3990_v12  ;;  %vm3954_vm11 = vcmp.ge.f32.partialorder %v3918_v13, 0.0  ;;  %v3991_v22 = vmul.f32 %v10883_v57, %v3918_v13  ;;  %9017 = vmatmul.mubr.msk.bf16.vlgmr.msra.gmra.mrb[0].mxu1 %vm852_vm0, %v4440_v14  ;;  %v10976_v2 = vpop.permute.xlu1 %4195 }
 0x3d1   : > { %v4283_v23 = vmul.f32 %v10873_v51, %v4026_v20  ;;  %v4024_v24 = vsel %vm3951_vm10, %v3915_v8, %v3988_v16  ;;  %vm3952_vm12 = vcmp.ge.f32.partialorder %v3916_v10, 0.0  ;;  %v3989_v25 = vmul.f32 %v10883_v57, %v3916_v10  ;;  %9053 = vmatpush3.bf16.msra.mxu1 %v10844_v35  ;;  %v8990_v30 = vpop.f32.mrb[12].mxu0  ;;  %9020 = vmatprep.mubr.msk.bf16.mxu1 %vm852_vm0, %v4441_v17 }
 0x3d2   : > { %v4281_v28 = vmul.f32 %v10864_v48, %v4024_v24  ;;  %v4027_v36 = vsel %vm3954_vm11, %v3918_v13, %v3991_v22  ;;  %v3881_v29 = vmul.f32 %v8990_v30, %v10871_v50  ;;  %v3732_v31 = vpop.f32.mrb[13].mxu0  ;;  %9054 = vmatprep.subr.bf16.mxu1 %v9983_v15 }
 0x3d3   : > { %4319 = vst.msk [vmem:[#allocation3 + $0x63] sm:$0xff] %vm852_vm0, %v4283_v23  ;;  %v4284_v35 = vmul.f32 %v10880_v45, %v4027_v36  ;;  %v4025_v21 = vsel %vm3952_vm12, %v3916_v10, %v3989_v25  ;;  %v3879_v33 = vmul.f32 %v10871_v50, %v3732_v31  ;;  %v8991_v34 = vpop.f32.mrb[14].mxu0  ;;  %v4409_v62 = vld [vmem:[#allocation3 + $0x31] sm:$0xff] }
 0x3d4   : > { %4317 = vst.msk [vmem:[#allocation3 + $0x53] sm:$0xff] %vm852_vm0, %v4281_v28  ;;  %v4282_v37 = vmul.f32 %v10866_v49, %v4025_v21  ;;  %v3921_v55 = vadd.f32 %v10878_v44, %v3881_v29  ;;  %v3882_v56 = vmul.f32 %v8991_v34, %v10871_v50  ;;  %v3735_v58 = vpop.f32.mrb[15].mxu0  ;;  %v4412_v52 = vld [vmem:[#allocation3 + $0x49] sm:$0xff]  ;;  %v10996_v28 = vpop.permute.xlu1 %4205 }
 0x3d5   : > { %4320 = vst.msk [vmem:[#allocation3 + $0x6b] sm:$0xff] %vm852_vm0, %v4284_v35  ;;  %v3919_v59 = vadd.f32 %v10878_v44, %v3879_v33  ;;  %v3880_v53 = vmul.f32 %v10871_v50, %v3735_v58  ;;  %v4410_v63 = vld [vmem:[#allocation3 + $0x39] sm:$0xff]  ;;  %v4411_v60 = vld [vmem:[#allocation3 + $0x41] sm:$0xff]  ;;  %9055 = vmatpush3.bf16.msra.mxu1 %v9983_v15  ;;  %v11005_v58 = vpop.permute.xlu0 %4210 }
 0x3d6   : > { %4318 = vst.msk [vmem:[#allocation3 + $0x5b] sm:$0xff] %vm852_vm0, %v4282_v37  ;;  %vm3957_vm13 = vcmp.ge.f32.partialorder %v3921_v55, 0.0  ;;  %v3994_v61 = vmul.f32 %v10883_v57, %v3921_v55  ;;  %v3922_v3 = vadd.f32 %v10878_v44, %v3882_v56  ;;  %v4442_v7 = vpack.c.bf16 %v4410_v63, %v4409_v62  ;;  %9092 = vmatprep.subr.bf16.mxu1 %v10964_v32 }
 0x3d7   : > { %vm3955_vm14 = vcmp.ge.f32.partialorder %v3919_v59, 0.0  ;;  %v3992_v8 = vmul.f32 %v10883_v57, %v3919_v59  ;;  %v3920_v9 = vadd.f32 %v10878_v44, %v3880_v53  ;;  %v4443_v4 = vpack.c.bf16 %v4412_v52, %v4411_v60 }
 0x3d8   : > { %v4030_v11 = vsel %vm3957_vm13, %v3921_v55, %v3994_v61  ;;  %vm3958_vm15 = vcmp.ge.f32.partialorder %v3922_v3, 0.0  ;;  %v3995_v12 = vmul.f32 %v10883_v57, %v3922_v3  ;;  %9021 = vmatmul.mubr.msk.bf16.gmra.mrb[4].mxu1 %vm852_vm0, %v4442_v7 }
 0x3d9   : > { %v4287_v13 = vmul.f32 %v10906_v19, %v4030_v11  ;;  %v4028_v14 = vsel %vm3955_vm14, %v3919_v59, %v3992_v8  ;;  %vm3956_vm1 = vcmp.ge.f32.partialorder %v3920_v9, 0.0  ;;  %v3993_v15 = vmul.f32 %v10883_v57, %v3920_v9  ;;  %v8994_v16 = vpop.f32.mrb[16].mxu0  ;;  %9024 = vmatprep.mubr.msk.bf16.mxu1 %vm852_vm0, %v4443_v4  ;;  %v11017_v11 = vpop.permute.xlu1 %4215 }
 0x3da   : > { %v4285_v10 = vmul.f32 %v10890_v1, %v4028_v14  ;;  %v4031_v17 = vsel %vm3958_vm15, %v3922_v3, %v3995_v12  ;;  %v3885_v20 = vmul.f32 %v8994_v16, %v10871_v50  ;;  %v3748_v22 = vpop.f32.mrb[17].mxu0 }
 0x3db   : > { %4323 = vst.msk [vmem:[#allocation3 + $0x83] sm:$0xff] %vm852_vm0, %v4287_v13  ;;  %v4288_v23 = vmul.f32 %v10915_v26, %v4031_v17  ;;  %v4029_v24 = vsel %vm3956_vm1, %v3920_v9, %v3993_v15  ;;  %v3883_v25 = vmul.f32 %v10871_v50, %v3748_v22  ;;  %v8995_v30 = vpop.f32.mrb[18].mxu0  ;;  %v4413_v37 = vld [vmem:[#allocation3 + $0x51] sm:$0xff]  ;;  %v11024_v22 = vpop.permute.xlu0 %4220 }
 0x3dc   : > { %4321 = vst.msk [vmem:[#allocation3 + $0x73] sm:$0xff] %vm852_vm0, %v4285_v10  ;;  %v4286_v36 = vmul.f32 %v10896_v6, %v4029_v24  ;;  %v3925_v29 = vadd.f32 %v10878_v44, %v3885_v20  ;;  %v3886_v31 = vmul.f32 %v8995_v30, %v10871_v50  ;;  %v3751_v35 = vpop.f32.mrb[19].mxu0  ;;  %v4416_v21 = vld [vmem:[#allocation3 + $0x69] sm:$0xff] }
 0x3dd   : > { %4324 = vst.msk [vmem:[#allocation3 + $0x8b] sm:$0xff] %vm852_vm0, %v4288_v23  ;;  %v3923_v33 = vadd.f32 %v10878_v44, %v3883_v25  ;;  %v3884_v34 = vmul.f32 %v10871_v50, %v3751_v35  ;;  %v4414_v55 = vld [vmem:[#allocation3 + $0x59] sm:$0xff]  ;;  %v4415_v56 = vld [vmem:[#allocation3 + $0x61] sm:$0xff] }
 0x3de   : > { %4322 = vst.msk [vmem:[#allocation3 + $0x7b] sm:$0xff] %vm852_vm0, %v4286_v36  ;;  %vm3961_vm2 = vcmp.ge.f32.partialorder %v3925_v29, 0.0  ;;  %v3998_v52 = vmul.f32 %v10883_v57, %v3925_v29  ;;  %v3926_v59 = vadd.f32 %v10878_v44, %v3886_v31  ;;  %v4444_v53 = vpack.c.bf16 %v4414_v55, %v4413_v37 }
 0x3df   : > { %vm3959_vm3 = vcmp.ge.f32.partialorder %v3923_v33, 0.0  ;;  %v3996_v62 = vmul.f32 %v10883_v57, %v3923_v33  ;;  %v3924_v63 = vadd.f32 %v10878_v44, %v3884_v34  ;;  %v4445_v60 = vpack.c.bf16 %v4416_v21, %v4415_v56 }
 0x3e0   : > { %v4034_v61 = vsel %vm3961_vm2, %v3925_v29, %v3998_v52  ;;  %vm3962_vm4 = vcmp.ge.f32.partialorder %v3926_v59, 0.0  ;;  %v3999_v3 = vmul.f32 %v10883_v57, %v3926_v59  ;;  %9025 = vmatmul.mubr.msk.bf16.gmra.mrb[8].mxu1 %vm852_vm0, %v4444_v53  ;;  %v11038_v53 = vpop.permute.xlu1 %4225 }
 0x3e1   : > { %v4291_v7 = vmul.f32 %v10949_v18, %v4034_v61  ;;  %v4032_v8 = vsel %vm3959_vm3, %v3923_v33, %v3996_v62  ;;  %vm3960_vm5 = vcmp.ge.f32.partialorder %v3924_v63, 0.0  ;;  %v3997_v9 = vmul.f32 %v10883_v57, %v3924_v63  ;;  %v8998_v4 = vpop.f32.mrb[20].mxu0  ;;  %9028 = vmatprep.mubr.msk.bf16.mxu1 %vm852_vm0, %v4445_v60 }
 0x3e2   : > { %v4289_v12 = vmul.f32 %v10925_v54, %v4032_v8  ;;  %v4035_v13 = vsel %vm3962_vm4, %v3926_v59, %v3999_v3  ;;  %v3889_v14 = vmul.f32 %v8998_v4, %v10871_v50  ;;  %v3764_v15 = vpop.f32.mrb[21].mxu0  ;;  %v11045_v8 = vpop.permute.xlu0 %4230 }
 0x3e3   : > { %4327 = vst.msk [vmem:[#allocation3 + $0xa3] sm:$0xff] %vm852_vm0, %v4291_v7  ;;  %v4292_v16 = vmul.f32 %v10957_v27, %v4035_v13  ;;  %v4033_v10 = vsel %vm3960_vm5, %v3924_v63, %v3997_v9  ;;  %v3887_v17 = vmul.f32 %v10871_v50, %v3764_v15  ;;  %v8999_v20 = vpop.f32.mrb[22].mxu0  ;;  %v4417_v35 = vld [vmem:[#allocation3 + $0x71] sm:$0xff] }
 0x3e4   : > { %4325 = vst.msk [vmem:[#allocation3 + $0x93] sm:$0xff] %vm852_vm0, %v4289_v12  ;;  %v4290_v23 = vmul.f32 %v10932_v0, %v4033_v10  ;;  %v3929_v24 = vadd.f32 %v10878_v44, %v3889_v14  ;;  %v3890_v25 = vmul.f32 %v8999_v20, %v10871_v50  ;;  %v3767_v30 = vpop.f32.mrb[23].mxu0  ;;  %v4420_v36 = vld [vmem:[#allocation3 + $0x89] sm:$0xff] }
 0x3e5   : > { %4328 = vst.msk [vmem:[#allocation3 + $0xab] sm:$0xff] %vm852_vm0, %v4292_v16  ;;  %v3927_v29 = vadd.f32 %v10878_v44, %v3887_v17  ;;  %v3888_v31 = vmul.f32 %v10871_v50, %v3767_v30  ;;  %v4418_v21 = vld [vmem:[#allocation3 + $0x79] sm:$0xff]  ;;  %v4419_v33 = vld [vmem:[#allocation3 + $0x81] sm:$0xff] }
 0x3e6   : > { %4326 = vst.msk [vmem:[#allocation3 + $0x9b] sm:$0xff] %vm852_vm0, %v4290_v23  ;;  %vm3965_vm6 = vcmp.ge.f32.partialorder %v3929_v24, 0.0  ;;  %v4002_v34 = vmul.f32 %v10883_v57, %v3929_v24  ;;  %v3930_v37 = vadd.f32 %v10878_v44, %v3890_v25  ;;  %v4446_v55 = vpack.c.bf16 %v4418_v21, %v4417_v35  ;;  %v11059_v21 = vpop.permute.xlu1 %4235 }
 0x3e7   : > { %vm3963_vm7 = vcmp.ge.f32.partialorder %v3927_v29, 0.0  ;;  %v4000_v56 = vmul.f32 %v10883_v57, %v3927_v29  ;;  %v3928_v52 = vadd.f32 %v10878_v44, %v3888_v31  ;;  %v4447_v59 = vpack.c.bf16 %v4420_v36, %v4419_v33 }
 0x3e8   : > { %v4038_v62 = vsel %vm3965_vm6, %v3929_v24, %v4002_v34  ;;  %vm3966_vm8 = vcmp.ge.f32.partialorder %v3930_v37, 0.0  ;;  %v4003_v63 = vmul.f32 %v10883_v57, %v3930_v37  ;;  %9029 = vmatmul.mubr.msk.bf16.gmra.mrb[12].mxu1 %vm852_vm0, %v4446_v55 }
 0x3e9   : > { %v4295_v60 = vmul.f32 %v10996_v28, %v4038_v62  ;;  %v4036_v61 = vsel %vm3963_vm7, %v3927_v29, %v4000_v56  ;;  %vm3964_vm9 = vcmp.ge.f32.partialorder %v3928_v52, 0.0  ;;  %v4001_v3 = vmul.f32 %v10883_v57, %v3928_v52  ;;  %v9002_v7 = vpop.f32.mrb[24].mxu0  ;;  %9032 = vmatprep.mubr.msk.bf16.mxu1 %vm852_vm0, %v4447_v59  ;;  %v11066_v59 = vpop.permute.xlu0 %4240 }
 0x3ea   : > { %v4293_v9 = vmul.f32 %v10976_v2, %v4036_v61  ;;  %v4039_v4 = vsel %vm3966_vm8, %v3930_v37, %v4003_v63  ;;  %v3893_v12 = vmul.f32 %v9002_v7, %v10871_v50  ;;  %v3780_v13 = vpop.f32.mrb[25].mxu0  ;;  %vm7510_vm7 = vcmask 254976  }
 0x3eb   : > { %4331 = vst.msk [vmem:[#allocation3 + $0xc3] sm:$0xff] %vm852_vm0, %v4295_v60  ;;  %v4296_v14 = vmul.f32 %v11005_v58, %v4039_v4  ;;  %v4037_v15 = vsel %vm3964_vm9, %v3928_v52, %v4001_v3  ;;  %v3891_v16 = vmul.f32 %v10871_v50, %v3780_v13  ;;  %v9003_v10 = vpop.f32.mrb[26].mxu0  ;;  %v4421_v29 = vld [vmem:[#allocation3 + $0x91] sm:$0xff] }
 0x3ec   : > { %4329 = vst.msk [vmem:[#allocation3 + $0xb3] sm:$0xff] %vm852_vm0, %v4293_v9  ;;  %v4294_v17 = vmul.f32 %v10984_v5, %v4037_v15  ;;  %v3933_v20 = vadd.f32 %v10878_v44, %v3893_v12  ;;  %v3894_v23 = vmul.f32 %v9003_v10, %v10871_v50  ;;  %v3783_v24 = vpop.f32.mrb[27].mxu0  ;;  %v4424_v25 = vld [vmem:[#allocation3 + $0xa9] sm:$0xff] }
 0x3ed   : > { %4332 = vst.msk [vmem:[#allocation3 + $0xcb] sm:$0xff] %vm852_vm0, %v4296_v14  ;;  %v3931_v30 = vadd.f32 %v10878_v44, %v3891_v16  ;;  %v3892_v36 = vmul.f32 %v10871_v50, %v3783_v24  ;;  %v4422_v31 = vld [vmem:[#allocation3 + $0x99] sm:$0xff]  ;;  %v4423_v35 = vld [vmem:[#allocation3 + $0xa1] sm:$0xff] }
 0x3ee   : > { %4330 = vst.msk [vmem:[#allocation3 + $0xbb] sm:$0xff] %vm852_vm0, %v4294_v17  ;;  %vm3969_vm10 = vcmp.ge.f32.partialorder %v3933_v20, 0.0  ;;  %v4006_v33 = vmul.f32 %v10883_v57, %v3933_v20  ;;  %v3934_v34 = vadd.f32 %v10878_v44, %v3894_v23  ;;  %v4448_v37 = vpack.c.bf16 %v4422_v31, %v4421_v29  ;;  %v11078_v17 = vpop.permute.xlu1 %4245 }
 0x3ef   : > { %vm3967_vm11 = vcmp.ge.f32.partialorder %v3931_v30, 0.0  ;;  %v4004_v55 = vmul.f32 %v10883_v57, %v3931_v30  ;;  %v3932_v56 = vadd.f32 %v10878_v44, %v3892_v36  ;;  %v4449_v52 = vpack.c.bf16 %v4424_v25, %v4423_v35 }
 0x3f0   : > { %v4042_v62 = vsel %vm3969_vm10, %v3933_v20, %v4006_v33  ;;  %vm3970_vm12 = vcmp.ge.f32.partialorder %v3934_v34, 0.0  ;;  %v4007_v63 = vmul.f32 %v10883_v57, %v3934_v34  ;;  %9033 = vmatmul.mubr.msk.bf16.gmra.mrb[16].mxu1 %vm852_vm0, %v4448_v37 }
 0x3f1   : > { %v4299_v60 = vmul.f32 %v11038_v53, %v4042_v62  ;;  %v4040_v61 = vsel %vm3967_vm11, %v3931_v30, %v4004_v55  ;;  %vm3968_vm13 = vcmp.ge.f32.partialorder %v3932_v56, 0.0  ;;  %v4005_v3 = vmul.f32 %v10883_v57, %v3932_v56  ;;  %v9006_v7 = vpop.f32.mrb[28].mxu0  ;;  %9036 = vmatprep.mubr.msk.bf16.mxu1 %vm852_vm0, %v4449_v52 }
 0x3f2   : > { %v4297_v9 = vmul.f32 %v11017_v11, %v4040_v61  ;;  %v4043_v4 = vsel %vm3970_vm12, %v3934_v34, %v4007_v63  ;;  %v3897_v12 = vmul.f32 %v9006_v7, %v10871_v50  ;;  %v3796_v13 = vpop.f32.mrb[29].mxu0  ;;  %v11087_v34 = vpop.permute.xlu0 %4250 }
 0x3f3   : > { %4335 = vst.msk [vmem:[#allocation3 + $0xe3] sm:$0xff] %vm852_vm0, %v4299_v60  ;;  %v4300_v14 = vmul.f32 %v11045_v8, %v4043_v4  ;;  %v4041_v15 = vsel %vm3968_vm13, %v3932_v56, %v4005_v3  ;;  %v3895_v16 = vmul.f32 %v10871_v50, %v3796_v13  ;;  %v9007_v10 = vpop.f32.mrb[30].mxu0  ;;  %v4425_v31 = vld [vmem:[#allocation3 + $0xb1] sm:$0xff] }
 0x3f4   : > { %4333 = vst.msk [vmem:[#allocation3 + $0xd3] sm:$0xff] %vm852_vm0, %v4297_v9  ;;  %v4298_v20 = vmul.f32 %v11024_v22, %v4041_v15  ;;  %v3937_v23 = vadd.f32 %v10878_v44, %v3897_v12  ;;  %v3898_v24 = vmul.f32 %v9007_v10, %v10871_v50  ;;  %v3799_v25 = vpop.f32.mrb[31].mxu0  ;;  %v4428_v30 = vld [vmem:[#allocation3 + $0xc9] sm:$0xff]  ;;  %v11099_v12 = vpop.permute.xlu1 %4255 }
 0x3f5   : > { %4336 = vst.msk [vmem:[#allocation3 + $0xeb] sm:$0xff] %vm852_vm0, %v4300_v14  ;;  %v3935_v36 = vadd.f32 %v10878_v44, %v3895_v16  ;;  %v3896_v29 = vmul.f32 %v10871_v50, %v3799_v25  ;;  %v4426_v35 = vld [vmem:[#allocation3 + $0xb9] sm:$0xff]  ;;  %v4427_v33 = vld [vmem:[#allocation3 + $0xc1] sm:$0xff] }
 0x3f6   : > { %4334 = vst.msk [vmem:[#allocation3 + $0xdb] sm:$0xff] %vm852_vm0, %v4298_v20  ;;  %vm3973_vm14 = vcmp.ge.f32.partialorder %v3937_v23, 0.0  ;;  %v4010_v37 = vmul.f32 %v10883_v57, %v3937_v23  ;;  %v3938_v55 = vadd.f32 %v10878_v44, %v3898_v24  ;;  %v4450_v56 = vpack.c.bf16 %v4426_v35, %v4425_v31  ;;  %v11106_v25 = vpop.permute.xlu0 %4260 }
 0x3f7   : > { %vm3971_vm15 = vcmp.ge.f32.partialorder %v3935_v36, 0.0  ;;  %v4008_v52 = vmul.f32 %v10883_v57, %v3935_v36  ;;  %v3936_v62 = vadd.f32 %v10878_v44, %v3896_v29  ;;  %v4451_v63 = vpack.c.bf16 %v4428_v30, %v4427_v33 }
 0x3f8   : > { %v4046_v60 = vsel %vm3973_vm14, %v3937_v23, %v4010_v37  ;;  %vm3974_vm1 = vcmp.ge.f32.partialorder %v3938_v55, 0.0  ;;  %v4011_v61 = vmul.f32 %v10883_v57, %v3938_v55  ;;  %9037 = vmatmul.mubr.msk.bf16.gmra.mrb[20].mxu1 %vm852_vm0, %v4450_v56 }
 0x3f9   : > { %v4303_v3 = vmul.f32 %v11078_v17, %v4046_v60  ;;  %v4044_v7 = vsel %vm3971_vm15, %v3935_v36, %v4008_v52  ;;  %vm3972_vm2 = vcmp.ge.f32.partialorder %v3936_v62, 0.0  ;;  %v4009_v9 = vmul.f32 %v10883_v57, %v3936_v62  ;;  %v9010_v4 = vpop.f32.mrb[32].mxu0  ;;  %9040 = vmatprep.mubr.msk.bf16.mxu1 %vm852_vm0, %v4451_v63 }
 0x3fa   : > { %v4301_v13 = vmul.f32 %v11059_v21, %v4044_v7  ;;  %v4047_v14 = vsel %vm3974_vm1, %v3938_v55, %v4011_v61  ;;  %v3901_v15 = vmul.f32 %v9010_v4, %v10871_v50  ;;  %v3812_v16 = vpop.f32.mrb[33].mxu0 }
 0x3fb   : > { %4339 = vst.msk [vmem:[#allocation3 + $0x103] sm:$0xff] %vm852_vm0, %v4303_v3  ;;  %v4304_v10 = vmul.f32 %v11087_v34, %v4047_v14  ;;  %v4045_v20 = vsel %vm3972_vm2, %v3936_v62, %v4009_v9  ;;  %v3899_v23 = vmul.f32 %v10871_v50, %v3812_v16  ;;  %v9011_v24 = vpop.f32.mrb[34].mxu0  ;;  %v4429_v55 = vld [vmem:[#allocation3 + $0xd1] sm:$0xff]  ;;  %v11120_v9 = vpop.permute.xlu1 %4265 }
 0x3fc   : > { %4337 = vst.msk [vmem:[#allocation3 + $0xf3] sm:$0xff] %vm852_vm0, %v4301_v13  ;;  %v4302_v30 = vmul.f32 %v11066_v59, %v4045_v20  ;;  %v3941_v36 = vadd.f32 %v10878_v44, %v3901_v15  ;;  %v3902_v29 = vmul.f32 %v9011_v24, %v10871_v50  ;;  %v3815_v31 = vpop.f32.mrb[35].mxu0  ;;  %v4432_v35 = vld [vmem:[#allocation3 + $0xe9] sm:$0xff]  ;;  %v11127_v16 = vpop.permute.xlu0 %4270 }
 0x3fd   : > { %4340 = vst.msk [vmem:[#allocation3 + $0x10b] sm:$0xff] %vm852_vm0, %v4304_v10  ;;  %v3939_v33 = vadd.f32 %v10878_v44, %v3899_v23  ;;  %v3900_v37 = vmul.f32 %v10871_v50, %v3815_v31  ;;  %v4430_v56 = vld [vmem:[#allocation3 + $0xd9] sm:$0xff]  ;;  %v4431_v52 = vld [vmem:[#allocation3 + $0xe1] sm:$0xff] }
 0x3fe   : > { %4338 = vst.msk [vmem:[#allocation3 + $0xfb] sm:$0xff] %vm852_vm0, %v4302_v30  ;;  %vm3977_vm3 = vcmp.ge.f32.partialorder %v3941_v36, 0.0  ;;  %v4014_v62 = vmul.f32 %v10883_v57, %v3941_v36  ;;  %v3942_v63 = vadd.f32 %v10878_v44, %v3902_v29  ;;  %v4452_v60 = vpack.c.bf16 %v4430_v56, %v4429_v55  ;;  %v4346_v55 = vld [vmem:[#allocation3 + $0x8] sm:$0xff] }
 0x3ff   : > { %vm3975_vm4 = vcmp.ge.f32.partialorder %v3939_v33, 0.0  ;;  %v4012_v61 = vmul.f32 %v10883_v57, %v3939_v33  ;;  %v3940_v3 = vadd.f32 %v10878_v44, %v3900_v37  ;;  %v4453_v7 = vpack.c.bf16 %v4432_v35, %v4431_v52  ;;  %v4345_v37 = vld [vmem:[#allocation3] sm:$0xff] }
 0x400   : > { %v4050_v50 = vsel %vm3977_vm3, %v3941_v36, %v4014_v62  ;;  %vm3978_vm5 = vcmp.ge.f32.partialorder %v3942_v63, 0.0  ;;  %v4015_v4 = vmul.f32 %v10883_v57, %v3942_v63  ;;  %9041 = vmatmul.mubr.msk.bf16.gmra.mrb[24].mxu1 %vm852_vm0, %v4452_v60  ;;  %v4381_v62 = vpack.c.bf16 %v4346_v55, %v4345_v37  ;;  %v4348_v60 = vld [vmem:[#allocation3 + $0x18] sm:$0xff]  ;;  %v4361_v37 = vld [vmem:[#allocation3 + $0x80] sm:$0xff]  ;;  %v4362_v55 = vld [vmem:[#allocation3 + $0x88] sm:$0xff] }
 0x401   : > { %v4307_v13 = vmul.f32 %v11120_v9, %v4050_v50  ;;  %v4048_v14 = vsel %vm3975_vm4, %v3939_v33, %v4012_v61  ;;  %vm3976_vm6 = vcmp.ge.f32.partialorder %v3940_v3, 0.0  ;;  %v4013_v15 = vmul.f32 %v10883_v57, %v3940_v3  ;;  %9044 = vmatprep.mubr.msk.bf16.mxu1 %vm852_vm0, %v4453_v7  ;;  %v4349_v61 = vld [vmem:[#allocation3 + $0x20] sm:$0xff]  ;;  %v4347_v7 = vld [vmem:[#allocation3 + $0x10] sm:$0xff] }
 0x402   : > { %v4305_v44 = vmul.f32 %v11099_v12, %v4048_v14  ;;  %v4051_v10 = vsel %vm3978_vm5, %v3942_v63, %v4015_v4  ;;  %v4382_v50 = vpack.c.bf16 %v4348_v60, %v4347_v7  ;;  %v9985_v4 = vld [vmem:[%s12157_s3 + $0x28] sm:$0xff]   ;;  %v11149_v14 = vld [vmem:[%s12157_s3 + $0x30] sm:$0xff]  }
 0x403   : > { %4343 = vst.msk [vmem:[#allocation3 + $0x123] sm:$0xff] %vm852_vm0, %v4307_v13  ;;  %v4308_v20 = vmul.f32 %v11127_v16, %v4051_v10  ;;  %v4049_v23 = vsel %vm3976_vm6, %v3940_v3, %v4013_v15  ;;  %v4433_v36 = vld [vmem:[#allocation3 + $0xf1] sm:$0xff]  ;;  %v4350_v3 = vld [vmem:[#allocation3 + $0x28] sm:$0xff]  ;;  %v4365_v60 = vld [vmem:[#allocation3 + $0xa0] sm:$0xff] }
 0x404   : > { %4341 = vst.msk [vmem:[#allocation3 + $0x113] sm:$0xff] %vm852_vm0, %v4305_v44  ;;  %v4306_v24 = vmul.f32 %v11106_v25, %v4049_v23  ;;  %v4436_v30 = vld [vmem:[#allocation3 + $0x109] sm:$0xff]  ;;  %v4383_v13 = vpack.c.bf16 %v4350_v3, %v4349_v61  ;;  %v4352_v15 = vld [vmem:[#allocation3 + $0x38] sm:$0xff]  ;;  %v4353_v44 = vld [vmem:[#allocation3 + $0x40] sm:$0xff] }
 0x405   : > { %4344 = vst.msk [vmem:[#allocation3 + $0x12b] sm:$0xff] %vm852_vm0, %v4308_v20  ;;  %v4434_v29 = vld [vmem:[#allocation3 + $0xf9] sm:$0xff]  ;;  %v4435_v31 = vld [vmem:[#allocation3 + $0x101] sm:$0xff]  ;;  %v4351_v20 = vld [vmem:[#allocation3 + $0x30] sm:$0xff] }
 0x406   : > { %4342 = vst.msk [vmem:[#allocation3 + $0x11b] sm:$0xff] %vm852_vm0, %v4306_v24  ;;  %v4454_v35 = vpack.c.bf16 %v4434_v29, %v4433_v36  ;;  %v4455_v33 = vpack.c.bf16 %v4436_v30, %v4435_v31  ;;  %v4354_v10 = vld [vmem:[#allocation3 + $0x48] sm:$0xff]  ;;  %v4384_v23 = vpack.c.bf16 %v4352_v15, %v4351_v20  ;;  %v4357_v30 = vld [vmem:[#allocation3 + $0x60] sm:$0xff]  ;;  %v4355_v29 = vld [vmem:[#allocation3 + $0x50] sm:$0xff] }
 0x407   : > { %v4385_v24 = vpack.c.bf16 %v4354_v10, %v4353_v44  ;;  %v4358_v36 = vld [vmem:[#allocation3 + $0x68] sm:$0xff]  ;;  %v4363_v3 = vld [vmem:[#allocation3 + $0x90] sm:$0xff] }
 0x408   : > { %9045 = vmatmul.mubr.msk.bf16.gmra.mrb[28].mxu1 %vm852_vm0, %v4454_v35  ;;  %v4387_v35 = vpack.c.bf16 %v4358_v36, %v4357_v30  ;;  %v4366_v61 = vld [vmem:[#allocation3 + $0xa8] sm:$0xff]  ;;  %v4367_v44 = vld [vmem:[#allocation3 + $0xb0] sm:$0xff] }
 0x409   : > { %9048 = vmatprep.mubr.msk.bf16.mxu1 %vm852_vm0, %v4455_v33  ;;  %v4360_v33 = vld [vmem:[#allocation3 + $0x78] sm:$0xff]  ;;  %v4370_v15 = vld [vmem:[#allocation3 + $0xc8] sm:$0xff]  ;;  %v4371_v30 = vld [vmem:[#allocation3 + $0xd0] sm:$0xff] }
 0x40b   : > { %v4437_v56 = vld [vmem:[#allocation3 + $0x111] sm:$0xff] }
 0x40d   : > { %v4438_v52 = vld [vmem:[#allocation3 + $0x119] sm:$0xff] }
 0x40e   : > { %v4456_v63 = vpack.c.bf16 %v4438_v52, %v4437_v56  ;;  %v4359_v56 = vld [vmem:[#allocation3 + $0x70] sm:$0xff] }
 0x40f   : > { %v4388_v52 = vpack.c.bf16 %v4360_v33, %v4359_v56  ;;  %v4378_v33 = vld [vmem:[#allocation3 + $0x108] sm:$0xff] }
 0x410   : > { %9049 = vmatmul.mubr.msk.bf16.gmra.mrb[32].mxu1 %vm852_vm0, %v4456_v63  ;;  %v4364_v63 = vld [vmem:[#allocation3 + $0x98] sm:$0xff] }
 0x411   : > { %9056 = vmatprep.mubr.msk.bf16.mxu1 %vm852_vm0, %v4381_v62  ;;  %v4389_v62 = vpack.c.bf16 %v4362_v55, %v4361_v37  ;;  %v4390_v7 = vpack.c.bf16 %v4364_v63, %v4363_v3  ;;  %v4375_v37 = vld [vmem:[#allocation3 + $0xf0] sm:$0xff]  ;;  %v4380_v63 = vld [vmem:[#allocation3 + $0x118] sm:$0xff] }
 0x418   : > { %9057 = vmatmul.mubr.msk.bf16.vlgmr.msra.gmra.mrb[0].mxu1 %vm852_vm0, %v4382_v50  ;;  %v4391_v50 = vpack.c.bf16 %v4366_v61, %v4365_v60  ;;  %v4379_v60 = vld [vmem:[#allocation3 + $0x110] sm:$0xff] }
 0x419   : > { %9093 = vmatpush3.bf16.msra.mxu1 %v10964_v32  ;;  %9060 = vmatprep.mubr.msk.bf16.mxu1 %vm852_vm0, %v4383_v13  ;;  %v4356_v32 = vld [vmem:[#allocation3 + $0x58] sm:$0xff]  ;;  %v4369_v13 = vld [vmem:[#allocation3 + $0xc0] sm:$0xff]  ;;  %v4398_v3 = vpack.c.bf16 %v4380_v63, %v4379_v60 }
 0x41a   : > { %9094 = vmatprep.subr.bf16.mxu1 %v9985_v4  ;;  %v4386_v31 = vpack.c.bf16 %v4356_v32, %v4355_v29  ;;  %v4393_v20 = vpack.c.bf16 %v4370_v15, %v4369_v13  ;;  %v4374_v32 = vld [vmem:[#allocation3 + $0xe8] sm:$0xff]  ;;  %v4950_v13 = vld [vmem:[#allocation3 + $0x12] sm:$0xff] }
 0x41b   : > { %v4962_v63 = vld [vmem:[#allocation3 + $0x72] sm:$0xff] }
 0x41d   : > { %9095 = vmatpush3.bf16.msra.mxu1 %v9985_v4  ;;  %v4368_v4 = vld [vmem:[#allocation3 + $0xb8] sm:$0xff] }
 0x41e   : > { %9132 = vmatprep.subr.bf16.mxu1 %v11149_v14  ;;  %v4392_v10 = vpack.c.bf16 %v4368_v4, %v4367_v44  ;;  %v4953_v4 = vld [vmem:[#allocation3 + $0x2a] sm:$0xff] }
 0x41f   : > { %v9987_v44 = vld [vmem:[%s12157_s3 + $0x38] sm:$0xff]  }
 0x420   : > { %9061 = vmatmul.mubr.msk.bf16.gmra.mrb[4].mxu1 %vm852_vm0, %v4384_v23  ;;  %v4372_v23 = vld [vmem:[#allocation3 + $0xd8] sm:$0xff] }
 0x421   : > { %9064 = vmatprep.mubr.msk.bf16.mxu1 %vm852_vm0, %v4385_v24  ;;  %v4373_v24 = vld [vmem:[#allocation3 + $0xe0] sm:$0xff]  ;;  %v4394_v36 = vpack.c.bf16 %v4372_v23, %v4371_v30  ;;  %v4954_v30 = vld [vmem:[#allocation3 + $0x32] sm:$0xff] }
 0x422   : > { %v4395_v29 = vpack.c.bf16 %v4374_v32, %v4373_v24  ;;  %v4955_v23 = vld [vmem:[#allocation3 + $0x3a] sm:$0xff]  ;;  %v4956_v24 = vld [vmem:[#allocation3 + $0x42] sm:$0xff]  ;;  %v4957_v32 = vld [vmem:[#allocation3 + $0x4a] sm:$0xff] }
 0x428   : > { %9065 = vmatmul.mubr.msk.bf16.gmra.mrb[8].mxu1 %vm852_vm0, %v4386_v31  ;;  %v4376_v31 = vld [vmem:[#allocation3 + $0xf8] sm:$0xff] }
 0x429   : > { %9068 = vmatprep.mubr.msk.bf16.mxu1 %vm852_vm0, %v4387_v35  ;;  %v4377_v35 = vld [vmem:[#allocation3 + $0x100] sm:$0xff]  ;;  %v4396_v55 = vpack.c.bf16 %v4376_v31, %v4375_v37 }
 0x42a   : > { %v4397_v56 = vpack.c.bf16 %v4378_v33, %v4377_v35  ;;  %v4960_v31 = vld [vmem:[#allocation3 + $0x62] sm:$0xff]  ;;  %v4961_v35 = vld [vmem:[#allocation3 + $0x6a] sm:$0xff]  ;;  %v4958_v33 = vld [vmem:[#allocation3 + $0x52] sm:$0xff] }
 0x430   : > { %9069 = vmatmul.mubr.msk.bf16.gmra.mrb[12].mxu1 %vm852_vm0, %v4388_v52  ;;  %v4948_v52 = vld [vmem:[#allocation3 + $0x2] sm:$0xff] }
 0x431   : > { %9072 = vmatprep.mubr.msk.bf16.mxu1 %vm852_vm0, %v4389_v62  ;;  %v4949_v62 = vld [vmem:[#allocation3 + $0xa] sm:$0xff] }
 0x432   : > { %v4984_v61 = vpack.c.bf16 %v4949_v62, %v4948_v52  ;;  %v4964_v52 = vld [vmem:[#allocation3 + $0x82] sm:$0xff]  ;;  %v4965_v62 = vld [vmem:[#allocation3 + $0x8a] sm:$0xff] }
 0x438   : > { %9073 = vmatmul.mubr.msk.bf16.gmra.mrb[16].mxu1 %vm852_vm0, %v4390_v7  ;;  %v4951_v7 = vld [vmem:[#allocation3 + $0x1a] sm:$0xff] }
 0x439   : > { %9076 = vmatprep.mubr.msk.bf16.mxu1 %vm852_vm0, %v4391_v50  ;;  %v4952_v50 = vld [vmem:[#allocation3 + $0x22] sm:$0xff]  ;;  %v11168_v15 = vpack.c.bf16 %v4951_v7, %v4950_v13 }
 0x43a   : > { %v4968_v7 = vld [vmem:[#allocation3 + $0xa2] sm:$0xff] }
 0x440   : > { %9077 = vmatmul.mubr.msk.bf16.gmra.mrb[20].mxu1 %vm852_vm0, %v4392_v10  ;;  %v11173_v10 = vpack.c.bf16 %v4953_v4, %v4952_v50  ;;  %v4969_v50 = vld [vmem:[#allocation3 + $0xaa] sm:$0xff]  ;;  %v4966_v4 = vld [vmem:[#allocation3 + $0x92] sm:$0xff] }
 0x441   : > { %9080 = vmatprep.mubr.msk.bf16.mxu1 %vm852_vm0, %v4393_v20  ;;  %v11183_v20 = vld [vmem:[%s12157_s3 + $0x40] sm:$0xff]  }
 0x448   : > { %9081 = vmatmul.mubr.msk.bf16.gmra.mrb[24].mxu1 %vm852_vm0, %v4394_v36  ;;  %v4987_v36 = vpack.c.bf16 %v4955_v23, %v4954_v30  ;;  %v4971_v23 = vld [vmem:[#allocation3 + $0xba] sm:$0xff]  ;;  %v4970_v30 = vld [vmem:[#allocation3 + $0xb2] sm:$0xff] }
 0x449   : > { %9084 = vmatprep.mubr.msk.bf16.mxu1 %vm852_vm0, %v4395_v29  ;;  %v11186_v29 = vpack.c.bf16 %v4957_v32, %v4956_v24  ;;  %v4972_v24 = vld [vmem:[#allocation3 + $0xc2] sm:$0xff]  ;;  %v4973_v32 = vld [vmem:[#allocation3 + $0xca] sm:$0xff] }
 0x450   : > { %9085 = vmatmul.mubr.msk.bf16.gmra.mrb[28].mxu1 %vm852_vm0, %v4396_v55  ;;  %v4990_v55 = vpack.c.bf16 %v4961_v35, %v4960_v31  ;;  %v4996_v31 = vpack.c.bf16 %v4973_v32, %v4972_v24  ;;  %v4975_v35 = vld [vmem:[#allocation3 + $0xda] sm:$0xff] }
 0x451   : > { %9088 = vmatprep.mubr.msk.bf16.mxu1 %vm852_vm0, %v4397_v56  ;;  %v4963_v56 = vld [vmem:[#allocation3 + $0x7a] sm:$0xff] }
 0x452   : > { %v4991_v60 = vpack.c.bf16 %v4963_v56, %v4962_v63  ;;  %v4977_v56 = vld [vmem:[#allocation3 + $0xea] sm:$0xff]  ;;  %v4983_v32 = vld [vmem:[#allocation3 + $0x11a] sm:$0xff] }
 0x458   : > { %9089 = vmatmul.mubr.msk.bf16.gmra.mrb[32].mxu1 %vm852_vm0, %v4398_v3  ;;  %v4967_v3 = vld [vmem:[#allocation3 + $0x9a] sm:$0xff] }
 0x459   : > { %9096 = vmatprep.mubr.msk.bf16.mxu1 %vm852_vm0, %v4984_v61  ;;  %v4992_v61 = vpack.c.bf16 %v4965_v62, %v4964_v52  ;;  %v4993_v13 = vpack.c.bf16 %v4967_v3, %v4966_v4  ;;  %v4974_v52 = vld [vmem:[#allocation3 + $0xd2] sm:$0xff]  ;;  %v4979_v3 = vld [vmem:[#allocation3 + $0xfa] sm:$0xff] }
 0x45a   : > { %v4997_v62 = vpack.c.bf16 %v4975_v35, %v4974_v52  ;;  %v4978_v4 = vld [vmem:[#allocation3 + $0xf2] sm:$0xff]  ;;  %v9989_v35 = vld [vmem:[%s12157_s3 + $0x48] sm:$0xff]  }
 0x45b   : > { %v5633_v52 = vld [vmem:[#allocation3 + $0x5b] sm:$0xff] }
 0x460   : > { %9097 = vmatmul.mubr.msk.bf16.vlgmr.msra.gmra.mrb[0].mxu1 %vm852_vm0, %v11168_v15 }
 0x461   : > { %9133 = vmatpush3.bf16.msra.mxu1 %v11149_v14  ;;  %9100 = vmatprep.mubr.msk.bf16.mxu1 %vm852_vm0, %v11173_v10  ;;  %v4959_v14 = vld [vmem:[#allocation3 + $0x5a] sm:$0xff] }
 0x462   : > { %9134 = vmatprep.subr.bf16.mxu1 %v9987_v44  ;;  %v4989_v37 = vpack.c.bf16 %v4959_v14, %v4958_v33  ;;  %v4995_v14 = vpack.c.bf16 %v4971_v23, %v4970_v30  ;;  %v4976_v33 = vld [vmem:[#allocation3 + $0xe2] sm:$0xff]  ;;  %v4999_v23 = vpack.c.bf16 %v4979_v3, %v4978_v4  ;;  %v4982_v30 = vld [vmem:[#allocation3 + $0x112] sm:$0xff] }
 0x463   : > { %v4998_v63 = vpack.c.bf16 %v4977_v56, %v4976_v33  ;;  %v5001_v57 = vpack.c.bf16 %v4983_v32, %v4982_v30  ;;  %v9990_v33 = vld [vmem:[%s12157_s3 + $0x50] sm:$0xff]   ;;  %v5632_v3 = vld [vmem:[#allocation3 + $0x53] sm:$0xff]  ;;  %v5637_v4 = vld [vmem:[#allocation3 + $0x7b] sm:$0xff] }
 0x464   : > { %v5631_v56 = vld [vmem:[#allocation3 + $0x4b] sm:$0xff]  ;;  %v5636_v32 = vld [vmem:[#allocation3 + $0x73] sm:$0xff] }
 0x465   : > { %9135 = vmatpush3.bf16.msra.mxu1 %v9987_v44  ;;  %v4994_v44 = vpack.c.bf16 %v4969_v50, %v4968_v7  ;;  %v4980_v7 = vld [vmem:[#allocation3 + $0x102] sm:$0xff]  ;;  %v4981_v50 = vld [vmem:[#allocation3 + $0x10a] sm:$0xff]  ;;  %v5666_v30 = vpack.c.bf16 %v5637_v4, %v5636_v32  ;;  %v5652_v4 = vld [vmem:[#allocation3 + $0xf3] sm:$0xff] }
 0x466   : > { %9172 = vmatprep.subr.bf16.mxu1 %v11183_v20  ;;  %v5000_v24 = vpack.c.bf16 %v4981_v50, %v4980_v7  ;;  %v5664_v7 = vpack.c.bf16 %v5633_v52, %v5632_v3  ;;  %v5635_v50 = vld [vmem:[#allocation3 + $0x6b] sm:$0xff]  ;;  %v5648_v52 = vld [vmem:[#allocation3 + $0xd3] sm:$0xff]  ;;  %v5653_v3 = vld [vmem:[#allocation3 + $0xfb] sm:$0xff] }
 0x467   : > { %v5657_v32 = vld [vmem:[#allocation3 + $0x11b] sm:$0xff] }
 0x468   : > { %9101 = vmatmul.mubr.msk.bf16.gmra.mrb[4].mxu1 %vm852_vm0, %v4987_v36 }
 0x469   : > { %9104 = vmatprep.mubr.msk.bf16.mxu1 %vm852_vm0, %v11186_v29 }
 0x470   : > { %9105 = vmatmul.mubr.msk.bf16.gmra.mrb[8].mxu1 %vm852_vm0, %v4989_v37 }
 0x471   : > { %9108 = vmatprep.mubr.msk.bf16.mxu1 %vm852_vm0, %v4990_v55 }
 0x478   : > { %9109 = vmatmul.mubr.msk.bf16.gmra.mrb[12].mxu1 %vm852_vm0, %v4991_v60 }
 0x479   : > { %9112 = vmatprep.mubr.msk.bf16.mxu1 %vm852_vm0, %v4992_v61 }
 0x480   : > { %9113 = vmatmul.mubr.msk.bf16.gmra.mrb[16].mxu1 %vm852_vm0, %v4993_v13 }
 0x481   : > { %9116 = vmatprep.mubr.msk.bf16.mxu1 %vm852_vm0, %v4994_v44 }
 0x488   : > { %9117 = vmatmul.mubr.msk.bf16.gmra.mrb[20].mxu1 %vm852_vm0, %v4995_v14 }
 0x489   : > { %9120 = vmatprep.mubr.msk.bf16.mxu1 %vm852_vm0, %v4996_v31 }
 0x490   : > { %9121 = vmatmul.mubr.msk.bf16.gmra.mrb[24].mxu1 %vm852_vm0, %v4997_v62 }
 0x491   : > { %9124 = vmatprep.mubr.msk.bf16.mxu1 %vm852_vm0, %v4998_v63 }
 0x498   : > { %9125 = vmatmul.mubr.msk.bf16.gmra.mrb[28].mxu1 %vm852_vm0, %v4999_v23 }
 0x499   : > { %9128 = vmatprep.mubr.msk.bf16.mxu1 %vm852_vm0, %v5000_v24 }
 0x4a0   : > { %9129 = vmatmul.mubr.msk.bf16.gmra.mrb[32].mxu1 %vm852_vm0, %v5001_v57 }
 0x4a1   : > { %9136 = vmatprep.mubr.msk.bf16.mxu1 %vm852_vm0, %v11168_v15  ;;  %v5320_v15 = vld [vmem:[#allocation3 + $0x122] sm:$0xff] }
 0x4a8   : > { %9137 = vmatmul.mubr.msk.bf16.vlgmr.msra.gmra.mrb[0].mxu1 %vm852_vm0, %v11173_v10  ;;  %v5321_v10 = vld [vmem:[#allocation3 + $0x12a] sm:$0xff] }
 0x4a9   : > { %9173 = vmatpush3.bf16.msra.mxu1 %v11183_v20  ;;  %9140 = vmatprep.mubr.msk.bf16.mxu1 %vm852_vm0, %v4987_v36  ;;  %v5625_v20 = vld [vmem:[#allocation3 + $0x1b] sm:$0xff]  ;;  %v5339_v36 = vpack.c.bf16 %v5321_v10, %v5320_v15  ;;  %v5638_v15 = vld [vmem:[#allocation3 + $0x83] sm:$0xff] }
 0x4aa   : > { %9174 = vmatprep.subr.bf16.mxu1 %v9989_v35 }
 0x4ad   : > { %9175 = vmatpush3.bf16.msra.mxu1 %v9989_v35  ;;  %v5639_v35 = vld [vmem:[#allocation3 + $0x8b] sm:$0xff] }
 0x4ae   : > { %9212 = vmatprep.subr.bf16.mxu1 %v9990_v33  ;;  %v5667_v10 = vpack.c.bf16 %v5639_v35, %v5638_v15 }
 0x4b0   : > { %9141 = vmatmul.mubr.msk.bf16.gmra.mrb[4].mxu1 %vm852_vm0, %v11186_v29  ;;  %v5624_v29 = vld [vmem:[#allocation3 + $0x13] sm:$0xff] }
 0x4b1   : > { %9144 = vmatprep.mubr.msk.bf16.mxu1 %vm852_vm0, %v4989_v37  ;;  %v5660_v37 = vpack.c.bf16 %v5625_v20, %v5624_v29  ;;  %v5640_v20 = vld [vmem:[#allocation3 + $0x93] sm:$0xff]  ;;  %v5643_v29 = vld [vmem:[#allocation3 + $0xab] sm:$0xff] }
 0x4b8   : > { %9145 = vmatmul.mubr.msk.bf16.gmra.mrb[8].mxu1 %vm852_vm0, %v4990_v55  ;;  %v5627_v55 = vld [vmem:[#allocation3 + $0x2b] sm:$0xff] }
 0x4b9   : > { %9148 = vmatprep.mubr.msk.bf16.mxu1 %vm852_vm0, %v4991_v60  ;;  %v5629_v60 = vld [vmem:[#allocation3 + $0x3b] sm:$0xff] }
 0x4c0   : > { %9149 = vmatmul.mubr.msk.bf16.gmra.mrb[12].mxu1 %vm852_vm0, %v4992_v61  ;;  %v5626_v61 = vld [vmem:[#allocation3 + $0x23] sm:$0xff] }
 0x4c1   : > { %9152 = vmatprep.mubr.msk.bf16.mxu1 %vm852_vm0, %v4993_v13  ;;  %v5661_v13 = vpack.c.bf16 %v5627_v55, %v5626_v61  ;;  %v5642_v55 = vld [vmem:[#allocation3 + $0xa3] sm:$0xff]  ;;  %v5644_v61 = vld [vmem:[#allocation3 + $0xb3] sm:$0xff] }
 0x4c8   : > { %9153 = vmatmul.mubr.msk.bf16.gmra.mrb[16].mxu1 %vm852_vm0, %v4994_v44  ;;  %v5628_v44 = vld [vmem:[#allocation3 + $0x33] sm:$0xff] }
 0x4c9   : > { %9156 = vmatprep.mubr.msk.bf16.mxu1 %vm852_vm0, %v4995_v14  ;;  %v9991_v14 = vld [vmem:[%s12157_s3 + $0x58] sm:$0xff]  }
 0x4d0   : > { %9157 = vmatmul.mubr.msk.bf16.gmra.mrb[20].mxu1 %vm852_vm0, %v4996_v31  ;;  %v11241_v31 = vld [vmem:[%s12157_s3 + $0x60] sm:$0xff]  }
 0x4d1   : > { %9160 = vmatprep.mubr.msk.bf16.mxu1 %vm852_vm0, %v4997_v62  ;;  %v5630_v62 = vld [vmem:[#allocation3 + $0x43] sm:$0xff] }
 0x4d8   : > { %9161 = vmatmul.mubr.msk.bf16.gmra.mrb[24].mxu1 %vm852_vm0, %v4998_v63  ;;  %v5663_v63 = vpack.c.bf16 %v5631_v56, %v5630_v62 }
 0x4d9   : > { %9164 = vmatprep.mubr.msk.bf16.mxu1 %vm852_vm0, %v4999_v23  ;;  %v5634_v23 = vld [vmem:[#allocation3 + $0x63] sm:$0xff] }
 0x4e0   : > { %9165 = vmatmul.mubr.msk.bf16.gmra.mrb[28].mxu1 %vm852_vm0, %v5000_v24  ;;  %v5665_v24 = vpack.c.bf16 %v5635_v50, %v5634_v23  ;;  %v5674_v23 = vpack.c.bf16 %v5653_v3, %v5652_v4  ;;  %v5971_v3 = vld [vmem:[#allocation3 + $0x5c] sm:$0xff] }
 0x4e1   : > { %9168 = vmatprep.mubr.msk.bf16.mxu1 %vm852_vm0, %v5001_v57  ;;  %v5662_v57 = vpack.c.bf16 %v5629_v60, %v5628_v44  ;;  %v5669_v60 = vpack.c.bf16 %v5643_v29, %v5642_v55  ;;  %v5647_v44 = vld [vmem:[#allocation3 + $0xcb] sm:$0xff]  ;;  %v5658_v29 = vld [vmem:[#allocation3 + $0x123] sm:$0xff] }
 0x4e8   : > { %9169 = vmatmul.mubr.msk.bf16.gmra.mrb[32].mxu1 %vm852_vm0, %v5339_v36 }
 0x4e9   : > { %9176 = vmatprep.mubr.msk.bf16.mxu1 %vm852_vm0, %v5660_v37  ;;  %v5645_v37 = vld [vmem:[#allocation3 + $0xbb] sm:$0xff] }
 0x4f0   : > { %9177 = vmatmul.mubr.msk.bf16.vlgmr.msra.gmra.mrb[0].mxu1 %vm852_vm0, %v5661_v13  ;;  %v5670_v13 = vpack.c.bf16 %v5645_v37, %v5644_v61  ;;  %v5966_v61 = vld [vmem:[#allocation3 + $0x34] sm:$0xff] }
 0x4f1   : > { %9213 = vmatpush3.bf16.msra.mxu1 %v9990_v33  ;;  %9180 = vmatprep.mubr.msk.bf16.mxu1 %vm852_vm0, %v5662_v57  ;;  %v5641_v33 = vld [vmem:[#allocation3 + $0x9b] sm:$0xff]  ;;  %v5646_v57 = vld [vmem:[#allocation3 + $0xc3] sm:$0xff] }
 0x4f2   : > { %9214 = vmatprep.subr.bf16.mxu1 %v9991_v14  ;;  %v5668_v36 = vpack.c.bf16 %v5641_v33, %v5640_v20  ;;  %v5671_v56 = vpack.c.bf16 %v5647_v44, %v5646_v57  ;;  %v5656_v33 = vld [vmem:[#allocation3 + $0x113] sm:$0xff]  ;;  %v5964_v44 = vld [vmem:[#allocation3 + $0x24] sm:$0xff] }
 0x4f3   : > { %v5676_v15 = vpack.c.bf16 %v5657_v32, %v5656_v33  ;;  %v5962_v20 = vld [vmem:[#allocation3 + $0x14] sm:$0xff]  ;;  %v9993_v57 = vld [vmem:[%s12157_s3 + $0x68] sm:$0xff]   ;;  %v5977_v33 = vld [vmem:[#allocation3 + $0x8c] sm:$0xff] }
 0x4f4   : > { %v5972_v32 = vld [vmem:[#allocation3 + $0x64] sm:$0xff] }
 0x4f5   : > { %9215 = vmatpush3.bf16.msra.mxu1 %v9991_v14  ;;  %v5649_v14 = vld [vmem:[#allocation3 + $0xdb] sm:$0xff] }
 0x4f6   : > { %9252 = vmatprep.subr.bf16.mxu1 %v11241_v31  ;;  %v5672_v62 = vpack.c.bf16 %v5649_v14, %v5648_v52  ;;  %v11275_v52 = vld [vmem:[%s12157_s3 + $0x70] sm:$0xff]  }
 0x4f8   : > { %9181 = vmatmul.mubr.msk.bf16.gmra.mrb[4].mxu1 %vm852_vm0, %v5663_v63  ;;  %v5651_v63 = vld [vmem:[#allocation3 + $0xeb] sm:$0xff] }
 0x4f9   : > { %9184 = vmatprep.mubr.msk.bf16.mxu1 %vm852_vm0, %v5664_v7  ;;  %v5650_v7 = vld [vmem:[#allocation3 + $0xe3] sm:$0xff] }
 0x4fa   : > { %v5673_v50 = vpack.c.bf16 %v5651_v63, %v5650_v7  ;;  %v5970_v63 = vld [vmem:[#allocation3 + $0x54] sm:$0xff]  ;;  %v5968_v7 = vld [vmem:[#allocation3 + $0x44] sm:$0xff] }
 0x4fb   : > { %v11278_v4 = vpack.c.bf16 %v5971_v3, %v5970_v63  ;;  %v5987_v63 = vld [vmem:[#allocation3 + $0xdc] sm:$0xff]  ;;  %v5984_v3 = vld [vmem:[#allocation3 + $0xc4] sm:$0xff] }
 0x500   : > { %9185 = vmatmul.mubr.msk.bf16.gmra.mrb[8].mxu1 %vm852_vm0, %v5665_v24  ;;  %v5655_v24 = vld [vmem:[#allocation3 + $0x10b] sm:$0xff] }
 0x501   : > { %9188 = vmatprep.mubr.msk.bf16.mxu1 %vm852_vm0, %v5666_v30  ;;  %v5654_v30 = vld [vmem:[#allocation3 + $0x103] sm:$0xff] }
 0x502   : > { %v5675_v35 = vpack.c.bf16 %v5655_v24, %v5654_v30  ;;  %v5975_v24 = vld [vmem:[#allocation3 + $0x7c] sm:$0xff] }
 0x508   : > { %9189 = vmatmul.mubr.msk.bf16.gmra.mrb[12].mxu1 %vm852_vm0, %v5667_v10  ;;  %v5659_v10 = vld [vmem:[#allocation3 + $0x12b] sm:$0xff] }
 0x509   : > { %9192 = vmatprep.mubr.msk.bf16.mxu1 %vm852_vm0, %v5668_v36  ;;  %v5963_v36 = vld [vmem:[#allocation3 + $0x1c] sm:$0xff]  ;;  %v5677_v37 = vpack.c.bf16 %v5659_v10, %v5658_v29 }
 0x50a   : > { %v5998_v55 = vpack.c.bf16 %v5963_v36, %v5962_v20  ;;  %v5979_v10 = vld [vmem:[#allocation3 + $0x9c] sm:$0xff]  ;;  %v5976_v20 = vld [vmem:[#allocation3 + $0x84] sm:$0xff] }
 0x50b   : > { %v6005_v36 = vpack.c.bf16 %v5977_v33, %v5976_v20  ;;  %v5988_v33 = vld [vmem:[#allocation3 + $0xe4] sm:$0xff]  ;;  %v5993_v20 = vld [vmem:[#allocation3 + $0x10c] sm:$0xff] }
 0x510   : > { %9193 = vmatmul.mubr.msk.bf16.gmra.mrb[16].mxu1 %vm852_vm0, %v5669_v60  ;;  %v5965_v60 = vld [vmem:[#allocation3 + $0x2c] sm:$0xff] }
 0x511   : > { %9196 = vmatprep.mubr.msk.bf16.mxu1 %vm852_vm0, %v5670_v13  ;;  %v5967_v13 = vld [vmem:[#allocation3 + $0x3c] sm:$0xff]  ;;  %v11260_v14 = vpack.c.bf16 %v5965_v60, %v5964_v44 }
 0x512   : > { %v5983_v60 = vld [vmem:[#allocation3 + $0xbc] sm:$0xff] }
 0x518   : > { %9197 = vmatmul.mubr.msk.bf16.gmra.mrb[20].mxu1 %vm852_vm0, %v5671_v56  ;;  %v11265_v56 = vpack.c.bf16 %v5967_v13, %v5966_v61  ;;  %v5980_v61 = vld [vmem:[#allocation3 + $0xa4] sm:$0xff] }
 0x519   : > { %9200 = vmatprep.mubr.msk.bf16.mxu1 %vm852_vm0, %v5672_v62  ;;  %v5969_v62 = vld [vmem:[#allocation3 + $0x4c] sm:$0xff] }
 0x520   : > { %9201 = vmatmul.mubr.msk.bf16.gmra.mrb[24].mxu1 %vm852_vm0, %v5673_v50  ;;  %v6001_v50 = vpack.c.bf16 %v5969_v62, %v5968_v7  ;;  %v5986_v62 = vld [vmem:[#allocation3 + $0xd4] sm:$0xff] }
 0x521   : > { %9204 = vmatprep.mubr.msk.bf16.mxu1 %vm852_vm0, %v5674_v23  ;;  %v5974_v23 = vld [vmem:[#allocation3 + $0x74] sm:$0xff] }
 0x528   : > { %9205 = vmatmul.mubr.msk.bf16.gmra.mrb[28].mxu1 %vm852_vm0, %v5675_v35  ;;  %v6004_v35 = vpack.c.bf16 %v5975_v24, %v5974_v23  ;;  %v5989_v23 = vld [vmem:[#allocation3 + $0xec] sm:$0xff]  ;;  %v5990_v24 = vld [vmem:[#allocation3 + $0xf4] sm:$0xff] }
 0x529   : > { %9208 = vmatprep.mubr.msk.bf16.mxu1 %vm852_vm0, %v5676_v15  ;;  %v5978_v15 = vld [vmem:[#allocation3 + $0x94] sm:$0xff] }
 0x52a   : > { %v6006_v29 = vpack.c.bf16 %v5979_v10, %v5978_v15  ;;  %v6011_v15 = vpack.c.bf16 %v5989_v23, %v5988_v33  ;;  %v9995_v23 = vld [vmem:[%s12157_s3 + $0x78] sm:$0xff]   ;;  %v6645_v33 = vld [vmem:[#allocation3 + $0x5d] sm:$0xff] }
 0x530   : > { %9209 = vmatmul.mubr.msk.bf16.gmra.mrb[32].mxu1 %vm852_vm0, %v5677_v37  ;;  %v5981_v37 = vld [vmem:[#allocation3 + $0xac] sm:$0xff] }
 0x531   : > { %9216 = vmatprep.mubr.msk.bf16.mxu1 %vm852_vm0, %v5998_v55  ;;  %v5982_v55 = vld [vmem:[#allocation3 + $0xb4] sm:$0xff]  ;;  %v6007_v13 = vpack.c.bf16 %v5981_v37, %v5980_v61 }
 0x532   : > { %v6008_v44 = vpack.c.bf16 %v5983_v60, %v5982_v55  ;;  %v5994_v37 = vld [vmem:[#allocation3 + $0x114] sm:$0xff]  ;;  %v5995_v55 = vld [vmem:[#allocation3 + $0x11c] sm:$0xff]  ;;  %v5992_v60 = vld [vmem:[#allocation3 + $0x104] sm:$0xff] }
 0x533   : > { %v6013_v61 = vpack.c.bf16 %v5993_v20, %v5992_v60  ;;  %v6646_v20 = vld [vmem:[#allocation3 + $0x65] sm:$0xff]  ;;  %v6649_v60 = vld [vmem:[#allocation3 + $0x7d] sm:$0xff] }
 0x538   : > { %9217 = vmatmul.mubr.msk.bf16.vlgmr.msra.gmra.mrb[0].mxu1 %vm852_vm0, %v11260_v14 }
 0x539   : > { %9253 = vmatpush3.bf16.msra.mxu1 %v11241_v31  ;;  %9220 = vmatprep.mubr.msk.bf16.mxu1 %vm852_vm0, %v11265_v56  ;;  %v5973_v31 = vld [vmem:[#allocation3 + $0x6c] sm:$0xff] }
 0x53a   : > { %9254 = vmatprep.subr.bf16.mxu1 %v9993_v57  ;;  %v6003_v30 = vpack.c.bf16 %v5973_v31, %v5972_v32  ;;  %v6010_v31 = vpack.c.bf16 %v5987_v63, %v5986_v62  ;;  %v5991_v32 = vld [vmem:[#allocation3 + $0xfc] sm:$0xff]  ;;  %v5996_v62 = vld [vmem:[#allocation3 + $0x124] sm:$0xff]  ;;  %v5997_v63 = vld [vmem:[#allocation3 + $0x12c] sm:$0xff] }
 0x53b   : > { %v6012_v10 = vpack.c.bf16 %v5991_v32, %v5990_v24  ;;  %v9996_v24 = vld [vmem:[%s12157_s3 + $0x80] sm:$0xff]  }
 0x53c   : > { %v6644_v32 = vld [vmem:[#allocation3 + $0x55] sm:$0xff] }
 0x53d   : > { %9255 = vmatpush3.bf16.msra.mxu1 %v9993_v57  ;;  %v5985_v57 = vld [vmem:[#allocation3 + $0xcc] sm:$0xff] }
 0x53e   : > { %9292 = vmatprep.subr.bf16.mxu1 %v11275_v52  ;;  %v6009_v7 = vpack.c.bf16 %v5985_v57, %v5984_v3  ;;  %v6014_v57 = vpack.c.bf16 %v5995_v55, %v5994_v37  ;;  %v6015_v3 = vpack.c.bf16 %v5997_v63, %v5996_v62  ;;  %v6648_v55 = vld [vmem:[#allocation3 + $0x75] sm:$0xff]  ;;  %v6650_v62 = vld [vmem:[#allocation3 + $0x85] sm:$0xff] }
 0x540   : > { %9221 = vmatmul.mubr.msk.bf16.gmra.mrb[4].mxu1 %vm852_vm0, %v6001_v50 }
 0x541   : > { %9224 = vmatprep.mubr.msk.bf16.mxu1 %vm852_vm0, %v11278_v4 }
 0x548   : > { %9225 = vmatmul.mubr.msk.bf16.gmra.mrb[8].mxu1 %vm852_vm0, %v6003_v30 }
 0x549   : > { %9228 = vmatprep.mubr.msk.bf16.mxu1 %vm852_vm0, %v6004_v35 }
 0x550   : > { %9229 = vmatmul.mubr.msk.bf16.gmra.mrb[12].mxu1 %vm852_vm0, %v6005_v36 }
 0x551   : > { %9232 = vmatprep.mubr.msk.bf16.mxu1 %vm852_vm0, %v6006_v29 }
 0x558   : > { %9233 = vmatmul.mubr.msk.bf16.gmra.mrb[16].mxu1 %vm852_vm0, %v6007_v13 }
 0x559   : > { %9236 = vmatprep.mubr.msk.bf16.mxu1 %vm852_vm0, %v6008_v44 }
 0x560   : > { %9237 = vmatmul.mubr.msk.bf16.gmra.mrb[20].mxu1 %vm852_vm0, %v6009_v7 }
 0x561   : > { %9240 = vmatprep.mubr.msk.bf16.mxu1 %vm852_vm0, %v6010_v31 }
 0x568   : > { %9241 = vmatmul.mubr.msk.bf16.gmra.mrb[24].mxu1 %vm852_vm0, %v6011_v15 }
 0x569   : > { %9244 = vmatprep.mubr.msk.bf16.mxu1 %vm852_vm0, %v6012_v10 }
 0x570   : > { %9245 = vmatmul.mubr.msk.bf16.gmra.mrb[28].mxu1 %vm852_vm0, %v6013_v61 }
 0x571   : > { %9248 = vmatprep.mubr.msk.bf16.mxu1 %vm852_vm0, %v6014_v57 }
 0x578   : > { %9249 = vmatmul.mubr.msk.bf16.gmra.mrb[32].mxu1 %vm852_vm0, %v6015_v3 }
 0x579   : > { %9256 = vmatprep.mubr.msk.bf16.mxu1 %vm852_vm0, %v11260_v14  ;;  %v6334_v14 = vld [vmem:[#allocation3 + $0x134] sm:$0xff] }
 0x580   : > { %9257 = vmatmul.mubr.msk.bf16.vlgmr.msra.gmra.mrb[0].mxu1 %vm852_vm0, %v11265_v56  ;;  %v6335_v56 = vld [vmem:[#allocation3 + $0x13c] sm:$0xff] }
 0x581   : > { %9293 = vmatpush3.bf16.msra.mxu1 %v11275_v52  ;;  %9260 = vmatprep.mubr.msk.bf16.mxu1 %vm852_vm0, %v6001_v50  ;;  %v6353_v52 = vpack.c.bf16 %v6335_v56, %v6334_v14  ;;  %v6639_v50 = vld [vmem:[#allocation3 + $0x2d] sm:$0xff]  ;;  %v6654_v56 = vld [vmem:[#allocation3 + $0xa5] sm:$0xff] }
 0x582   : > { %9294 = vmatprep.subr.bf16.mxu1 %v9995_v23 }
 0x585   : > { %9295 = vmatpush3.bf16.msra.mxu1 %v9995_v23  ;;  %v6653_v23 = vld [vmem:[#allocation3 + $0x9d] sm:$0xff] }
 0x586   : > { %9332 = vmatprep.subr.bf16.mxu1 %v9996_v24 }
 0x588   : > { %9261 = vmatmul.mubr.msk.bf16.gmra.mrb[4].mxu1 %vm852_vm0, %v11278_v4  ;;  %v6638_v4 = vld [vmem:[#allocation3 + $0x25] sm:$0xff] }
 0x589   : > { %9264 = vmatprep.mubr.msk.bf16.mxu1 %vm852_vm0, %v6003_v30  ;;  %v6674_v30 = vpack.c.bf16 %v6639_v50, %v6638_v4  ;;  %v6656_v50 = vld [vmem:[#allocation3 + $0xb5] sm:$0xff]  ;;  %v6657_v4 = vld [vmem:[#allocation3 + $0xbd] sm:$0xff] }
 0x590   : > { %9265 = vmatmul.mubr.msk.bf16.gmra.mrb[8].mxu1 %vm852_vm0, %v6004_v35  ;;  %v6640_v35 = vld [vmem:[#allocation3 + $0x35] sm:$0xff] }
 0x591   : > { %9268 = vmatprep.mubr.msk.bf16.mxu1 %vm852_vm0, %v6005_v36  ;;  %v6641_v36 = vld [vmem:[#allocation3 + $0x3d] sm:$0xff] }
 0x598   : > { %9269 = vmatmul.mubr.msk.bf16.gmra.mrb[12].mxu1 %vm852_vm0, %v6006_v29  ;;  %v6643_v29 = vld [vmem:[#allocation3 + $0x4d] sm:$0xff] }
 0x599   : > { %9272 = vmatprep.mubr.msk.bf16.mxu1 %vm852_vm0, %v6007_v13  ;;  %v6675_v13 = vpack.c.bf16 %v6641_v36, %v6640_v35  ;;  %v6683_v35 = vpack.c.bf16 %v6657_v4, %v6656_v50  ;;  %v6658_v36 = vld [vmem:[#allocation3 + $0xc5] sm:$0xff] }
 0x59a   : > { %v6976_v50 = vld [vmem:[#allocation3 + $0x26] sm:$0xff] }
 0x5a0   : > { %9273 = vmatmul.mubr.msk.bf16.gmra.mrb[16].mxu1 %vm852_vm0, %v6008_v44  ;;  %v6642_v44 = vld [vmem:[#allocation3 + $0x45] sm:$0xff] }
 0x5a1   : > { %9276 = vmatprep.mubr.msk.bf16.mxu1 %vm852_vm0, %v6009_v7  ;;  %v9997_v7 = vld [vmem:[%s12157_s3 + $0x88] sm:$0xff]  }
 0x5a8   : > { %9277 = vmatmul.mubr.msk.bf16.gmra.mrb[20].mxu1 %vm852_vm0, %v6010_v31  ;;  %v6676_v31 = vpack.c.bf16 %v6643_v29, %v6642_v44  ;;  %v6661_v44 = vld [vmem:[#allocation3 + $0xdd] sm:$0xff] }
 0x5a9   : > { %9280 = vmatprep.mubr.msk.bf16.mxu1 %vm852_vm0, %v6011_v15  ;;  %v6647_v15 = vld [vmem:[#allocation3 + $0x6d] sm:$0xff] }
 0x5aa   : > { %v6678_v37 = vpack.c.bf16 %v6647_v15, %v6646_v20  ;;  %v6664_v15 = vld [vmem:[#allocation3 + $0xf5] sm:$0xff]  ;;  %v6667_v20 = vld [vmem:[#allocation3 + $0x10d] sm:$0xff] }
 0x5b0   : > { %9281 = vmatmul.mubr.msk.bf16.gmra.mrb[24].mxu1 %vm852_vm0, %v6012_v10  ;;  %v6677_v10 = vpack.c.bf16 %v6645_v33, %v6644_v32  ;;  %v6662_v32 = vld [vmem:[#allocation3 + $0xe5] sm:$0xff] }
 0x5b1   : > { %9284 = vmatprep.mubr.msk.bf16.mxu1 %vm852_vm0, %v6013_v61  ;;  %v6651_v61 = vld [vmem:[#allocation3 + $0x8d] sm:$0xff] }
 0x5b2   : > { %v6680_v63 = vpack.c.bf16 %v6651_v61, %v6650_v62  ;;  %v6668_v61 = vld [vmem:[#allocation3 + $0x115] sm:$0xff]  ;;  %v6670_v62 = vld [vmem:[#allocation3 + $0x125] sm:$0xff] }
 0x5b8   : > { %9285 = vmatmul.mubr.msk.bf16.gmra.mrb[28].mxu1 %vm852_vm0, %v6014_v57  ;;  %v6679_v57 = vpack.c.bf16 %v6649_v60, %v6648_v55  ;;  %v6666_v55 = vld [vmem:[#allocation3 + $0x105] sm:$0xff] }
 0x5b9   : > { %9288 = vmatprep.mubr.msk.bf16.mxu1 %vm852_vm0, %v6015_v3  ;;  %v6652_v3 = vld [vmem:[#allocation3 + $0x95] sm:$0xff]  ;;  %v6688_v60 = vpack.c.bf16 %v6667_v20, %v6666_v55 }
 0x5ba   : > { %v6681_v14 = vpack.c.bf16 %v6653_v23, %v6652_v3  ;;  %v6986_v20 = vld [vmem:[#allocation3 + $0x76] sm:$0xff]  ;;  %v6989_v55 = vld [vmem:[#allocation3 + $0x8e] sm:$0xff] }
 0x5c0   : > { %9289 = vmatmul.mubr.msk.bf16.gmra.mrb[32].mxu1 %vm852_vm0, %v6353_v52 }
 0x5c1   : > { %9296 = vmatprep.mubr.msk.bf16.mxu1 %vm852_vm0, %v6674_v30  ;;  %v6659_v30 = vld [vmem:[#allocation3 + $0xcd] sm:$0xff] }
 0x5c2   : > { %v6684_v29 = vpack.c.bf16 %v6659_v30, %v6658_v36  ;;  %v6978_v30 = vld [vmem:[#allocation3 + $0x36] sm:$0xff]  ;;  %v6981_v36 = vld [vmem:[#allocation3 + $0x4e] sm:$0xff] }
 0x5c8   : > { %9297 = vmatmul.mubr.msk.bf16.vlgmr.msra.gmra.mrb[0].mxu1 %vm852_vm0, %v6675_v13  ;;  %v6660_v13 = vld [vmem:[#allocation3 + $0xd5] sm:$0xff] }
 0x5c9   : > { %9333 = vmatpush3.bf16.msra.mxu1 %v9996_v24  ;;  %9300 = vmatprep.mubr.msk.bf16.mxu1 %vm852_vm0, %v6676_v31  ;;  %v6655_v24 = vld [vmem:[#allocation3 + $0xad] sm:$0xff]  ;;  %v6685_v31 = vpack.c.bf16 %v6661_v44, %v6660_v13 }
 0x5ca   : > { %9334 = vmatprep.subr.bf16.mxu1 %v9997_v7  ;;  %v6682_v52 = vpack.c.bf16 %v6655_v24, %v6654_v56  ;;  %v6672_v24 = vld [vmem:[#allocation3 + $0x135] sm:$0xff]  ;;  %v6980_v13 = vld [vmem:[#allocation3 + $0x46] sm:$0xff] }
 0x5cb   : > { %v7014_v44 = vpack.c.bf16 %v6981_v36, %v6980_v13  ;;  %v6998_v36 = vld [vmem:[#allocation3 + $0xd6] sm:$0xff]  ;;  %v7001_v13 = vld [vmem:[#allocation3 + $0xee] sm:$0xff] }
 0x5cd   : > { %9335 = vmatpush3.bf16.msra.mxu1 %v9997_v7  ;;  %v6663_v7 = vld [vmem:[#allocation3 + $0xed] sm:$0xff] }
 0x5ce   : > { %v6686_v33 = vpack.c.bf16 %v6663_v7, %v6662_v32  ;;  %v6982_v7 = vld [vmem:[#allocation3 + $0x56] sm:$0xff]  ;;  %v6985_v32 = vld [vmem:[#allocation3 + $0x6e] sm:$0xff] }
 0x5d0   : > { %9301 = vmatmul.mubr.msk.bf16.gmra.mrb[4].mxu1 %vm852_vm0, %v6677_v10  ;;  %v6665_v10 = vld [vmem:[#allocation3 + $0xfd] sm:$0xff] }
 0x5d1   : > { %9304 = vmatprep.mubr.msk.bf16.mxu1 %vm852_vm0, %v6678_v37  ;;  %v6687_v37 = vpack.c.bf16 %v6665_v10, %v6664_v15  ;;  %v6984_v15 = vld [vmem:[#allocation3 + $0x66] sm:$0xff] }
 0x5d2   : > { %v7016_v10 = vpack.c.bf16 %v6985_v32, %v6984_v15  ;;  %v7002_v32 = vld [vmem:[#allocation3 + $0xf6] sm:$0xff]  ;;  %v7005_v15 = vld [vmem:[#allocation3 + $0x10e] sm:$0xff] }
 0x5d8   : > { %9305 = vmatmul.mubr.msk.bf16.gmra.mrb[8].mxu1 %vm852_vm0, %v6679_v57  ;;  %v6669_v57 = vld [vmem:[#allocation3 + $0x11d] sm:$0xff] }
 0x5d9   : > { %9308 = vmatprep.mubr.msk.bf16.mxu1 %vm852_vm0, %v6680_v63  ;;  %v6671_v63 = vld [vmem:[#allocation3 + $0x12d] sm:$0xff]  ;;  %v6689_v3 = vpack.c.bf16 %v6669_v57, %v6668_v61 }
 0x5da   : > { %v6690_v23 = vpack.c.bf16 %v6671_v63, %v6670_v62  ;;  %v6988_v61 = vld [vmem:[#allocation3 + $0x86] sm:$0xff]  ;;  %v6990_v62 = vld [vmem:[#allocation3 + $0x96] sm:$0xff]  ;;  %v6991_v63 = vld [vmem:[#allocation3 + $0x9e] sm:$0xff] }
 0x5db   : > { %v7018_v57 = vpack.c.bf16 %v6989_v55, %v6988_v61  ;;  %v7006_v55 = vld [vmem:[#allocation3 + $0x116] sm:$0xff]  ;;  %v7008_v61 = vld [vmem:[#allocation3 + $0x126] sm:$0xff] }
 0x5e0   : > { %9309 = vmatmul.mubr.msk.bf16.gmra.mrb[12].mxu1 %vm852_vm0, %v6681_v14  ;;  %v6673_v14 = vld [vmem:[#allocation3 + $0x13d] sm:$0xff] }
 0x5e1   : > { %9312 = vmatprep.mubr.msk.bf16.mxu1 %vm852_vm0, %v6682_v52  ;;  %v6691_v56 = vpack.c.bf16 %v6673_v14, %v6672_v24  ;;  %v6977_v52 = vld [vmem:[#allocation3 + $0x2e] sm:$0xff]  ;;  %v6992_v24 = vld [vmem:[#allocation3 + $0xa6] sm:$0xff] }
 0x5e2   : > { %v7012_v4 = vpack.c.bf16 %v6977_v52, %v6976_v50  ;;  %v6995_v52 = vld [vmem:[#allocation3 + $0xbe] sm:$0xff]  ;;  %v6997_v50 = vld [vmem:[#allocation3 + $0xce] sm:$0xff] }
 0x5e8   : > { %9313 = vmatmul.mubr.msk.bf16.gmra.mrb[16].mxu1 %vm852_vm0, %v6683_v35  ;;  %v6979_v35 = vld [vmem:[#allocation3 + $0x3e] sm:$0xff] }
 0x5e9   : > { %9316 = vmatprep.mubr.msk.bf16.mxu1 %vm852_vm0, %v6684_v29  ;;  %v7013_v29 = vpack.c.bf16 %v6979_v35, %v6978_v30  ;;  %v6996_v30 = vld [vmem:[#allocation3 + $0xc6] sm:$0xff] }
 0x5ea   : > { %v7022_v35 = vpack.c.bf16 %v6997_v50, %v6996_v30 }
 0x5f0   : > { %9317 = vmatmul.mubr.msk.bf16.gmra.mrb[20].mxu1 %vm852_vm0, %v6685_v31  ;;  %v6983_v31 = vld [vmem:[#allocation3 + $0x5e] sm:$0xff] }
 0x5f1   : > { %9320 = vmatprep.mubr.msk.bf16.mxu1 %vm852_vm0, %v6686_v33  ;;  %v7015_v33 = vpack.c.bf16 %v6983_v31, %v6982_v7  ;;  %v7000_v7 = vld [vmem:[#allocation3 + $0xe6] sm:$0xff] }
 0x5f2   : > { %v7024_v31 = vpack.c.bf16 %v7001_v13, %v7000_v7 }
 0x5f8   : > { %9321 = vmatmul.mubr.msk.bf16.gmra.mrb[24].mxu1 %vm852_vm0, %v6687_v37  ;;  %v6987_v37 = vld [vmem:[#allocation3 + $0x7e] sm:$0xff] }
 0x5f9   : > { %9324 = vmatprep.mubr.msk.bf16.mxu1 %vm852_vm0, %v6688_v60  ;;  %v7017_v60 = vpack.c.bf16 %v6987_v37, %v6986_v20  ;;  %v7004_v20 = vld [vmem:[#allocation3 + $0x106] sm:$0xff] }
 0x5fa   : > { %v7026_v37 = vpack.c.bf16 %v7005_v15, %v7004_v20 }
 0x600   : > { %9325 = vmatmul.mubr.msk.bf16.gmra.mrb[28].mxu1 %vm852_vm0, %v6689_v3  ;;  %v6993_v3 = vld [vmem:[#allocation3 + $0xae] sm:$0xff] }
 0x601   : > { %9328 = vmatprep.mubr.msk.bf16.mxu1 %vm852_vm0, %v6690_v23  ;;  %v7019_v23 = vpack.c.bf16 %v6991_v63, %v6990_v62  ;;  %v7020_v14 = vpack.c.bf16 %v6993_v3, %v6992_v24  ;;  %v7010_v3 = vld [vmem:[#allocation3 + $0x136] sm:$0xff] }
 0x608   : > { %9329 = vmatmul.mubr.msk.bf16.gmra.mrb[32].mxu1 %vm852_vm0, %v6691_v56  ;;  %v6994_v56 = vld [vmem:[#allocation3 + $0xb6] sm:$0xff] }
 0x609   : > { %9336 = vmatprep.mubr.msk.bf16.mxu1 %vm852_vm0, %v7012_v4  ;;  %v7021_v4 = vpack.c.bf16 %v6995_v52, %v6994_v56  ;;  %v11371_v52 = vld [vmem:[%s12158_s4 + $0x5] ss:$0 sm:$0xff] }
 0x610   : > { %9337 = vmatmul.mubr.msk.bf16.vlgmr.msra.gmra.mrb[0].mxu1 %vm852_vm0, %v7013_v29  ;;  %v6999_v29 = vld [vmem:[#allocation3 + $0xde] sm:$0xff] }
 0x611   : > { %9340 = vmatprep.mubr.msk.bf16.mxu1 %vm852_vm0, %v7014_v44  ;;  %v7023_v44 = vpack.c.bf16 %v6999_v29, %v6998_v36 }
 0x618   : > { %9341 = vmatmul.mubr.msk.bf16.gmra.mrb[4].mxu1 %vm852_vm0, %v7015_v33  ;;  %v7003_v33 = vld [vmem:[#allocation3 + $0xfe] sm:$0xff] }
 0x619   : > { %9344 = vmatprep.mubr.msk.bf16.mxu1 %vm852_vm0, %v7016_v10  ;;  %v7025_v10 = vpack.c.bf16 %v7003_v33, %v7002_v32 }
 0x620   : > { %9345 = vmatmul.mubr.msk.bf16.gmra.mrb[8].mxu1 %vm852_vm0, %v7017_v60  ;;  %v7007_v60 = vld [vmem:[#allocation3 + $0x11e] sm:$0xff] }
 0x621   : > { %9348 = vmatprep.mubr.msk.bf16.mxu1 %vm852_vm0, %v7018_v57  ;;  %v7009_v57 = vld [vmem:[#allocation3 + $0x12e] sm:$0xff]  ;;  %v7027_v62 = vpack.c.bf16 %v7007_v60, %v7006_v55 }
 0x622   : > { %v7028_v63 = vpack.c.bf16 %v7009_v57, %v7008_v61 }
 0x628   : > { %9349 = vmatmul.mubr.msk.bf16.gmra.mrb[12].mxu1 %vm852_vm0, %v7019_v23  ;;  %v7011_v23 = vld [vmem:[#allocation3 + $0x13e] sm:$0xff] }
 0x629   : > { %9352 = vmatprep.mubr.msk.bf16.mxu1 %vm852_vm0, %v7020_v14  ;;  %v7029_v24 = vpack.c.bf16 %v7011_v23, %v7010_v3  ;;  %v11366_v14 = vld [vmem:[%s12158_s4 + $0x4] ss:$0 sm:$0xff] }
 0x630   : > { %9353 = vmatmul.mubr.msk.bf16.gmra.mrb[16].mxu1 %vm852_vm0, %v7021_v4 }
 0x631   : > { %9356 = vmatprep.mubr.msk.bf16.mxu1 %vm852_vm0, %v7022_v35 }
 0x638   : > { %9357 = vmatmul.mubr.msk.bf16.gmra.mrb[20].mxu1 %vm852_vm0, %v7023_v44 }
 0x639   : > { %9360 = vmatprep.mubr.msk.bf16.mxu1 %vm852_vm0, %v7024_v31 }
 0x640   : > { %9361 = vmatmul.mubr.msk.bf16.gmra.mrb[24].mxu1 %vm852_vm0, %v7025_v10 }
 0x641   : > { %9364 = vmatprep.mubr.msk.bf16.mxu1 %vm852_vm0, %v7026_v37 }
 0x648   : > { %9365 = vmatmul.mubr.msk.bf16.gmra.mrb[28].mxu1 %vm852_vm0, %v7027_v62 }
 0x649   : > { %9368 = vmatprep.mubr.msk.bf16.mxu1 %vm852_vm0, %v7028_v63 }
 0x650   : > { %9369 = vmatmul.mubr.msk.bf16.gmra.mrb[32].mxu1 %vm852_vm0, %v7029_v24 }
 0x6e3   : > { %v9338_v56 = vpop.f32.mrb[0].mxu1 }
 0x6e4   : > { %v7320_v50 = vmul.f32 %v9338_v56, %v11366_v14  ;;  %v7135_v4 = vpop.f32.mrb[1].mxu1 }
 0x6e5   : > { %v7318_v30 = vmul.f32 %v11366_v14, %v7135_v4  ;;  %v9339_v35 = vpop.f32.mrb[2].mxu1 }
 0x6e6   : > { %v7321_v36 = vmul.f32 %v9339_v35, %v11366_v14  ;;  %v7138_v29 = vpop.f32.mrb[3].mxu1  ;;  %v7360_v13 = vadd.f32 %v11371_v52, %v7320_v50 }
 0x6e7   : > { %v7358_v44 = vadd.f32 %v11371_v52, %v7318_v30  ;;  %v7319_v7 = vmul.f32 %v11366_v14, %v7138_v29 }
 0x6e8   : > { %v7361_v32 = vadd.f32 %v11371_v52, %v7321_v36  ;;  %v11385_v15 = vmul.f32 %v7360_v13, %v10852_v39 }
 0x6e9   : > { %v11380_v31 = vmul.f32 %v7358_v44, %v10848_v43  ;;  %v7359_v33 = vadd.f32 %v11371_v52, %v7319_v7 }
 0x6ea   : > { %v11394_v43 = vmul.f32 %v7361_v32, %v10854_v40  ;;  %v7433_v3 = vsel %vm852_vm0, %v11385_v15, 0.0 }
 0x6eb   : > { %v11388_v10 = vmul.f32 %v7359_v33, %v10850_v38  ;;  %v9342_v20 = vpop.f32.mrb[4].mxu1  ;;  %v7430_v60 = vsel %vm852_vm0, %v11380_v31, 0.0 }
 0x6ec   : > { %v7324_v37 = vmul.f32 %v9342_v20, %v11366_v14  ;;  %v7151_v55 = vpop.f32.mrb[5].mxu1  ;;  %v7435_v50 = vsel %vm852_vm0, %v11394_v43, 0.0 }
 0x6ed   : > { %v7431_v61 = vsel %vm852_vm0, %v11388_v10, 0.0  ;;  %v7322_v57 = vmul.f32 %v11366_v14, %v7151_v55  ;;  %v9343_v39 = vpop.f32.mrb[6].mxu1 }
 0x6ee   : > { %v7432_v62 = vadd.f32 %v7431_v61, %v7430_v60  ;;  %v7325_v38 = vmul.f32 %v9343_v39, %v11366_v14  ;;  %v7154_v63 = vpop.f32.mrb[7].mxu1  ;;  %v7364_v23 = vadd.f32 %v11371_v52, %v7324_v37 }
 0x6ef   : > { %v7362_v24 = vadd.f32 %v11371_v52, %v7322_v57  ;;  %v7323_v40 = vmul.f32 %v11366_v14, %v7154_v63 }
 0x6f0   : > { %v7434_v56 = vadd.f32 %v7433_v3, %v7432_v62  ;;  %v7365_v30 = vadd.f32 %v11371_v52, %v7325_v38  ;;  %v11413_v29 = vmul.f32 %v7364_v23, %v10860_v46 }
 0x6f1   : > { %v11408_v4 = vmul.f32 %v7362_v24, %v10856_v41  ;;  %v7363_v35 = vadd.f32 %v11371_v52, %v7323_v40 }
 0x6f2   : > { %v7436_v36 = vadd.f32 %v7435_v50, %v7434_v56  ;;  %v11422_v20 = vmul.f32 %v7365_v30, %v10862_v47 }
 0x6f3   : > { %v7437_v13 = vsel %vm852_vm0, %v11408_v4, 0.0  ;;  %v11418_v44 = vmul.f32 %v7363_v35, %v10858_v42  ;;  %v9346_v7 = vpop.f32.mrb[8].mxu1  ;;  %v7441_v42 = vsel %vm852_vm0, %v11413_v29, 0.0 }
 0x6f4   : > { %v7438_v32 = vadd.f32 %v7437_v13, %v7436_v36  ;;  %v7328_v33 = vmul.f32 %v9346_v7, %v11366_v14  ;;  %v7167_v41 = vpop.f32.mrb[9].mxu1  ;;  %v7443_v63 = vsel %vm852_vm0, %v11422_v20, 0.0 }
 0x6f5   : > { %v7439_v37 = vsel %vm852_vm0, %v11418_v44, 0.0  ;;  %v7326_v46 = vmul.f32 %v11366_v14, %v7167_v41  ;;  %v9347_v55 = vpop.f32.mrb[10].mxu1 }
 0x6f6   : > { %v7440_v60 = vadd.f32 %v7439_v37, %v7438_v32  ;;  %v7329_v61 = vmul.f32 %v9347_v55, %v11366_v14  ;;  %v7170_v57 = vpop.f32.mrb[11].mxu1  ;;  %v7368_v39 = vadd.f32 %v11371_v52, %v7328_v33 }
 0x6f7   : > { %v7366_v62 = vadd.f32 %v11371_v52, %v7326_v46  ;;  %v7327_v47 = vmul.f32 %v11366_v14, %v7170_v57 }
 0x6f8   : > { %v7442_v38 = vadd.f32 %v7441_v42, %v7440_v60  ;;  %v7369_v23 = vadd.f32 %v11371_v52, %v7329_v61  ;;  %v11441_v56 = vmul.f32 %v7368_v39, %v10873_v51 }
 0x6f9   : > { %v11436_v3 = vmul.f32 %v7366_v62, %v10864_v48  ;;  %v7367_v24 = vadd.f32 %v11371_v52, %v7327_v47 }
 0x6fa   : > { %v7444_v40 = vadd.f32 %v7443_v63, %v7442_v38  ;;  %v11450_v7 = vmul.f32 %v7369_v23, %v10880_v45 }
 0x6fb   : > { %v7445_v50 = vsel %vm852_vm0, %v11436_v3, 0.0  ;;  %v11446_v30 = vmul.f32 %v7367_v24, %v10866_v49  ;;  %v9350_v35 = vpop.f32.mrb[12].mxu1  ;;  %v7449_v49 = vsel %vm852_vm0, %v11441_v56, 0.0 }
 0x6fc   : > { %v7446_v36 = vadd.f32 %v7445_v50, %v7444_v40  ;;  %v7332_v13 = vmul.f32 %v9350_v35, %v11366_v14  ;;  %v7183_v48 = vpop.f32.mrb[13].mxu1  ;;  %v7451_v57 = vsel %vm852_vm0, %v11450_v7, 0.0 }
 0x6fd   : > { %v7447_v32 = vsel %vm852_vm0, %v11446_v30, 0.0  ;;  %v7330_v51 = vmul.f32 %v11366_v14, %v7183_v48  ;;  %v9351_v33 = vpop.f32.mrb[14].mxu1 }
 0x6fe   : > { %v7448_v41 = vadd.f32 %v7447_v32, %v7446_v36  ;;  %v7333_v37 = vmul.f32 %v9351_v33, %v11366_v14  ;;  %v7186_v46 = vpop.f32.mrb[15].mxu1  ;;  %v7372_v55 = vadd.f32 %v11371_v52, %v7332_v13 }
 0x6ff   : > { %v7370_v60 = vadd.f32 %v11371_v52, %v7330_v51  ;;  %v7331_v45 = vmul.f32 %v11366_v14, %v7186_v46 }
 0x700   : > { %v7450_v61 = vadd.f32 %v7449_v49, %v7448_v41  ;;  %v7373_v39 = vadd.f32 %v11371_v52, %v7333_v37  ;;  %v11469_v38 = vmul.f32 %v7372_v55, %v10906_v19 }
 0x701   : > { %v11464_v42 = vmul.f32 %v7370_v60, %v10890_v1  ;;  %v7371_v62 = vadd.f32 %v11371_v52, %v7331_v45 }
 0x702   : > { %v7452_v47 = vadd.f32 %v7451_v57, %v7450_v61  ;;  %v11478_v35 = vmul.f32 %v7373_v39, %v10915_v26 }
 0x703   : > { %v7453_v63 = vsel %vm852_vm0, %v11464_v42, 0.0  ;;  %v11474_v23 = vmul.f32 %v7371_v62, %v10896_v6  ;;  %v9354_v24 = vpop.f32.mrb[16].mxu1  ;;  %v7457_v6 = vsel %vm852_vm0, %v11469_v38, 0.0 }
 0x704   : > { %v7454_v40 = vadd.f32 %v7453_v63, %v7452_v47  ;;  %v7336_v50 = vmul.f32 %v9354_v24, %v11366_v14  ;;  %v7199_v1 = vpop.f32.mrb[17].mxu1  ;;  %v7459_v46 = vsel %vm852_vm0, %v11478_v35, 0.0 }
 0x705   : > { %v7455_v36 = vsel %vm852_vm0, %v11474_v23, 0.0  ;;  %v7334_v19 = vmul.f32 %v11366_v14, %v7199_v1  ;;  %v9355_v13 = vpop.f32.mrb[18].mxu1 }
 0x706   : > { %v7456_v48 = vadd.f32 %v7455_v36, %v7454_v40  ;;  %v7337_v32 = vmul.f32 %v9355_v13, %v11366_v14  ;;  %v7202_v51 = vpop.f32.mrb[19].mxu1  ;;  %v7376_v33 = vadd.f32 %v11371_v52, %v7336_v50 }
 0x707   : > { %v7374_v41 = vadd.f32 %v11371_v52, %v7334_v19  ;;  %v7335_v26 = vmul.f32 %v11366_v14, %v7202_v51 }
 0x708   : > { %v7458_v37 = vadd.f32 %v7457_v6, %v7456_v48  ;;  %v7377_v55 = vadd.f32 %v11371_v52, %v7337_v32  ;;  %v11497_v61 = vmul.f32 %v7376_v33, %v10949_v18 }
 0x709   : > { %v11492_v49 = vmul.f32 %v7374_v41, %v10925_v54  ;;  %v7375_v60 = vadd.f32 %v11371_v52, %v7335_v26 }
 0x70a   : > { %v7460_v45 = vadd.f32 %v7459_v46, %v7458_v37  ;;  %v11506_v24 = vmul.f32 %v7377_v55, %v10957_v27 }
 0x70b   : > { %v7461_v57 = vsel %vm852_vm0, %v11492_v49, 0.0  ;;  %v11502_v39 = vmul.f32 %v7375_v60, %v10932_v0  ;;  %v9358_v62 = vpop.f32.mrb[20].mxu1  ;;  %v7465_v0 = vsel %vm852_vm0, %v11497_v61, 0.0 }
 0x70c   : > { %v7462_v47 = vadd.f32 %v7461_v57, %v7460_v45  ;;  %v7340_v63 = vmul.f32 %v9358_v62, %v11366_v14  ;;  %v7215_v54 = vpop.f32.mrb[21].mxu1  ;;  %v7467_v51 = vsel %vm852_vm0, %v11506_v24, 0.0 }
 0x70d   : > { %v7463_v40 = vsel %vm852_vm0, %v11502_v39, 0.0  ;;  %v7338_v18 = vmul.f32 %v11366_v14, %v7215_v54  ;;  %v9359_v50 = vpop.f32.mrb[22].mxu1 }
 0x70e   : > { %v7464_v1 = vadd.f32 %v7463_v40, %v7462_v47  ;;  %v7341_v36 = vmul.f32 %v9359_v50, %v11366_v14  ;;  %v7218_v19 = vpop.f32.mrb[23].mxu1  ;;  %v7380_v13 = vadd.f32 %v11371_v52, %v7340_v63 }
 0x70f   : > { %v7378_v48 = vadd.f32 %v11371_v52, %v7338_v18  ;;  %v7339_v27 = vmul.f32 %v11366_v14, %v7218_v19 }
 0x710   : > { %v7466_v32 = vadd.f32 %v7465_v0, %v7464_v1  ;;  %v7381_v33 = vadd.f32 %v11371_v52, %v7341_v36  ;;  %v11525_v37 = vmul.f32 %v7380_v13, %v10996_v28 }
 0x711   : > { %v11520_v6 = vmul.f32 %v7378_v48, %v10976_v2  ;;  %v7379_v41 = vadd.f32 %v11371_v52, %v7339_v27 }
 0x712   : > { %v7468_v26 = vadd.f32 %v7467_v51, %v7466_v32  ;;  %v11534_v62 = vmul.f32 %v7381_v33, %v11005_v58 }
 0x713   : > { %v7469_v46 = vsel %vm852_vm0, %v11520_v6, 0.0  ;;  %v11530_v55 = vmul.f32 %v7379_v41, %v10984_v5  ;;  %v9362_v60 = vpop.f32.mrb[24].mxu1  ;;  %v7473_v5 = vsel %vm852_vm0, %v11525_v37, 0.0 }
 0x714   : > { %v7470_v45 = vadd.f32 %v7469_v46, %v7468_v26  ;;  %v7344_v57 = vmul.f32 %v9362_v60, %v11366_v14  ;;  %v7231_v2 = vpop.f32.mrb[25].mxu1  ;;  %v7475_v19 = vsel %vm852_vm0, %v11534_v62, 0.0 }
 0x715   : > { %v7471_v47 = vsel %vm852_vm0, %v11530_v55, 0.0  ;;  %v7342_v28 = vmul.f32 %v11366_v14, %v7231_v2  ;;  %v9363_v63 = vpop.f32.mrb[26].mxu1 }
 0x716   : > { %v7472_v54 = vadd.f32 %v7471_v47, %v7470_v45  ;;  %v7345_v40 = vmul.f32 %v9363_v63, %v11366_v14  ;;  %v7234_v18 = vpop.f32.mrb[27].mxu1  ;;  %v7384_v50 = vadd.f32 %v11371_v52, %v7344_v57 }
 0x717   : > { %v7382_v1 = vadd.f32 %v11371_v52, %v7342_v28  ;;  %v7343_v58 = vmul.f32 %v11366_v14, %v7234_v18 }
 0x718   : > { %v7474_v36 = vadd.f32 %v7473_v5, %v7472_v54  ;;  %v7385_v13 = vadd.f32 %v11371_v52, %v7345_v40  ;;  %v11553_v32 = vmul.f32 %v7384_v50, %v11038_v53 }
 0x719   : > { %v11548_v0 = vmul.f32 %v7382_v1, %v11017_v11  ;;  %v7383_v48 = vadd.f32 %v11371_v52, %v7343_v58 }
 0x71a   : > { %v7476_v27 = vadd.f32 %v7475_v19, %v7474_v36  ;;  %v11562_v60 = vmul.f32 %v7385_v13, %v11045_v8 }
 0x71b   : > { %v7477_v51 = vsel %vm852_vm0, %v11548_v0, 0.0  ;;  %v11558_v33 = vmul.f32 %v7383_v48, %v11024_v22  ;;  %v9366_v41 = vpop.f32.mrb[28].mxu1  ;;  %v7481_v22 = vsel %vm852_vm0, %v11553_v32, 0.0 }
 0x71c   : > { %v7478_v26 = vadd.f32 %v7477_v51, %v7476_v27  ;;  %v7348_v46 = vmul.f32 %v9366_v41, %v11366_v14  ;;  %v7247_v11 = vpop.f32.mrb[29].mxu1  ;;  %v7483_v18 = vsel %vm852_vm0, %v11562_v60, 0.0 }
 0x71d   : > { %v7479_v45 = vsel %vm852_vm0, %v11558_v33, 0.0  ;;  %v7346_v53 = vmul.f32 %v11366_v14, %v7247_v11  ;;  %v9367_v57 = vpop.f32.mrb[30].mxu1 }
 0x71e   : > { %v7480_v2 = vadd.f32 %v7479_v45, %v7478_v26  ;;  %v7349_v47 = vmul.f32 %v9367_v57, %v11366_v14  ;;  %v7250_v28 = vpop.f32.mrb[31].mxu1  ;;  %v7388_v63 = vadd.f32 %v11371_v52, %v7348_v46 }
 0x71f   : > { %v7386_v54 = vadd.f32 %v11371_v52, %v7346_v53  ;;  %v7347_v8 = vmul.f32 %v11366_v14, %v7250_v28 }
 0x720   : > { %v7482_v40 = vadd.f32 %v7481_v22, %v7480_v2  ;;  %v7389_v50 = vadd.f32 %v11371_v52, %v7349_v47  ;;  %v11581_v36 = vmul.f32 %v7388_v63, %v11078_v17 }
 0x721   : > { %v11576_v5 = vmul.f32 %v7386_v54, %v11059_v21  ;;  %v7387_v1 = vadd.f32 %v11371_v52, %v7347_v8 }
 0x722   : > { %v7484_v58 = vadd.f32 %v7483_v18, %v7482_v40  ;;  %v11590_v41 = vmul.f32 %v7389_v50, %v11087_v34 }
 0x723   : > { %v7485_v19 = vsel %vm852_vm0, %v11576_v5, 0.0  ;;  %v11586_v13 = vmul.f32 %v7387_v1, %v11066_v59  ;;  %v9370_v48 = vpop.f32.mrb[32].mxu1  ;;  %v7489_v59 = vsel %vm852_vm0, %v11581_v36, 0.0 }
 0x724   : > { %v7486_v27 = vadd.f32 %v7485_v19, %v7484_v58  ;;  %v7352_v51 = vmul.f32 %v9370_v48, %v11366_v14  ;;  %v7263_v21 = vpop.f32.mrb[33].mxu1  ;;  %v7491_v28 = vsel %vm852_vm0, %v11590_v41, 0.0 }
 0x725   : > { %v7487_v26 = vsel %vm852_vm0, %v11586_v13, 0.0  ;;  %v7350_v17 = vmul.f32 %v11366_v14, %v7263_v21  ;;  %v9371_v46 = vpop.f32.mrb[34].mxu1 }
 0x726   : > { %v7488_v11 = vadd.f32 %v7487_v26, %v7486_v27  ;;  %v7353_v45 = vmul.f32 %v9371_v46, %v11366_v14  ;;  %v7266_v53 = vpop.f32.mrb[35].mxu1  ;;  %v7392_v57 = vadd.f32 %v11371_v52, %v7352_v51 }
 0x727   : > { %v7390_v2 = vadd.f32 %v11371_v52, %v7350_v17  ;;  %v7351_v34 = vmul.f32 %v11366_v14, %v7266_v53  ;;  %v7514_v53 = vld [vmem:[%s12160_s6] sm:$0x3] }
 0x728   : > { %v7490_v47 = vadd.f32 %v7489_v59, %v7488_v11  ;;  %v7393_v63 = vadd.f32 %v11371_v52, %v7353_v45  ;;  %v11609_v40 = vmul.f32 %v7392_v57, %v11120_v9  ;;  %v7517_v59 = vstv %s391_s28 }
 0x729   : > { %v11604_v22 = vmul.f32 %v7390_v2, %v11099_v12  ;;  %v7391_v54 = vadd.f32 %v11371_v52, %v7351_v34 }
 0x72a   : > { %v7492_v8 = vadd.f32 %v7491_v28, %v7490_v47  ;;  %v11617_v1 = vmul.f32 %v7393_v63, %v11127_v16  ;;  %v7497_v52 = vsel %vm852_vm0, %v11609_v40, 0.0  ;;  %v7508_v16 = vld [vmem:[%s12159_s5] sm:$0x3] }
 0x72b   : > { %v7493_v18 = vsel %vm852_vm0, %v11604_v22, 0.0  ;;  %v11614_v14 = vmul.f32 %v7391_v54, %v11106_v25  ;;  %v7520_v28 = vld [vmem:[%s12161_s7] sm:$0x3] }
 0x72c   : > { %v7494_v50 = vadd.f32 %v7493_v18, %v7492_v8  ;;  %v7499_v9 = vsel %vm852_vm0, %v11617_v1, 0.0 }
 0x72d   : > { %v7495_v12 = vsel %vm852_vm0, %v11614_v14, 0.0 }
 0x72e   : > { %v7496_v58 = vadd.f32 %v7495_v12, %v7494_v50 }
 0x730   : > { %v7498_v19 = vadd.f32 %v7497_v52, %v7496_v58 }
 0x732   : > { %v7500_v48 = vadd.f32 %v7499_v9, %v7498_v19  ;;  %v7534_v19 = vld [vmem:[%s12162_s8] sm:$0x1] }
 0x734   : > { %v7501_v27 = vrot.slane %v7500_v48, 4 }
 0x736   : > { %v7502_v51 = vadd.f32 %v7501_v27, %v7500_v48 }
 0x738   : > { %v7503_v25 = vrot.slane %v7502_v51, 2 }
 0x73a   : > { %v7504_v21 = vadd.f32 %v7503_v25, %v7502_v51 }
 0x73c   : > { %v7505_v26 = vrot.slane %v7504_v21, 1 }
 0x73e   : > { %v7506_v17 = vadd.f32 %v7505_v26, %v7504_v21  ;;  %v7578_v26 = vlaneseq }
 0x740   : > { %v7507_v46 = vmul.f32 0.00390625, %v7506_v17  ;;  %v7579_v17 = vshrl.u32 %v7578_v26, 7 }
 0x742   : > { %v7509_v11 = vmul.f32 %v7508_v16, %v7507_v46  ;;  %v7580_v16 = vsub.s32 0, %v7579_v17 }
 0x744   : > { %v7511_v45 = vsel %vm7510_vm7, %v7509_v11, 0.0 }
 0x745   : > { %7512 = vadd.xlane.f32.xlu1 %v7511_v45 }
 0x7d2   : > { %v7513_v57 = vpop.xlane.xlu1 %7512 }
 0x7d3   : > { %v7515_v2 = vadd.f32 %v7514_v53, %v7513_v57 }
 0x7d5   : > { %v7518_v34 = vmul.f32 %v7517_v59, %v7515_v2  ;;  %vm7516_vm8 = vcmp.ge.f32.partialorder %v7515_v2, 0.0 }
 0x7d7   : > { %v7519_v47 = vsel %vm7516_vm8, %v7515_v2, %v7518_v34 }
 0x7d8   : > { %7523 = vperm.xlu0 %9960, %v7519_v47  }
 0x857   : > { %v7524_v63 = vpop.permute.xlu0 %7523 }
 0x858   : > { %v7526_v54 = vmul.f32 %v7524_v63, %v7520_v28  ;;  %v7546_v63 = vld [vmem:[%s10209_s20 + $0x33] sm:$0xff] }
 0x85a   : > { %v7527_v8 = vsel %vm7510_vm7, %v7526_v54, 0.0  ;;  %v7547_v54 = vld [vmem:[%s10209_s20 + $0x3b] sm:$0xff] }
 0x85b   : > { %v7528_v18 = vrot.slane %v7527_v8, 4 }
 0x85d   : > { %v7529_v50 = vadd.f32 %v7528_v18, %v7527_v8  ;;  %v7548_v8 = vld [vmem:[%s10209_s20 + $0x43] sm:$0xff]  ;;  %v7549_v18 = vld [vmem:[%s10209_s20 + $0x4b] sm:$0xff] }
 0x85f   : > { %v7530_v12 = vrot.slane %v7529_v50, 2 }
 0x861   : > { %v7531_v58 = vadd.f32 %v7530_v12, %v7529_v50  ;;  %v7551_v12 = vld [vmem:[%s10209_s20 + $0x5b] sm:$0xff] }
 0x863   : > { %v7532_v52 = vrot.slane %v7531_v58, 1 }
 0x865   : > { %v7533_v9 = vadd.f32 %v7532_v52, %v7531_v58  ;;  %v7552_v58 = vld [vmem:[%s10209_s20 + $0x63] sm:$0xff]  ;;  %v7553_v52 = vld [vmem:[%s10209_s20 + $0x6b] sm:$0xff] }
 0x867   : > { %v7535_v48 = vadd.f32 %v7534_v19, %v7533_v9  ;;  %v7554_v9 = vld [vmem:[%s10209_s20 + $0x73] sm:$0xff] }
 0x869   : > { %v7536_v27 = vsub.f32 0.0, %v7535_v48  ;;  %v7556_v48 = vld [vmem:[%s10209_s20 + $0x83] sm:$0xff] }
 0x86b   : > { %v7537_v51 = vmul.f32 1.442695, %v7536_v27 }
 0x86d   : > { %9998 = vpow2.f32 %v7537_v51 }
 0x877   : > { %v9999_v25 = vpop.eup %9998 }
 0x878   : > { %v7539_v21 = vadd.f32 1.0, %v9999_v25 }
 0x87a   : > { %10000 = vrcp.f32 %v7539_v21  ;;  %v7559_v21 = vld [vmem:[%s10209_s20 + $0x9b] sm:$0xff] }
 0x884   : > { %v10001_v46 = vpop.eup %10000 }
 0x885   : > { %v7581_v11 = vrot.slane %v10001_v46, %v7580_v16  ;;  %v7562_v16 = vld [vmem:[%s10209_s20 + $0xb3] sm:$0xff] }
 0x887   : > { %v7582_v45 = vmul.f32 %v7581_v11, %v11380_v31  ;;  %v7583_v53 = vmul.f32 %v7581_v11, %v11388_v10  ;;  %v7584_v59 = vmul.f32 %v7581_v11, %v11385_v15  ;;  %v7585_v57 = vmul.f32 %v7581_v11, %v11394_v43 }
 0x888   : > { %v7586_v2 = vmul.f32 %v7581_v11, %v11408_v4  ;;  %v7587_v34 = vmul.f32 %v7581_v11, %v11418_v44  ;;  %v7588_v47 = vmul.f32 %v7581_v11, %v11413_v29  ;;  %v7589_v28 = vmul.f32 %v7581_v11, %v11422_v20 }
 0x889   : > { %v11648_v31 = vmul.f32 %v7581_v11, %v11436_v3  ;;  %v11651_v10 = vmul.f32 %v7581_v11, %v11446_v30  ;;  %v11654_v15 = vmul.f32 %v7581_v11, %v11441_v56  ;;  %v11657_v43 = vmul.f32 %v7581_v11, %v11450_v7  ;;  %v7542_v3 = vld [vmem:[%s10209_s20 + $0x13] sm:$0xff]  ;;  %v7543_v56 = vld [vmem:[%s10209_s20 + $0x1b] sm:$0xff]  ;;  %v7544_v30 = vld [vmem:[%s10209_s20 + $0x23] sm:$0xff] }
 0x88a   : > { %v11660_v4 = vmul.f32 %v7581_v11, %v11464_v42  ;;  %v11663_v29 = vmul.f32 %v7581_v11, %v11474_v23  ;;  %v11666_v44 = vmul.f32 %v7581_v11, %v11469_v38  ;;  %v11669_v20 = vmul.f32 %v7581_v11, %v11478_v35  ;;  %v7545_v7 = vld [vmem:[%s10209_s20 + $0x2b] sm:$0xff] }
 0x88b   : > { %v11676_v42 = vmul.f32 %v7581_v11, %v11492_v49  ;;  %v11679_v23 = vmul.f32 %v7581_v11, %v11502_v39  ;;  %v11682_v38 = vmul.f32 %v7581_v11, %v11497_v61  ;;  %v11685_v35 = vmul.f32 %v7581_v11, %v11506_v24  ;;  %v7550_v24 = vld [vmem:[%s10209_s20 + $0x53] sm:$0xff] }
 0x88c   : > { %v11692_v50 = vmul.f32 %v7581_v11, %v11520_v6  ;;  %v11695_v49 = vmul.f32 %v7581_v11, %v11530_v55  ;;  %v11698_v39 = vmul.f32 %v7581_v11, %v11525_v37  ;;  %v11701_v61 = vmul.f32 %v7581_v11, %v11534_v62  ;;  %v7555_v62 = vld [vmem:[%s10209_s20 + $0x7b] sm:$0xff] }
 0x88d   : > { %v7606_v19 = vmul.f32 %v7581_v11, %v11548_v0  ;;  %v7607_v6 = vmul.f32 %v7581_v11, %v11558_v33  ;;  %v7608_v55 = vmul.f32 %v7581_v11, %v11553_v32  ;;  %v7609_v37 = vmul.f32 %v7581_v11, %v11562_v60  ;;  %v7557_v33 = vld [vmem:[%s10209_s20 + $0x8b] sm:$0xff]  ;;  %v7558_v32 = vld [vmem:[%s10209_s20 + $0x93] sm:$0xff] }
 0x88e   : > { %12193 = vst [vmem:[#allocation7_spill] sm:$0xff] %v11695_v49  ;;  %12194 = vst [vmem:[#allocation8_spill] sm:$0xff] %v11698_v39  ;;  %v7610_v27 = vmul.f32 %v7581_v11, %v11576_v5  ;;  %v7611_v51 = vmul.f32 %v7581_v11, %v11586_v13  ;;  %v7612_v25 = vmul.f32 %v7581_v11, %v11581_v36  ;;  %v7560_v13 = vld [vmem:[%s10209_s20 + $0xa3] sm:$0xff]  ;;  %v7561_v36 = vld [vmem:[%s10209_s20 + $0xab] sm:$0xff] }
 0x88f   : > { %12195 = vst [vmem:[#allocation9_spill] sm:$0xff] %v11701_v61  ;;  %v7613_v0 = vmul.f32 %v7581_v11, %v11590_v41  ;;  %v7614_v60 = vmul.f32 %v7581_v11, %v11604_v22  ;;  %v7615_v26 = vmul.f32 %v7581_v11, %v11614_v14  ;;  %v7616_v17 = vmul.f32 %v7581_v11, %v11609_v40  ;;  %v7563_v14 = vld [vmem:[%s10209_s20 + $0xbb] sm:$0xff]  ;;  %v7564_v40 = vld [vmem:[%s10209_s20 + $0xc3] sm:$0xff]  ;;  %v7565_v39 = vld [vmem:[%s10209_s20 + $0xcb] sm:$0xff] }
 0x890   : > { %v7617_v5 = vmul.f32 %v7581_v11, %v11617_v1  ;;  %v11728_v41 = vadd.f32 %v7582_v45, %v7542_v3  ;;  %v11730_v46 = vadd.f32 %v7583_v53, %v7543_v56  ;;  %v11732_v61 = vadd.f32 %v7584_v59, %v7544_v30  ;;  %v7566_v53 = vld [vmem:[%s10209_s20 + $0xd3] sm:$0xff]  ;;  %v7567_v59 = vld [vmem:[%s10209_s20 + $0xdb] sm:$0xff] }
 0x891   : > { %v11734_v22 = vadd.f32 %v7585_v57, %v7545_v7  ;;  %v11739_v1 = vadd.f32 %v7586_v2, %v7546_v63  ;;  %v11741_v11 = vadd.f32 %v7587_v34, %v7547_v54  ;;  %v11743_v49 = vadd.f32 %v7588_v47, %v7548_v8  ;;  %v7568_v57 = vld [vmem:[%s10209_s20 + $0xe3] sm:$0xff]  ;;  %v7569_v47 = vld [vmem:[%s10209_s20 + $0xeb] sm:$0xff]  ;;  %v7571_v30 = vld [vmem:[%s10209_s20 + $0xfb] sm:$0xff] }
 0x892   : > { %v11745_v45 = vadd.f32 %v7589_v28, %v7549_v18  ;;  %v11751_v3 = vadd.f32 %v11648_v31, %v7550_v24  ;;  %v11754_v56 = vadd.f32 %v11651_v10, %v7551_v12  ;;  %v11757_v2 = vadd.f32 %v11654_v15, %v7552_v58  ;;  %v7570_v28 = vld [vmem:[%s10209_s20 + $0xf3] sm:$0xff]  ;;  %v7572_v63 = vld [vmem:[%s10209_s20 + $0x103] sm:$0xff]  ;;  %v7577_v12 = vld [vmem:[%s10209_s20 + $0x12b] sm:$0xff] }
 0x893   : > { %v11760_v34 = vadd.f32 %v11657_v43, %v7553_v52  ;;  %v11766_v7 = vadd.f32 %v11660_v4, %v7554_v9  ;;  %v11769_v31 = vadd.f32 %v11663_v29, %v7555_v62  ;;  %v11772_v10 = vadd.f32 %v11666_v44, %v7556_v48  ;;  %v7573_v43 = vld [vmem:[%s10209_s20 + $0x10b] sm:$0xff]  ;;  %v7574_v54 = vld [vmem:[%s10209_s20 + $0x113] sm:$0xff]  ;;  %v7575_v44 = vld [vmem:[%s10209_s20 + $0x11b] sm:$0xff] }
 0x894   : > { %v11775_v15 = vadd.f32 %v11669_v20, %v7557_v33  ;;  %v11781_v8 = vadd.f32 %v11676_v42, %v7558_v32  ;;  %v11784_v18 = vadd.f32 %v11679_v23, %v7559_v21  ;;  %v11787_v4 = vadd.f32 %v11682_v38, %v7560_v13  ;;  %v7576_v24 = vld [vmem:[%s10209_s20 + $0x123] sm:$0xff]  ;;  %s9949_s20 = smul.u32 288, %s12246_s22 }
 0x895   : > { %v11790_v29 = vadd.f32 %v11685_v35, %v7561_v36  ;;  %v11796_v20 = vadd.f32 %v11692_v50, %v7562_v16  ;;  %v12196_v58 = vld [vmem:[#allocation7_spill] sm:$0xff]  ;;  %v12197_v42 = vld [vmem:[#allocation8_spill] sm:$0xff]  ;;  %v11807_v38 = vadd.f32 %v7606_v19, %v7566_v53  ;;  %v11809_v48 = vadd.f32 %v7607_v6, %v7567_v59 }
 0x896   : > { %v11799_v52 = vadd.f32 %v12196_v58, %v7563_v14  ;;  %v11802_v9 = vadd.f32 %v12197_v42, %v7564_v40  ;;  %v12199_v23 = vld [vmem:[#allocation9_spill] sm:$0xff]  ;;  %v11811_v35 = vadd.f32 %v7608_v55, %v7568_v57  ;;  %v11813_v33 = vadd.f32 %v7609_v37, %v7569_v47  ;;  %v12211_v55 = vld [vmem:[#allocation6_spill] sm:$0xff]  ;;  %s11937_s18 = scalar_lea.vmem %s12165_s11, %s9949_s20 }
 0x897   : > { %v11805_v62 = vadd.f32 %v12199_v23, %v7565_v39  ;;  %12201 = vst [vmem:[#allocation9_spill] sm:$0xff] %v11807_v38  ;;  %12202 = vst [vmem:[#allocation10_spill] sm:$0xff] %v11809_v48  ;;  %v11815_v32 = vadd.f32 %v7610_v27, %v7570_v28  ;;  %v11817_v50 = vadd.f32 %v7611_v51, %v7571_v30  ;;  %vm7654_vm9 = vcmp.ge.f32.partialorder %v11728_v41, 0.0 }
 0x898   : > { %12198 = vst [vmem:[#allocation7_spill] sm:$0xff] %v11802_v9  ;;  %12203 = vst [vmem:[#allocation11_spill] sm:$0xff] %v11811_v35  ;;  %v11819_v21 = vadd.f32 %v7612_v25, %v7572_v63  ;;  %v11821_v13 = vadd.f32 %v7613_v0, %v7573_v43  ;;  %v11823_v36 = vadd.f32 %v7614_v60, %v7574_v54  ;;  %vm7655_vm10 = vcmp.ge.f32.partialorder %v11730_v46, 0.0 }
 0x899   : > { %12200 = vst [vmem:[#allocation8_spill] sm:$0xff] %v11805_v62  ;;  %12204 = vst [vmem:[#allocation12_spill] sm:$0xff] %v11813_v33  ;;  %v11825_v39 = vadd.f32 %v7615_v26, %v7575_v44  ;;  %v11827_v19 = vadd.f32 %v7616_v17, %v7576_v24  ;;  %v11829_v6 = vadd.f32 %v7617_v5, %v7577_v12  ;;  %vm7656_vm11 = vcmp.ge.f32.partialorder %v11732_v61, 0.0 }
 0x89a   : > { %12205 = vst [vmem:[#allocation13_spill] sm:$0xff] %v11815_v32  ;;  %12206 = vst [vmem:[#allocation14_spill] sm:$0xff] %v11817_v50  ;;  %vm7657_vm12 = vcmp.ge.f32.partialorder %v11734_v22, 0.0  ;;  %vm7658_vm13 = vcmp.ge.f32.partialorder %v11739_v1, 0.0  ;;  %vm7659_vm14 = vcmp.ge.f32.partialorder %v11741_v11, 0.0  ;;  %vm7660_vm15 = vcmp.ge.f32.partialorder %v11743_v49, 0.0 }
 0x89b   : > { %12207 = vst [vmem:[#allocation15_spill] sm:$0xff] %v11819_v21  ;;  %12208 = vst [vmem:[#allocation16_spill] sm:$0xff] %v11821_v13  ;;  %vm7661_vm1 = vcmp.ge.f32.partialorder %v11745_v45, 0.0  ;;  %vm7662_vm2 = vcmp.ge.f32.partialorder %v11751_v3, 0.0  ;;  %vm7663_vm3 = vcmp.ge.f32.partialorder %v11754_v56, 0.0  ;;  %vm7664_vm4 = vcmp.ge.f32.partialorder %v11757_v2, 0.0 }
 0x89c   : > { %12209 = vst [vmem:[#allocation17_spill] sm:$0xff] %v11825_v39  ;;  %12210 = vst [vmem:[#allocation18_spill] sm:$0xff] %v11827_v19  ;;  %v11845_v37 = vmul.f32 %v11728_v41, %v12211_v55  ;;  %v11849_v27 = vmul.f32 %v11730_v46, %v12211_v55  ;;  %v11853_v51 = vmul.f32 %v11732_v61, %v12211_v55  ;;  %vm7686_vm6 = vcmp.ge.f32.partialorder %v11823_v36, 0.0 }
 0x89d   : > { %v11857_v25 = vmul.f32 %v11734_v22, %v12211_v55  ;;  %v7694_v0 = vmul.f32 %v11739_v1, %v12211_v55  ;;  %v7695_v60 = vmul.f32 %v11741_v11, %v12211_v55  ;;  %v7696_v26 = vmul.f32 %v11743_v49, %v12211_v55 }
 0x89e   : > { %v7697_v17 = vmul.f32 %v11745_v45, %v12211_v55  ;;  %v7698_v5 = vmul.f32 %v11751_v3, %v12211_v55  ;;  %v7699_v16 = vmul.f32 %v11754_v56, %v12211_v55  ;;  %v7700_v14 = vmul.f32 %v11757_v2, %v12211_v55 }
 0x89f   : > { %v7701_v40 = vmul.f32 %v11760_v34, %v12211_v55  ;;  %v7702_v53 = vmul.f32 %v11766_v7, %v12211_v55  ;;  %v7703_v59 = vmul.f32 %v11769_v31, %v12211_v55  ;;  %v7704_v57 = vmul.f32 %v11772_v10, %v12211_v55 }
 0x8a0   : > { %v7705_v47 = vmul.f32 %v11775_v15, %v12211_v55  ;;  %v7706_v28 = vmul.f32 %v11781_v8, %v12211_v55  ;;  %v7707_v30 = vmul.f32 %v11784_v18, %v12211_v55  ;;  %v7708_v63 = vmul.f32 %v11787_v4, %v12211_v55 }
 0x8a1   : > { %v7709_v43 = vmul.f32 %v11790_v29, %v12211_v55  ;;  %v7710_v54 = vmul.f32 %v11796_v20, %v12211_v55  ;;  %v7711_v44 = vmul.f32 %v11799_v52, %v12211_v55  ;;  %v7712_v24 = vmul.f32 %v11802_v9, %v12211_v55 }
 0x8a2   : > { %v7713_v12 = vmul.f32 %v11805_v62, %v12211_v55  ;;  %vm7687_vm7 = vcmp.ge.f32.partialorder %v11825_v39, 0.0  ;;  %vm7688_vm8 = vcmp.ge.f32.partialorder %v11827_v19, 0.0  ;;  %vm7689_vm5 = vcmp.ge.f32.partialorder %v11829_v6, 0.0 }
 0x8a3   : > { %v7714_v58 = vmul.f32 %v11807_v38, %v12211_v55  ;;  %v7715_v42 = vmul.f32 %v11809_v48, %v12211_v55  ;;  %v7716_v23 = vmul.f32 %v11811_v35, %v12211_v55  ;;  %v7717_v62 = vmul.f32 %v11813_v33, %v12211_v55 }
 0x8a4   : > { %v7718_v9 = vmul.f32 %v11815_v32, %v12211_v55  ;;  %v7719_v38 = vmul.f32 %v11817_v50, %v12211_v55  ;;  %v7720_v35 = vmul.f32 %v11819_v21, %v12211_v55  ;;  %v7721_v33 = vmul.f32 %v11821_v13, %v12211_v55 }
 0x8a5   : > { %v11949_v48 = vmul.f32 %v11823_v36, %v12211_v55  ;;  %v11953_v32 = vmul.f32 %v11825_v39, %v12211_v55  ;;  %v11957_v50 = vmul.f32 %v11827_v19, %v12211_v55  ;;  %v11961_v21 = vmul.f32 %v11829_v6, %v12211_v55 }
 0x8a6   : > { %v7726_v13 = vsel %vm7654_vm9, %v11728_v41, %v11845_v37  ;;  %v7727_v39 = vsel %vm7655_vm10, %v11730_v46, %v11849_v27  ;;  %v7728_v19 = vsel %vm7656_vm11, %v11732_v61, %v11853_v51  ;;  %v7729_v55 = vsel %vm7657_vm12, %v11734_v22, %v11857_v25  ;;  %v12231_v27 = vld [vmem:[#allocation11_spill] sm:$0xff]  ;;  %v12233_v25 = vld [vmem:[#allocation12_spill] sm:$0xff] }
 0x8a7   : > { %v7730_v41 = vsel %vm7658_vm13, %v11739_v1, %v7694_v0  ;;  %v7731_v46 = vsel %vm7659_vm14, %v11741_v11, %v7695_v60  ;;  %v7732_v37 = vsel %vm7660_vm15, %v11743_v49, %v7696_v26  ;;  %v7733_v61 = vsel %vm7661_vm1, %v11745_v45, %v7697_v17  ;;  %7762 = vst.msk [vmem:[%s11937_s18] sm:$0xff] %vm852_vm0, %v7726_v13  ;;  %v12235_v60 = vld [vmem:[#allocation13_spill] sm:$0xff]  ;;  %v12237_v17 = vld [vmem:[#allocation14_spill] sm:$0xff] }
 0x8a8   : > { %7763 = vst.msk [vmem:[%s11937_s18 + $0x8] sm:$0xff] %vm852_vm0, %v7727_v39  ;;  %7764 = vst.msk [vmem:[%s11937_s18 + $0x10] sm:$0xff] %vm852_vm0, %v7728_v19  ;;  %v7734_v49 = vsel %vm7662_vm2, %v11751_v3, %v7698_v5  ;;  %v7735_v22 = vsel %vm7663_vm3, %v11754_v56, %v7699_v16  ;;  %v7736_v1 = vsel %vm7664_vm4, %v11757_v2, %v7700_v14  ;;  %vm12212_vm9 = vcmp.ge.f32.partialorder %v11760_v34, 0.0  ;;  %v12229_v39 = vld [vmem:[#allocation10_spill] sm:$0xff]  ;;  %v12239_v5 = vld [vmem:[#allocation15_spill] sm:$0xff] }
 0x8a9   : > { %7765 = vst.msk [vmem:[%s11937_s18 + $0x18] sm:$0xff] %vm852_vm0, %v7729_v55  ;;  %v7737_v11 = vsel %vm12212_vm9, %v11760_v34, %v7701_v40  ;;  %7766 = vst.msk [vmem:[%s11937_s18 + $0x20] sm:$0xff] %vm852_vm0, %v7730_v41  ;;  %vm12213_vm10 = vcmp.ge.f32.partialorder %v11766_v7, 0.0  ;;  %vm12214_vm11 = vcmp.ge.f32.partialorder %v11769_v31, 0.0  ;;  %vm12215_vm12 = vcmp.ge.f32.partialorder %v11772_v10, 0.0  ;;  %v12241_v14 = vld [vmem:[#allocation16_spill] sm:$0xff] }
 0x8aa   : > { %7767 = vst.msk [vmem:[%s11937_s18 + $0x28] sm:$0xff] %vm852_vm0, %v7731_v46  ;;  %7768 = vst.msk [vmem:[%s11937_s18 + $0x30] sm:$0xff] %vm852_vm0, %v7732_v37  ;;  %v7738_v45 = vsel %vm12213_vm10, %v11766_v7, %v7702_v53  ;;  %v7739_v3 = vsel %vm12214_vm11, %v11769_v31, %v7703_v59  ;;  %v7740_v56 = vsel %vm12215_vm12, %v11772_v10, %v7704_v57  ;;  %vm12216_vm13 = vcmp.ge.f32.partialorder %v11775_v15, 0.0 }
 0x8ab   : > { %7769 = vst.msk [vmem:[%s11937_s18 + $0x38] sm:$0xff] %vm852_vm0, %v7733_v61  ;;  %v7741_v2 = vsel %vm12216_vm13, %v11775_v15, %v7705_v47  ;;  %7770 = vst.msk [vmem:[%s11937_s18 + $0x40] sm:$0xff] %vm852_vm0, %v7734_v49  ;;  %vm12217_vm14 = vcmp.ge.f32.partialorder %v11781_v8, 0.0  ;;  %vm12218_vm15 = vcmp.ge.f32.partialorder %v11784_v18, 0.0  ;;  %vm12219_vm1 = vcmp.ge.f32.partialorder %v11787_v4, 0.0 }
 0x8ac   : > { %7771 = vst.msk [vmem:[%s11937_s18 + $0x48] sm:$0xff] %vm852_vm0, %v7735_v22  ;;  %7772 = vst.msk [vmem:[%s11937_s18 + $0x50] sm:$0xff] %vm852_vm0, %v7736_v1  ;;  %v7742_v34 = vsel %vm12217_vm14, %v11781_v8, %v7706_v28  ;;  %v7743_v7 = vsel %vm12218_vm15, %v11784_v18, %v7707_v30  ;;  %v7744_v31 = vsel %vm12219_vm1, %v11787_v4, %v7708_v63  ;;  %vm12220_vm2 = vcmp.ge.f32.partialorder %v11790_v29, 0.0  ;;  %v12223_v18 = vld [vmem:[#allocation7_spill] sm:$0xff] }
 0x8ad   : > { %7773 = vst.msk [vmem:[%s11937_s18 + $0x58] sm:$0xff] %vm852_vm0, %v7737_v11  ;;  %v7745_v10 = vsel %vm12220_vm2, %v11790_v29, %v7709_v43  ;;  %7774 = vst.msk [vmem:[%s11937_s18 + $0x60] sm:$0xff] %vm852_vm0, %v7738_v45  ;;  %vm12221_vm3 = vcmp.ge.f32.partialorder %v11796_v20, 0.0  ;;  %vm12222_vm4 = vcmp.ge.f32.partialorder %v11799_v52, 0.0  ;;  %vm12224_vm9 = vcmp.ge.f32.partialorder %v12223_v18, 0.0  ;;  %v12225_v29 = vld [vmem:[#allocation8_spill] sm:$0xff] }
 0x8ae   : > { %7775 = vst.msk [vmem:[%s11937_s18 + $0x68] sm:$0xff] %vm852_vm0, %v7739_v3  ;;  %7776 = vst.msk [vmem:[%s11937_s18 + $0x70] sm:$0xff] %vm852_vm0, %v7740_v56  ;;  %v7746_v15 = vsel %vm12221_vm3, %v11796_v20, %v7710_v54  ;;  %v7747_v8 = vsel %vm12222_vm4, %v11799_v52, %v7711_v44  ;;  %v7748_v4 = vsel %vm12224_vm9, %v12223_v18, %v7712_v24  ;;  %vm12226_vm10 = vcmp.ge.f32.partialorder %v12225_v29, 0.0  ;;  %v12227_v20 = vld [vmem:[#allocation9_spill] sm:$0xff] }
 0x8af   : > { %7777 = vst.msk [vmem:[%s11937_s18 + $0x78] sm:$0xff] %vm852_vm0, %v7741_v2  ;;  %v7749_v13 = vsel %vm12226_vm10, %v12225_v29, %v7713_v12  ;;  %7778 = vst.msk [vmem:[%s11937_s18 + $0x80] sm:$0xff] %vm852_vm0, %v7742_v34  ;;  %vm12228_vm11 = vcmp.ge.f32.partialorder %v12227_v20, 0.0  ;;  %vm12230_vm12 = vcmp.ge.f32.partialorder %v12229_v39, 0.0  ;;  %vm12232_vm13 = vcmp.ge.f32.partialorder %v12231_v27, 0.0 }
 0x8b0   : > { %7779 = vst.msk [vmem:[%s11937_s18 + $0x88] sm:$0xff] %vm852_vm0, %v7743_v7  ;;  %7780 = vst.msk [vmem:[%s11937_s18 + $0x90] sm:$0xff] %vm852_vm0, %v7744_v31  ;;  %v7750_v52 = vsel %vm12228_vm11, %v12227_v20, %v7714_v58  ;;  %v7751_v19 = vsel %vm12230_vm12, %v12229_v39, %v7715_v42  ;;  %v7752_v51 = vsel %vm12232_vm13, %v12231_v27, %v7716_v23  ;;  %vm12234_vm14 = vcmp.ge.f32.partialorder %v12233_v25, 0.0 }
 0x8b1   : > { %7781 = vst.msk [vmem:[%s11937_s18 + $0x98] sm:$0xff] %vm852_vm0, %v7745_v10  ;;  %v7753_v0 = vsel %vm12234_vm14, %v12233_v25, %v7717_v62  ;;  %7782 = vst.msk [vmem:[%s11937_s18 + $0xa0] sm:$0xff] %vm852_vm0, %v7746_v15  ;;  %vm12236_vm15 = vcmp.ge.f32.partialorder %v12235_v60, 0.0  ;;  %vm12238_vm1 = vcmp.ge.f32.partialorder %v12237_v17, 0.0  ;;  %vm12240_vm2 = vcmp.ge.f32.partialorder %v12239_v5, 0.0 }
 0x8b2   : > { %7783 = vst.msk [vmem:[%s11937_s18 + $0xa8] sm:$0xff] %vm852_vm0, %v7747_v8  ;;  %7784 = vst.msk [vmem:[%s11937_s18 + $0xb0] sm:$0xff] %vm852_vm0, %v7748_v4  ;;  %v7754_v26 = vsel %vm12236_vm15, %v12235_v60, %v7718_v9  ;;  %v7755_v62 = vsel %vm12238_vm1, %v12237_v17, %v7719_v38  ;;  %v7756_v16 = vsel %vm12240_vm2, %v12239_v5, %v7720_v35  ;;  %vm12242_vm3 = vcmp.ge.f32.partialorder %v12241_v14, 0.0  ;;  %v12243_v38 = vld [vmem:[#allocation17_spill] sm:$0xff] }
 0x8b3   : > { %7785 = vst.msk [vmem:[%s11937_s18 + $0xb8] sm:$0xff] %vm852_vm0, %v7749_v13  ;;  %v7757_v40 = vsel %vm12242_vm3, %v12241_v14, %v7721_v33  ;;  %7786 = vst.msk [vmem:[%s11937_s18 + $0xc0] sm:$0xff] %vm852_vm0, %v7750_v52  ;;  %v7758_v9 = vsel %vm7686_vm6, %v11823_v36, %v11949_v48  ;;  %v7759_v35 = vsel %vm7687_vm7, %v12243_v38, %v11953_v32  ;;  %v12244_v33 = vld [vmem:[#allocation18_spill] sm:$0xff] }
 0x8b4   : > { %7787 = vst.msk [vmem:[%s11937_s18 + $0xc8] sm:$0xff] %vm852_vm0, %v7751_v19  ;;  %7788 = vst.msk [vmem:[%s11937_s18 + $0xd0] sm:$0xff] %vm852_vm0, %v7752_v51  ;;  %v7760_v53 = vsel %vm7688_vm8, %v12244_v33, %v11957_v50  ;;  %v7761_v59 = vsel %vm7689_vm5, %v11829_v6, %v11961_v21 }
 0x8b5   : > { %7789 = vst.msk [vmem:[%s11937_s18 + $0xd8] sm:$0xff] %vm852_vm0, %v7753_v0  ;;  %7790 = vst.msk [vmem:[%s11937_s18 + $0xe0] sm:$0xff] %vm852_vm0, %v7754_v26 }
 0x8b6   : > { %7791 = vst.msk [vmem:[%s11937_s18 + $0xe8] sm:$0xff] %vm852_vm0, %v7755_v62  ;;  %7792 = vst.msk [vmem:[%s11937_s18 + $0xf0] sm:$0xff] %vm852_vm0, %v7756_v16 }
 0x8b7   : > { %7793 = vst.msk [vmem:[%s11937_s18 + $0xf8] sm:$0xff] %vm852_vm0, %v7757_v40  ;;  %7794 = vst.msk [vmem:[%s11937_s18 + $0x100] sm:$0xff] %vm852_vm0, %v7758_v9 }
 0x8b8   : > { %7795 = vst.msk [vmem:[%s11937_s18 + $0x108] sm:$0xff] %vm852_vm0, %v7759_v35  ;;  %7796 = vst.msk [vmem:[%s11937_s18 + $0x110] sm:$0xff] %vm852_vm0, %v7760_v53 }
 0x8b9   : > { %7797 = vst.msk [vmem:[%s11937_s18 + $0x118] sm:$0xff] %vm852_vm0, %v7761_v59 }
 0x8ba PF: > { %s23_s21 = sadd.s32 1, %s10008_s21  }
 0x8bb   : > { %p20_p4 = scmp.ge.s32.totalorder %s23_s21, 4  }
 0x8bd   :  { %22 = sbr.rel (!%p20_p4) target bundleno = 3 (0x3), region = 110 }

</bundles_post_ra>
